<compile_context>
chip_gen: v7x
topology: tpu7x:2x2x1
jax: 0.10.0
libtpu: 0.0.40
codegen_flags: <defaults>
</compile_context>

<pallas_src>
import numpy as np
import jax
import jax.numpy as jnp
from jax.experimental import pallas as pl
from jax.experimental.pallas import tpu as pltpu

LRELU_SLOPE = 0.2
LRELU_GAIN = float(np.sqrt(2.0))   # bias_act 'lrelu' default gain
LANE = 128                         # TPU lane width / padded tail width


def prepare_dpose_params(params, in_channel, weight_dtype=jnp.bfloat16):
    """One-time parameter preparation (do NOT run per forward call).

    params: list of 5 (weight [out, in], bias [out]) pairs in PyTorch convention
    for (in_channel+25)->2048->512->128->32->6.

    Returns packed, pre-scaled, pre-transposed buffers:
      w1_feat  [in_channel, 2048]   weight_dtype
      w2       [2048, 512]          weight_dtype
      tail     [512+128+128, 128]   weight_dtype  (w3 | w4 pad | w5 pad)
      cam_bias [n_cam+5 (pad to 8), 2048] float32 (w1_cam rows, then b1..b5 rows)
    """
    assert len(params) == 5
    scaled = []
    for i, (w, b) in enumerate(params):
        fan_in = w.shape[1]
        gain = 1.0 / np.sqrt(fan_in)            # equalized-lr weight gain
        if i > 0:
            # Previous layer's lrelu sqrt(2) gain: folding into THIS layer's
            # weight is valid because the scalar gain commutes with the linear
            # map ((g*h) @ W == h @ (g*W)); it is unrelated to lrelu itself.
            gain *= LRELU_GAIN
        w_t = jnp.transpose(w).astype(jnp.float32) * jnp.float32(gain)  # [in, out]
        scaled.append((w_t, b.astype(jnp.float32)))

    (w1, b1), (w2, b2), (w3, b3), (w4, b4), (w5, b5) = scaled
    d1, d2, d3, d4, d5 = (w1.shape[1], w2.shape[1], w3.shape[1],
                          w4.shape[1], w5.shape[1])
    assert d3 == LANE and d4 <= LANE and d5 <= LANE and w4.shape[0] == d3

    w1_feat = w1[:in_channel]                   # [in_channel, 2048]
    w1_cam = w1[in_channel:]                    # [25, 2048]
    n_cam = w1_cam.shape[0]

    # --- tail pack: w3 | w4 | w5, zero-padded to lane-dense 128-wide blocks ---
    w4_p = jnp.zeros((d3, LANE), jnp.float32).at[:, :d4].set(w4)     # [128,128]
    w5_p = jnp.zeros((LANE, LANE), jnp.float32).at[:d4, :d5].set(w5)  # [128,128]
    tail = jnp.concatenate([w3, w4_p, w5_p], axis=0)                  # [768,128]

    # --- cam + bias pack (kept in float32 for accuracy; ~260 KiB total) ------
    def bias_row(b):
        return jnp.zeros((1, d1), jnp.float32).at[0, :b.shape[0]].set(b)

    cam_bias = jnp.concatenate(
        [w1_cam, bias_row(b1), bias_row(b2), bias_row(b3),
         bias_row(b4), bias_row(b5)], axis=0)                         # [n_cam+5, 2048]
    pad_rows = (-cam_bias.shape[0]) % 8
    if pad_rows:
        cam_bias = jnp.pad(cam_bias, ((0, pad_rows), (0, 0)))

    return {
        "w1_feat": w1_feat.astype(weight_dtype),
        "w2": w2.astype(weight_dtype),
        "tail": tail.astype(weight_dtype),
        "cam_bias": cam_bias,                   # float32
        "n_cam": n_cam,
        "dims": (d1, d2, d3, d4, d5),
    }


def dpose_branch_forward(feature, camera_parameters, prepped, *, batch_tile=512):
    """feature: [B, in_channel] f32, camera_parameters: [B, 25] f32.
    prepped: output of prepare_dpose_params().  Returns pose [B, 6] f32."""
    B, fdim = feature.shape
    cdim = camera_parameters.shape[1]
    d1, d2, d3, d4, d5 = prepped["dims"]
    n_cam = prepped["n_cam"]
    assert cdim == n_cam, (cdim, n_cam)

    w1_feat = prepped["w1_feat"]
    w2 = prepped["w2"]
    tail = prepped["tail"]
    cam_bias = prepped["cam_bias"]
    r3 = tail.shape[0] - 2 * LANE            # rows of w3 (== d2)
    assert r3 == d2

    tile = B if B <= batch_tile else batch_tile
    grid = (pl.cdiv(B, tile),)

    def kernel(feat_ref, cam_ref, w1f_ref, cb_ref, w2_hbm, tail_hbm,
               out_ref, w2_vmem, tail_vmem, sems):
        step = pl.program_id(0)

        # Kick off the w2 / tail weight DMAs immediately so they overlap the
        # layer-1 matmuls below.  Only on step 0: the single-buffered scratch
        # stays resident for later batch tiles (valid because the grid axis is
        # "arbitrary", i.e. runs sequentially on one core).
        @pl.when(step == 0)
        def _start_weight_fetch():
            pltpu.make_async_copy(w2_hbm, w2_vmem, sems.at[0]).start()
            pltpu.make_async_copy(tail_hbm, tail_vmem, sems.at[1]).start()

        def lrelu(y):
            # sqrt(2) gain is folded into the NEXT layer's pre-scaled weight
            # (scalar gain commutes with a linear map), so only the slope
            # remains in the kernel epilogue.
            return jnp.where(y >= 0.0, y, LRELU_SLOPE * y)

        wdt = w1f_ref.dtype
        # Layer 1: torch.cat([feature, camera], dim=1) is replaced by a split
        # matmul.  The camera half of the weight and the bias stay in f32.
        y1 = (jnp.dot(feat_ref[...].astype(wdt), w1f_ref[...],
                      preferred_element_type=jnp.float32)
              + jnp.dot(cam_ref[...], cb_ref[0:n_cam, :],
                        preferred_element_type=jnp.float32)
              + cb_ref[n_cam:n_cam + 1, :])
        h = lrelu(y1)

        @pl.when(step == 0)
        def _wait_weight_fetch():
            pltpu.make_async_copy(w2_hbm, w2_vmem, sems.at[0]).wait()
            pltpu.make_async_copy(tail_hbm, tail_vmem, sems.at[1]).wait()

        def fc(x, w, b):
            # MXU matmul in the weight dtype with f32 accumulation;
            # bias add / epilogue stay in f32.
            return jnp.dot(x.astype(w.dtype), w,
                           preferred_element_type=jnp.float32) + b

        h = lrelu(fc(h, w2_vmem[...],
                     cb_ref[n_cam + 1:n_cam + 2, 0:d2]))
        h = lrelu(fc(h, tail_vmem[0:r3, :],
                     cb_ref[n_cam + 2:n_cam + 3, 0:d3]))
        h = lrelu(fc(h, tail_vmem[r3:r3 + LANE, :],
                     cb_ref[n_cam + 3:n_cam + 4, 0:LANE]))
        # Final layer: linear.  Output kept lane-dense (padded to 128 cols,
        # padding columns are exactly zero by construction).
        out_ref[...] = fc(h, tail_vmem[r3 + LANE:r3 + 2 * LANE, :],
                          cb_ref[n_cam + 4:n_cam + 5, 0:LANE]
                          ).astype(out_ref.dtype)

    def act_spec(nc):                        # tiled over the batch axis
        return pl.BlockSpec((tile, nc), lambda i: (i, 0))

    def const_spec(arr):                     # whole array, constant block index
        return pl.BlockSpec(arr.shape, lambda i: (0, 0))

    out = pl.pallas_call(
        kernel,
        out_shape=jax.ShapeDtypeStruct((B, LANE), jnp.float32),
        grid=grid,
        in_specs=[act_spec(fdim),
                  act_spec(cdim),
                  const_spec(w1_feat),
                  const_spec(cam_bias),
                  pl.BlockSpec(memory_space=pl.ANY),    # w2   (manual DMA)
                  pl.BlockSpec(memory_space=pl.ANY)],   # tail (manual DMA)
        out_specs=act_spec(LANE),
        scratch_shapes=[pltpu.VMEM(w2.shape, w2.dtype),
                        pltpu.VMEM(tail.shape, tail.dtype),
                        pltpu.SemaphoreType.DMA((2,))],
        compiler_params=pltpu.CompilerParams(
            # "arbitrary": avoids per-core duplication of the constant weight
            # DMAs on v7x megacore and keeps the step==0 fetch guard correct.
            dimension_semantics=("arbitrary",),
            vmem_limit_bytes=32 << 20,
        ),
    )(feature, camera_parameters, w1_feat, cam_bias, w2, tail)
    return out[:, :d5]


def dpose_branch_reference(feature, camera_parameters, params):
    """Pure-JAX f32 reference mirroring the PyTorch forward exactly."""
    x = jnp.concatenate([feature, camera_parameters], axis=1)
    n = len(params)
    for i, (w, b) in enumerate(params):
        gain = 1.0 / float(np.sqrt(w.shape[1]))
        y = x @ (w * gain).T + b[None, :]
        if i < n - 1:   # 'lrelu'
            y = jnp.where(y >= 0.0, y, LRELU_SLOPE * y) * LRELU_GAIN
        x = y
    return x


def dpose_branch_reference_prepped(feature, camera_parameters, prepped):
    """Mirrors the kernel math on the packed (possibly bf16) params."""
    d1, d2, d3, d4, d5 = prepped["dims"]
    n_cam = prepped["n_cam"]
    cb = prepped["cam_bias"]
    tail = prepped["tail"]
    r3 = tail.shape[0] - 2 * LANE
    w1c = cb[:n_cam]
    b1 = cb[n_cam:n_cam + 1, :d1]
    b2 = cb[n_cam + 1:n_cam + 2, :d2]
    b3 = cb[n_cam + 2:n_cam + 3, :d3]
    b4 = cb[n_cam + 3:n_cam + 4, :LANE]
    b5 = cb[n_cam + 4:n_cam + 5, :LANE]
    w3 = tail[:r3]
    w4 = tail[r3:r3 + LANE]
    w5 = tail[r3 + LANE:]
    wdt = prepped["w1_feat"].dtype

    def lrelu(y):
        return jnp.where(y >= 0.0, y, LRELU_SLOPE * y)

    y = (jnp.dot(feature.astype(wdt), prepped["w1_feat"],
                 preferred_element_type=jnp.float32)
         + jnp.dot(camera_parameters, w1c, preferred_element_type=jnp.float32)
         + b1)
    h = lrelu(y)
    h = lrelu(jnp.dot(h.astype(wdt), prepped["w2"],
                      preferred_element_type=jnp.float32) + b2)
    h = lrelu(jnp.dot(h.astype(tail.dtype), w3,
                      preferred_element_type=jnp.float32) + b3)
    h = lrelu(jnp.dot(h.astype(tail.dtype), w4,
                      preferred_element_type=jnp.float32) + b4)
    y = jnp.dot(h.astype(tail.dtype), w5,
                preferred_element_type=jnp.float32) + b5
    return y[:, :d5]


def make_params(key, in_channel):
    """Deterministic synthetic parameters; shapes follow DPoseBranch.__init__."""
    dims = [in_channel + 25, 2048, 512, 128, 32, 6]
    params = []
    for i in range(len(dims) - 1):
        key, kw, kb = jax.random.split(key, 3)
        w = jax.random.normal(kw, (dims[i + 1], dims[i]), dtype=jnp.float32)
        # __init__ uses bias_init=0; small random bias here to exercise the add.
        b = 0.1 * jax.random.normal(kb, (dims[i + 1],), dtype=jnp.float32)
        params.append((w, b))
    return params


if __name__ == "__main__":
    B = 4
    in_channel = 4   # before the +25 camera parameters
    key = jax.random.PRNGKey(0)
    k_feat, k_cam, k_par = jax.random.split(key, 3)

    feature = jax.random.normal(k_feat, (B, in_channel), dtype=jnp.float32)
    camera_parameters = jax.random.normal(k_cam, (B, 25), dtype=jnp.float32)
    params = make_params(k_par, in_channel)

    ref = dpose_branch_reference(feature, camera_parameters, params)

    # --- f32 weights: strict check against the PyTorch-style math -----------
    prep_f32 = prepare_dpose_params(params, in_channel, weight_dtype=jnp.float32)
    pose_f32 = jax.block_until_ready(
        dpose_branch_forward(feature, camera_parameters, prep_f32))
    np.testing.assert_allclose(np.asarray(pose_f32), np.asarray(ref),
                               rtol=1e-4, atol=1e-4)

    # --- bf16 weights (default fast path: halves the dominant weight DMA) ---
    prep_bf16 = prepare_dpose_params(params, in_channel)   # bfloat16 weights
    pose_bf16 = jax.block_until_ready(
        dpose_branch_forward(feature, camera_parameters, prep_bf16))
    # (a) kernel mechanics vs the same packed math in plain JAX
    ref_bf16 = dpose_branch_reference_prepped(feature, camera_parameters, prep_bf16)
    np.testing.assert_allclose(np.asarray(pose_bf16), np.asarray(ref_bf16),
                               rtol=1e-2, atol=1e-2)
    # (b) end-to-end pose error of the bf16 path vs the true f32 reference
    np.testing.assert_allclose(np.asarray(pose_bf16), np.asarray(ref),
                               rtol=5e-2, atol=5e-2)

    assert pose_f32.shape == (B, 6) and pose_bf16.shape == (B, 6)
    print("KERNEL_OK")
</pallas_src>

<mosaic_0001>
module attributes {stable_mosaic.version = 11 : i64} {
  func.func @kernel(%arg0: i32, %arg1: memref<4x4xf32, #tpu.memory_space<vmem>>, %arg2: memref<4x25xf32, #tpu.memory_space<vmem>>, %arg3: memref<4x2048xf32, #tpu.memory_space<vmem>>, %arg4: memref<32x2048xf32, #tpu.memory_space<vmem>>, %arg5: memref<2048x512xf32, #tpu.memory_space<any>>, %arg6: memref<768x128xf32, #tpu.memory_space<any>>, %arg7: memref<4x128xf32, #tpu.memory_space<vmem>>, %arg8: memref<2048x512xf32, #tpu.memory_space<vmem>>, %arg9: memref<768x128xf32, #tpu.memory_space<vmem>>, %arg10: memref<2x!tpu.dma_semaphore, #tpu.memory_space<semaphore_mem>>) attributes {dimension_semantics = [#tpu.dimension_semantics<arbitrary>], iteration_bounds = array<i64: 1>, scalar_prefetch = 0 : i64, scratch_operands = 3 : i64, tpu.core_type = #tpu.core_type<tc>, window_params = [{transform_indices = @transform_0, window_bounds = array<i64: 4, 4>}, {transform_indices = @transform_1, window_bounds = array<i64: 4, 25>}, {pipeline_mode = #tpu.pipeline_mode<synchronous>, transform_indices = @transform_2, window_bounds = array<i64: 4, 2048>}, {pipeline_mode = #tpu.pipeline_mode<synchronous>, transform_indices = @transform_3, window_bounds = array<i64: 32, 2048>}, {}, {}, {transform_indices = @transform_6, window_bounds = array<i64: 4, 128>}]} {
    %c0_i32 = arith.constant 0 : i32
    %0 = arith.cmpi eq, %arg0, %c0_i32 : i32
    %1 = arith.extui %0 : i1 to i32
    %c0_i32_0 = arith.constant 0 : i32
    %2 = arith.cmpi ne, %1, %c0_i32_0 : i32
    scf.if %2 {
      %c0_i32_36 = arith.constant 0 : i32
      %57 = tpu.memref_slice %arg10[%c0_i32_36] : memref<2x!tpu.dma_semaphore, #tpu.memory_space<semaphore_mem>> -> memref<1x!tpu.dma_semaphore, #tpu.memory_space<semaphore_mem>>
      %58 = tpu.memref_squeeze %57 : memref<1x!tpu.dma_semaphore, #tpu.memory_space<semaphore_mem>> -> memref<!tpu.dma_semaphore, #tpu.memory_space<semaphore_mem>>
      tpu.enqueue_dma source(%arg5 : memref<2048x512xf32, #tpu.memory_space<any>>) target(%arg8 : memref<2048x512xf32, #tpu.memory_space<vmem>>) target_semaphore(%58 : memref<!tpu.dma_semaphore, #tpu.memory_space<semaphore_mem>>)
      %c1_i32 = arith.constant 1 : i32
      %59 = tpu.memref_slice %arg10[%c1_i32] : memref<2x!tpu.dma_semaphore, #tpu.memory_space<semaphore_mem>> -> memref<1x!tpu.dma_semaphore, #tpu.memory_space<semaphore_mem>>
      %60 = tpu.memref_squeeze %59 : memref<1x!tpu.dma_semaphore, #tpu.memory_space<semaphore_mem>> -> memref<!tpu.dma_semaphore, #tpu.memory_space<semaphore_mem>>
      tpu.enqueue_dma source(%arg6 : memref<768x128xf32, #tpu.memory_space<any>>) target(%arg9 : memref<768x128xf32, #tpu.memory_space<vmem>>) target_semaphore(%60 : memref<!tpu.dma_semaphore, #tpu.memory_space<semaphore_mem>>)
    } else {
    }
    %c0 = arith.constant 0 : index
    %c0_1 = arith.constant 0 : index
    %3 = vector.load %arg1[%c0, %c0_1] : memref<4x4xf32, #tpu.memory_space<vmem>>, vector<4x4xf32>
    %c0_2 = arith.constant 0 : index
    %c0_3 = arith.constant 0 : index
    %4 = vector.load %arg3[%c0_2, %c0_3] : memref<4x2048xf32, #tpu.memory_space<vmem>>, vector<4x2048xf32>
    %cst = arith.constant dense<0.000000e+00> : vector<4x2048xf32>
    %5 = tpu.matmul %3, %4, %cst {dimension_numbers = #tpu.dot_dimension_numbers<[1], [0], [0], [1], [0, 0, 1, 1], [], []>} : vector<4x4xf32>, vector<4x2048xf32>, vector<4x2048xf32> -> vector<4x2048xf32>
    %c0_4 = arith.constant 0 : index
    %c0_5 = arith.constant 0 : index
    %6 = vector.load %arg2[%c0_4, %c0_5] : memref<4x25xf32, #tpu.memory_space<vmem>>, vector<4x25xf32>
    %c0_6 = arith.constant 0 : index
    %c0_7 = arith.constant 0 : index
    %7 = vector.load %arg4[%c0_6, %c0_7] : memref<32x2048xf32, #tpu.memory_space<vmem>>, vector<25x2048xf32>
    %cst_8 = arith.constant dense<0.000000e+00> : vector<4x2048xf32>
    %8 = tpu.matmul %6, %7, %cst_8 {dimension_numbers = #tpu.dot_dimension_numbers<[1], [0], [0], [1], [0, 0, 1, 1], [], []>} : vector<4x25xf32>, vector<25x2048xf32>, vector<4x2048xf32> -> vector<4x2048xf32>
    %9 = arith.addf %5, %8 : vector<4x2048xf32>
    %c25 = arith.constant 25 : index
    %c0_9 = arith.constant 0 : index
    %10 = vector.load %arg4[%c25, %c0_9] : memref<32x2048xf32, #tpu.memory_space<vmem>>, vector<1x2048xf32>
    %11 = vector.broadcast %10 : vector<1x2048xf32> to vector<4x2048xf32>
    %12 = arith.addf %9, %11 : vector<4x2048xf32>
    %cst_10 = arith.constant 0.000000e+00 : f32
    %13 = vector.broadcast %cst_10 : f32 to vector<4x2048xf32>
    %14 = arith.cmpf oge, %12, %13 : vector<4x2048xf32>
    %cst_11 = arith.constant 2.000000e-01 : f32
    %15 = vector.broadcast %cst_11 : f32 to vector<4x2048xf32>
    %16 = arith.mulf %15, %12 : vector<4x2048xf32>
    %17 = arith.select %14, %12, %16 : vector<4x2048xi1>, vector<4x2048xf32>
    %c0_i32_12 = arith.constant 0 : i32
    %18 = arith.cmpi eq, %arg0, %c0_i32_12 : i32
    %19 = arith.extui %18 : i1 to i32
    %c0_i32_13 = arith.constant 0 : i32
    %20 = arith.cmpi ne, %19, %c0_i32_13 : i32
    scf.if %20 {
      %c0_i32_36 = arith.constant 0 : i32
      %57 = tpu.memref_slice %arg10[%c0_i32_36] : memref<2x!tpu.dma_semaphore, #tpu.memory_space<semaphore_mem>> -> memref<1x!tpu.dma_semaphore, #tpu.memory_space<semaphore_mem>>
      %58 = tpu.memref_squeeze %57 : memref<1x!tpu.dma_semaphore, #tpu.memory_space<semaphore_mem>> -> memref<!tpu.dma_semaphore, #tpu.memory_space<semaphore_mem>>
      tpu.wait_dma2 semaphore(%58 : memref<!tpu.dma_semaphore, #tpu.memory_space<semaphore_mem>>) src(%arg5 : memref<2048x512xf32, #tpu.memory_space<any>>) dst(%arg8 : memref<2048x512xf32, #tpu.memory_space<vmem>>)
      %c1_i32 = arith.constant 1 : i32
      %59 = tpu.memref_slice %arg10[%c1_i32] : memref<2x!tpu.dma_semaphore, #tpu.memory_space<semaphore_mem>> -> memref<1x!tpu.dma_semaphore, #tpu.memory_space<semaphore_mem>>
      %60 = tpu.memref_squeeze %59 : memref<1x!tpu.dma_semaphore, #tpu.memory_space<semaphore_mem>> -> memref<!tpu.dma_semaphore, #tpu.memory_space<semaphore_mem>>
      tpu.wait_dma2 semaphore(%60 : memref<!tpu.dma_semaphore, #tpu.memory_space<semaphore_mem>>) src(%arg6 : memref<768x128xf32, #tpu.memory_space<any>>) dst(%arg9 : memref<768x128xf32, #tpu.memory_space<vmem>>)
    } else {
    }
    %c0_14 = arith.constant 0 : index
    %c0_15 = arith.constant 0 : index
    %21 = vector.load %arg8[%c0_14, %c0_15] : memref<2048x512xf32, #tpu.memory_space<vmem>>, vector<2048x512xf32>
    %c26 = arith.constant 26 : index
    %c0_16 = arith.constant 0 : index
    %22 = vector.load %arg4[%c26, %c0_16] : memref<32x2048xf32, #tpu.memory_space<vmem>>, vector<1x512xf32>
    %cst_17 = arith.constant dense<0.000000e+00> : vector<4x512xf32>
    %23 = tpu.matmul %17, %21, %cst_17 {dimension_numbers = #tpu.dot_dimension_numbers<[1], [0], [0], [1], [0, 0, 1, 1], [], []>} : vector<4x2048xf32>, vector<2048x512xf32>, vector<4x512xf32> -> vector<4x512xf32>
    %24 = vector.broadcast %22 : vector<1x512xf32> to vector<4x512xf32>
    %25 = arith.addf %23, %24 : vector<4x512xf32>
    %cst_18 = arith.constant 0.000000e+00 : f32
    %26 = vector.broadcast %cst_18 : f32 to vector<4x512xf32>
    %27 = arith.cmpf oge, %25, %26 : vector<4x512xf32>
    %cst_19 = arith.constant 2.000000e-01 : f32
    %28 = vector.broadcast %cst_19 : f32 to vector<4x512xf32>
    %29 = arith.mulf %28, %25 : vector<4x512xf32>
    %30 = arith.select %27, %25, %29 : vector<4x512xi1>, vector<4x512xf32>
    %c0_20 = arith.constant 0 : index
    %c0_21 = arith.constant 0 : index
    %31 = vector.load %arg9[%c0_20, %c0_21] : memref<768x128xf32, #tpu.memory_space<vmem>>, vector<512x128xf32>
    %c27 = arith.constant 27 : index
    %c0_22 = arith.constant 0 : index
    %32 = vector.load %arg4[%c27, %c0_22] : memref<32x2048xf32, #tpu.memory_space<vmem>>, vector<1x128xf32>
    %cst_23 = arith.constant dense<0.000000e+00> : vector<4x128xf32>
    %33 = tpu.matmul %30, %31, %cst_23 {dimension_numbers = #tpu.dot_dimension_numbers<[1], [0], [0], [1], [0, 0, 1, 1], [], []>} : vector<4x512xf32>, vector<512x128xf32>, vector<4x128xf32> -> vector<4x128xf32>
    %34 = vector.broadcast %32 : vector<1x128xf32> to vector<4x128xf32>
    %35 = arith.addf %33, %34 : vector<4x128xf32>
    %cst_24 = arith.constant 0.000000e+00 : f32
    %36 = vector.broadcast %cst_24 : f32 to vector<4x128xf32>
    %37 = arith.cmpf oge, %35, %36 : vector<4x128xf32>
    %cst_25 = arith.constant 2.000000e-01 : f32
    %38 = vector.broadcast %cst_25 : f32 to vector<4x128xf32>
    %39 = arith.mulf %38, %35 : vector<4x128xf32>
    %40 = arith.select %37, %35, %39 : vector<4x128xi1>, vector<4x128xf32>
    %c512 = arith.constant 512 : index
    %c0_26 = arith.constant 0 : index
    %41 = vector.load %arg9[%c512, %c0_26] : memref<768x128xf32, #tpu.memory_space<vmem>>, vector<128x128xf32>
    %c28 = arith.constant 28 : index
    %c0_27 = arith.constant 0 : index
    %42 = vector.load %arg4[%c28, %c0_27] : memref<32x2048xf32, #tpu.memory_space<vmem>>, vector<1x128xf32>
    %cst_28 = arith.constant dense<0.000000e+00> : vector<4x128xf32>
    %43 = tpu.matmul %40, %41, %cst_28 {dimension_numbers = #tpu.dot_dimension_numbers<[1], [0], [0], [1], [0, 0, 1, 1], [], []>} : vector<4x128xf32>, vector<128x128xf32>, vector<4x128xf32> -> vector<4x128xf32>
    %44 = vector.broadcast %42 : vector<1x128xf32> to vector<4x128xf32>
    %45 = arith.addf %43, %44 : vector<4x128xf32>
    %cst_29 = arith.constant 0.000000e+00 : f32
    %46 = vector.broadcast %cst_29 : f32 to vector<4x128xf32>
    %47 = arith.cmpf oge, %45, %46 : vector<4x128xf32>
    %cst_30 = arith.constant 2.000000e-01 : f32
    %48 = vector.broadcast %cst_30 : f32 to vector<4x128xf32>
    %49 = arith.mulf %48, %45 : vector<4x128xf32>
    %50 = arith.select %47, %45, %49 : vector<4x128xi1>, vector<4x128xf32>
    %c640 = arith.constant 640 : index
    %c0_31 = arith.constant 0 : index
    %51 = vector.load %arg9[%c640, %c0_31] : memref<768x128xf32, #tpu.memory_space<vmem>>, vector<128x128xf32>
    %c29 = arith.constant 29 : index
    %c0_32 = arith.constant 0 : index
    %52 = vector.load %arg4[%c29, %c0_32] : memref<32x2048xf32, #tpu.memory_space<vmem>>, vector<1x128xf32>
    %cst_33 = arith.constant dense<0.000000e+00> : vector<4x128xf32>
    %53 = tpu.matmul %50, %51, %cst_33 {dimension_numbers = #tpu.dot_dimension_numbers<[1], [0], [0], [1], [0, 0, 1, 1], [], []>} : vector<4x128xf32>, vector<128x128xf32>, vector<4x128xf32> -> vector<4x128xf32>
    %54 = vector.broadcast %52 : vector<1x128xf32> to vector<4x128xf32>
    %55 = arith.addf %53, %54 : vector<4x128xf32>
    %c0_34 = arith.constant 0 : index
    %c0_35 = arith.constant 0 : index
    %56 = vector.load %arg7[%c0_34, %c0_35] : memref<4x128xf32, #tpu.memory_space<vmem>>, vector<4x128xf32>
    tpu.vector_store %arg7[%c0_34, %c0_35], %55 {strides = array<i32>} : memref<4x128xf32, #tpu.memory_space<vmem>>, vector<4x128xf32>,
    return
  }
  func.func @transform_0(%arg0: i32) -> (i32, i32) {
    %c0_i32 = arith.constant 0 : i32
    %c0_i32_0 = arith.constant 0 : i32
    return %arg0, %c0_i32 : i32, i32
  }
  func.func @transform_1(%arg0: i32) -> (i32, i32) {
    %c0_i32 = arith.constant 0 : i32
    %c0_i32_0 = arith.constant 0 : i32
    return %arg0, %c0_i32 : i32, i32
  }
  func.func @transform_2(%arg0: i32) -> (i32, i32) {
    %c0_i32 = arith.constant 0 : i32
    %c0_i32_0 = arith.constant 0 : i32
    %c0_i32_1 = arith.constant 0 : i32
    return %c0_i32, %c0_i32_0 : i32, i32
  }
  func.func @transform_3(%arg0: i32) -> (i32, i32) {
    %c0_i32 = arith.constant 0 : i32
    %c0_i32_0 = arith.constant 0 : i32
    %c0_i32_1 = arith.constant 0 : i32
    return %c0_i32, %c0_i32_0 : i32, i32
  }
  func.func @transform_6(%arg0: i32) -> (i32, i32) {
    %c0_i32 = arith.constant 0 : i32
    %c0_i32_0 = arith.constant 0 : i32
    return %arg0, %c0_i32 : i32, i32
  }
}

</mosaic_0001>

<bundles_post_ra>
// kernel: tpu_custom_call.1
= control target key start
LH: loop header
LB: loop body
LE: loop exit
PB: predicated region body
PF: predicated region fallthrough
CT: control target
= control target key end

     0   :  { %11 = vsyncpa [#allocation6], 0  ;;  %s6216_s0 = inlined_call_operand.hbm [shape: f32[4,4], index: 0, kind: input, shape index: {}]   ;;  %s6217_s1 = inlined_call_operand.hbm [shape: f32[4,25], index: 1, kind: input, shape index: {}]   ;;  %s6218_s2 = inlined_call_operand.hbm [shape: f32[4,2048], index: 2, kind: input, shape index: {}]   ;;  %s6219_s3 = inlined_call_operand.hbm [shape: f32[32,2048], index: 3, kind: input, shape index: {}]   ;;  %s6220_s4 = inlined_call_operand.hbm [shape: f32[2048,512], index: 4, kind: input, shape index: {}]   ;;  %s6221_s5 = inlined_call_operand.hbm [shape: f32[768,128], index: 5, kind: input, shape index: {}]   ;;  %s6222_s6 = inlined_call_operand.hbm [shape: f32[4,128], index: 6, kind: output, shape index: {}]  }
   0x1   :  { %12 = vsyncpa [#allocation9], 0 }
   0x2   :  { %13 = vsyncpa [#allocation12], 0 }
   0x3   :  { %14 = vsyncpa [#allocation7], 0  ;;  %s5863_s21 = smov [#allocation8]   ;;  %s5864_s23 = smov [#allocation5]  }
   0x4   :  { %s31_s22 = sshll.u32 %s5863_s21, 4  ;;  %s21_s24 = sshll.u32 %s5864_s23, 4  ;;  %s32_s22 = int_to_ptr.vmem [resolvable:$true] %s31_s22  ;;  %s22_s24 = int_to_ptr.vmem [resolvable:$true] %s21_s24 }
   0x5   :  { %s5697_s27 = scalar_lea.hbm %s6217_s1, 64 }
   0x6   :  { %p5698_p0 = scmp.ne.s32.totalorder %s6217_s1, %s5697_s27  ;;  %p5701_p1 = scmp.lt.u32.totalorder %s5697_s27, %s6217_s1 }
   0x8   :  { %p5703_p2 = pnand %p5701_p1, %p5698_p0 }
   0xa   :  { %5706 = shalt.err (!%p5703_p2)
}
   0xb   :  { %s5707_s8 = scalar_lea.vmem %s32_s22, 64  ;;  %p5712_p4 = scmp.lt.s32.totalorder %s32_s22, %s32_s22 }
   0xc   :  { %p5708_p3 = scmp.ne.s32.totalorder %s32_s22, %s5707_s8  ;;  %p5713_p5 = scmp.lt.s32.totalorder %s5707_s8, %s5707_s8 }
   0xe   :  { %p5714_p6 = por %p5713_p5, %p5712_p4 }
  0x10   :  { %p5715_p7 = pnand %p5714_p6, %p5708_p3 }
  0x12   :  { %5718 = shalt.err (!%p5715_p7)
}
  0x13   :  { %34 = dma.hbm_to_vmem [thread:$0]  %s6217_s1, 64, %s32_s22, [#allocation9]  }
  0x14   :  { %s5719_s13 = scalar_lea.hbm %s6216_s0, 64 }
  0x15   :  { %p5720_p8 = scmp.ne.s32.totalorder %s6216_s0, %s5719_s13  ;;  %p5723_p9 = scmp.lt.u32.totalorder %s5719_s13, %s6216_s0 }
  0x17   :  { %p5725_p10 = pnand %p5723_p9, %p5720_p8 }
  0x19   :  { %5728 = shalt.err (!%p5725_p10)
}
  0x1a   :  { %s5729_s18 = scalar_lea.vmem %s22_s24, 64  ;;  %p5734_p12 = scmp.lt.s32.totalorder %s22_s24, %s22_s24 }
  0x1b   :  { %p5730_p11 = scmp.ne.s32.totalorder %s22_s24, %s5729_s18  ;;  %p5735_p13 = scmp.lt.s32.totalorder %s5729_s18, %s5729_s18 }
  0x1d   :  { %p5736_p0 = por %p5735_p13, %p5734_p12 }
  0x1f   :  { %p5737_p1 = pnand %p5736_p0, %p5730_p11 }
  0x21   :  { %5740 = shalt.err (!%p5737_p1)
}
  0x22   :  { %24 = dma.hbm_to_vmem [thread:$0]  %s6216_s0, 64, %s22_s24, [#allocation6]  }
  0x23   :  { %s5865_s20 = smov [#allocation10]   ;;  %s5866_s22 = smov [#allocation11]  }
  0x24   :  { %s41_s21 = sshll.u32 %s5865_s20, 4  ;;  %s50_s23 = sshll.u32 %s5866_s22, 4  ;;  %s42_s21 = int_to_ptr.vmem [resolvable:$true] %s41_s21  ;;  %s5935_s23 = int_to_ptr.vmem [resolvable:$true] %s50_s23 }
  0x25   :  { %s5741_s27 = scalar_lea.hbm %s6218_s2, 1024 }
  0x26   :  { %p5742_p2 = scmp.ne.s32.totalorder %s6218_s2, %s5741_s27  ;;  %p5745_p3 = scmp.lt.u32.totalorder %s5741_s27, %s6218_s2 }
  0x28   :  { %p5747_p4 = pnand %p5745_p3, %p5742_p2 }
  0x2a   :  { %5750 = shalt.err (!%p5747_p4)
}
  0x2b   :  { %s5751_s0 = scalar_lea.vmem %s42_s21, 1024  ;;  %p5756_p6 = scmp.lt.s32.totalorder %s42_s21, %s42_s21 }
  0x2c   :  { %p5752_p5 = scmp.ne.s32.totalorder %s42_s21, %s5751_s0  ;;  %p5757_p7 = scmp.lt.s32.totalorder %s5751_s0, %s5751_s0 }
  0x2e   :  { %p5758_p8 = por %p5757_p7, %p5756_p6 }
  0x30   :  { %p5759_p9 = pnand %p5758_p8, %p5752_p5 }
  0x32   :  { %5762 = shalt.err (!%p5759_p9)
}
  0x33   :  { %44 = dma.hbm_to_vmem [thread:$0]  %s6218_s2, 1024, %s42_s21, [#allocation9]  }
  0x34   :  { %s5763_s11 = scalar_lea.hbm %s6219_s3, 8192 }
  0x35   :  { %p5764_p10 = scmp.ne.s32.totalorder %s6219_s3, %s5763_s11  ;;  %p5767_p11 = scmp.lt.u32.totalorder %s5763_s11, %s6219_s3 }
  0x37   :  { %p5769_p12 = pnand %p5767_p11, %p5764_p10 }
  0x39   :  { %5772 = shalt.err (!%p5769_p12)
}
  0x3a   :  { %s5773_s16 = scalar_lea.vmem %s5935_s23, 8192  ;;  %p5778_p0 = scmp.lt.s32.totalorder %s5935_s23, %s5935_s23 }
  0x3b   :  { %p5774_p13 = scmp.ne.s32.totalorder %s5935_s23, %s5773_s16  ;;  %p5779_p1 = scmp.lt.s32.totalorder %s5773_s16, %s5773_s16 }
  0x3d   :  { %p5780_p2 = por %p5779_p1, %p5778_p0 }
  0x3f   :  { %p5781_p3 = pnand %p5780_p2, %p5774_p13 }
  0x41   :  { %5784 = shalt.err (!%p5781_p3)
}
  0x42   :  { %s5867_s2 = smov 2048   ;;  %s5868_s17 = smov 128  }
  0x43   :  { %56 = dma.hbm_to_vmem [thread:$0]  %s6219_s3, 8192, %s5935_s23, [#allocation12], %s5867_s2, %s5867_s2, %s5868_s17  }
  0x44   :  { %5851 = dma.done.wait [#allocation6], 64  }
  0x45   :  { %5852 = vsyncadd [#allocation6], 4294967232 }
  0x46   :  { %5853 = dma.done.wait [#allocation9], 1088  }
  0x47   :  { %5854 = vsyncadd [#allocation9], 4294966208 }
  0x48   :  { %5855 = dma.done.wait [#allocation12], 8192  }
  0x49   :  { %5856 = vsyncadd [#allocation12], 4294959104  ;;  %v5869_v0 = vmov 0.0   ;;  %vm174_vm0 = vcmask 1040384   ;;  %vm5870_vm1 = vmmov 1   ;;  %v107_v2 = vld [vmem:[#allocation11 + $0x8] sm:$0xff] }
  0x4a   :  { %287 = vmatprep.mubr.f32.mxu0 %v5869_v0  ;;  %358 = vmatprep.mubr.f32.mxu1 %v5869_v0  ;;  %vm5968_vm2 = vmpackc.low %vm174_vm0, %vm5870_vm1  ;;  %v123_v3 = vld [vmem:[#allocation11 + $0x88] sm:$0xff]  ;;  %v109_v4 = vld [vmem:[#allocation11 + $0x18] sm:$0xff]  ;;  %vm170_vm3 = vcmask 203776   ;;  %vm811_vm4 = vcmask 1043456   ;;  %vm807_vm5 = vcmask 31744   ;;  %s5871_s3 = smov [#allocation2]  }
  0x4b   :  { %v4412_v5 = vpack.c.bf16 %v123_v3, %v107_v2  ;;  %v125_v6 = vld [vmem:[#allocation11 + $0x98] sm:$0xff]  ;;  %v106_v7 = vld [vmem:[#allocation11] sm:$0xff]  ;;  %v108_v11 = vld [vmem:[#allocation11 + $0x10] sm:$0xff]  ;;  %s80_s19 = sshll.u32 %s5871_s3, 4  ;;  %s5872_s20 = smov [#allocation3]   ;;  %s81_s19 = int_to_ptr.vmem [resolvable:$true] %s80_s19 }
  0x4c   :  { %v122_v8 = vld [vmem:[#allocation11 + $0x80] sm:$0xff]  ;;  %v4422_v9 = vpack.c.bf16 %v125_v6, %v109_v4  ;;  %v124_v12 = vld [vmem:[#allocation11 + $0x90] sm:$0xff]  ;;  %v139_v13 = vld [vmem:[#allocation11 + $0x108] sm:$0xff]  ;;  %s92_s21 = sshll.u32 %s5872_s20, 4  ;;  %s5785_s25 = scalar_lea.hbm %s6220_s4, 131072  ;;  %s93_s21 = int_to_ptr.vmem [resolvable:$true] %s92_s21 }
  0x4d   :  { %v4414_v10 = vpack.c.bf16 %v122_v8, %v106_v7  ;;  %4413 = vmatprep.subr.bf16.mxu0 %v4412_v5  ;;  %v4424_v14 = vpack.c.bf16 %v124_v12, %v108_v11  ;;  %v155_v15 = vld [vmem:[#allocation11 + $0x188] sm:$0x1]  ;;  %v141_v16 = vld [vmem:[#allocation11 + $0x118] sm:$0xff]  ;;  %v138_v20 = vld [vmem:[#allocation11 + $0x100] sm:$0xff]  ;;  %p5786_p4 = scmp.ne.s32.totalorder %s6220_s4, %s5785_s25  ;;  %p5789_p5 = scmp.lt.u32.totalorder %s5785_s25, %s6220_s4 }
  0x4e   :  { %v157_v17 = vld [vmem:[#allocation11 + $0x198] sm:$0x1]  ;;  %4423 = vmatprep.subr.bf16.mxu1 %v4422_v9  ;;  %v4416_v18 = vpack.c.bf16 %v155_v15, %v139_v13  ;;  %v154_v21 = vld [vmem:[#allocation11 + $0x180] sm:$0x1]  ;;  %v140_v22 = vld [vmem:[#allocation11 + $0x110] sm:$0xff] }
  0x4f   :  { %4415 = vmatpush1.bf16.msra.mxu0 %v4414_v10  ;;  %v4426_v19 = vpack.c.bf16 %v157_v17, %v141_v16  ;;  %4425 = vmatpush1.bf16.msra.mxu1 %v4424_v14  ;;  %v4419_v23 = vpack.c.bf16 %v154_v21, %v138_v20  ;;  %v156_v24 = vld [vmem:[#allocation11 + $0x190] sm:$0x1]  ;;  %v111_v25 = vld [vmem:[#allocation11 + $0x28] sm:$0xff]  ;;  %v113_v29 = vld [vmem:[#allocation11 + $0x38] sm:$0xff]  ;;  %p5791_p6 = pnand %p5789_p5, %p5786_p4 }
  0x50   :  { %v127_v26 = vld [vmem:[#allocation11 + $0xa8] sm:$0xff]  ;;  %4418 = vmatprep.subr.msk.bf16.mxu0 %vm5968_vm2, %v4416_v18  ;;  %v4429_v27 = vpack.c.bf16 %v156_v24, %v140_v22  ;;  %v129_v30 = vld [vmem:[#allocation11 + $0xb8] sm:$0xff]  ;;  %v110_v33 = vld [vmem:[#allocation11 + $0x20] sm:$0xff] }
  0x51   :  { %4428 = vmatprep.subr.msk.bf16.mxu1 %vm5968_vm2, %v4426_v19  ;;  %v4432_v28 = vpack.c.bf16 %v127_v26, %v111_v25  ;;  %v5976_v31 = vld [vmem:[#allocation8] sm:$0xf]  ;;  %v4442_v32 = vpack.c.bf16 %v129_v30, %v113_v29  ;;  %v126_v34 = vld [vmem:[#allocation11 + $0xa0] sm:$0xff]  ;;  %v112_v35 = vld [vmem:[#allocation11 + $0x30] sm:$0xff] }
  0x52   :  { %v4434_v36 = vpack.c.bf16 %v126_v34, %v110_v33  ;;  %v128_v37 = vld [vmem:[#allocation11 + $0xb0] sm:$0xff]  ;;  %v143_v38 = vld [vmem:[#allocation11 + $0x128] sm:$0xff]  ;;  %v145_v42 = vld [vmem:[#allocation11 + $0x138] sm:$0xff] }
  0x53   :  { %4421 = vmatpush1.bf16.msk.msra.mxu0 %vm5968_vm2, %v4419_v23  ;;  %v159_v39 = vld [vmem:[#allocation11 + $0x1a8] sm:$0x1]  ;;  %4431 = vmatpush1.bf16.msk.msra.mxu1 %vm5968_vm2, %v4429_v27  ;;  %v4444_v40 = vpack.c.bf16 %v128_v37, %v112_v35  ;;  %v161_v43 = vld [vmem:[#allocation11 + $0x1b8] sm:$0x1]  ;;  %v142_v44 = vld [vmem:[#allocation11 + $0x120] sm:$0xff] }
  0x54   :  { %4433 = vmatprep.subr.bf16.mxu0 %v4432_v28  ;;  %v4436_v41 = vpack.c.bf16 %v159_v39, %v143_v38  ;;  %4443 = vmatprep.subr.bf16.mxu1 %v4442_v32  ;;  %v4446_v45 = vpack.c.bf16 %v161_v43, %v145_v42  ;;  %v158_v46 = vld [vmem:[#allocation11 + $0x1a0] sm:$0x1]  ;;  %v144_v47 = vld [vmem:[#allocation11 + $0x130] sm:$0xff]  ;;  %v115_v49 = vld [vmem:[#allocation11 + $0x48] sm:$0xff] }
  0x55   :  { %v160_v48 = vld [vmem:[#allocation11 + $0x1b0] sm:$0x1]  ;;  %v131_v50 = vld [vmem:[#allocation11 + $0xc8] sm:$0xff]  ;;  %v117_v51 = vld [vmem:[#allocation11 + $0x58] sm:$0xff]  ;;  %v4439_v52 = vpack.c.bf16 %v158_v46, %v142_v44 }
  0x56   :  { %4190 = vmatmul.mubr.msk.f32.vlgmr.msra.gmra.mrb[0].mxu0 %vm170_vm3, %v5976_v31  ;;  %4193 = vmatmul.mubr.msk.f32.vlgmr.msra.gmra.mrb[0].mxu1 %vm170_vm3, %v5976_v31  ;;  %v133_v53 = vld [vmem:[#allocation11 + $0xd8] sm:$0xff]  ;;  %v4449_v54 = vpack.c.bf16 %v160_v48, %v144_v47  ;;  %v4452_v55 = vpack.c.bf16 %v131_v50, %v115_v49  ;;  %v114_v56 = vld [vmem:[#allocation11 + $0x40] sm:$0xff]  ;;  %v116_v58 = vld [vmem:[#allocation11 + $0x50] sm:$0xff] }
  0x57   :  { %4435 = vmatpush1.bf16.msra.mxu0 %v4434_v36  ;;  %4445 = vmatpush1.bf16.msra.mxu1 %v4444_v40  ;;  %v130_v57 = vld [vmem:[#allocation11 + $0xc0] sm:$0xff]  ;;  %v4462_v59 = vpack.c.bf16 %v133_v53, %v117_v51  ;;  %v132_v60 = vld [vmem:[#allocation11 + $0xd0] sm:$0xff]  ;;  %v147_v61 = vld [vmem:[#allocation11 + $0x148] sm:$0xff] }
  0x58   :  { %4438 = vmatprep.subr.msk.bf16.mxu0 %vm5968_vm2, %v4436_v41  ;;  %4448 = vmatprep.subr.msk.bf16.mxu1 %vm5968_vm2, %v4446_v45  ;;  %v163_v62 = vld [vmem:[#allocation11 + $0x1c8] sm:$0x1]  ;;  %v149_v63 = vld [vmem:[#allocation11 + $0x158] sm:$0xff]  ;;  %v4454_v3 = vpack.c.bf16 %v130_v57, %v114_v56  ;;  %v4464_v4 = vpack.c.bf16 %v132_v60, %v116_v58  ;;  %v146_v6 = vld [vmem:[#allocation11 + $0x140] sm:$0xff] }
  0x59   :  { %429 = vmatprep.mubr.f32.mxu0 %v5869_v0  ;;  %500 = vmatprep.mubr.f32.mxu1 %v5869_v0  ;;  %v165_v2 = vld [vmem:[#allocation11 + $0x1d8] sm:$0x1]  ;;  %v4456_v5 = vpack.c.bf16 %v163_v62, %v147_v61  ;;  %v162_v7 = vld [vmem:[#allocation11 + $0x1c0] sm:$0x1]  ;;  %v148_v8 = vld [vmem:[#allocation11 + $0x150] sm:$0xff] }
  0x5a   :  { %v4466_v9 = vpack.c.bf16 %v165_v2, %v149_v63  ;;  %v164_v10 = vld [vmem:[#allocation11 + $0x1d0] sm:$0x1]  ;;  %v119_v11 = vld [vmem:[#allocation11 + $0x68] sm:$0xff]  ;;  %v121_v13 = vld [vmem:[#allocation11 + $0x78] sm:$0xff]  ;;  %v4459_v15 = vpack.c.bf16 %v162_v7, %v146_v6 }
  0x5b   :  { %4441 = vmatpush1.bf16.msk.msra.mxu0 %vm5968_vm2, %v4439_v52  ;;  %4451 = vmatpush1.bf16.msk.msra.mxu1 %vm5968_vm2, %v4449_v54  ;;  %v135_v12 = vld [vmem:[#allocation11 + $0xe8] sm:$0xff]  ;;  %v137_v14 = vld [vmem:[#allocation11 + $0xf8] sm:$0xff]  ;;  %v4469_v16 = vpack.c.bf16 %v164_v10, %v148_v8  ;;  %v118_v18 = vld [vmem:[#allocation11 + $0x60] sm:$0xff] }
  0x5c   :  { %4453 = vmatprep.subr.bf16.mxu0 %v4452_v55  ;;  %4463 = vmatprep.subr.bf16.mxu1 %v4462_v59  ;;  %v4472_v17 = vpack.c.bf16 %v135_v12, %v119_v11  ;;  %v134_v19 = vld [vmem:[#allocation11 + $0xe0] sm:$0xff]  ;;  %v120_v20 = vld [vmem:[#allocation11 + $0x70] sm:$0xff]  ;;  %v4482_v21 = vpack.c.bf16 %v137_v14, %v121_v13  ;;  %v151_v23 = vld [vmem:[#allocation11 + $0x168] sm:$0xff] }
  0x5d   :  { %v136_v22 = vld [vmem:[#allocation11 + $0xf0] sm:$0xff]  ;;  %v167_v24 = vld [vmem:[#allocation11 + $0x1e8] sm:$0x1]  ;;  %v153_v25 = vld [vmem:[#allocation11 + $0x178] sm:$0xff]  ;;  %v4474_v27 = vpack.c.bf16 %v134_v19, %v118_v18 }
  0x5e   :  { %4196 = vmatmul.mubr.msk.f32.vlgmr.msra.gmra.mrb[2].mxu0 %vm170_vm3, %v5976_v31  ;;  %4199 = vmatmul.mubr.msk.f32.vlgmr.msra.gmra.mrb[2].mxu1 %vm170_vm3, %v5976_v31  ;;  %v169_v26 = vld [vmem:[#allocation11 + $0x1f8] sm:$0x1]  ;;  %v4484_v28 = vpack.c.bf16 %v136_v22, %v120_v20  ;;  %v4476_v29 = vpack.c.bf16 %v167_v24, %v151_v23  ;;  %v150_v30 = vld [vmem:[#allocation11 + $0x160] sm:$0xff]  ;;  %v152_v34 = vld [vmem:[#allocation11 + $0x170] sm:$0xff] }
  0x5f   :  { %4455 = vmatpush1.bf16.msra.mxu0 %v4454_v3  ;;  %4465 = vmatpush1.bf16.msra.mxu1 %v4464_v4  ;;  %v166_v32 = vld [vmem:[#allocation11 + $0x1e0] sm:$0x1]  ;;  %v4486_v33 = vpack.c.bf16 %v169_v26, %v153_v25  ;;  %v168_v35 = vld [vmem:[#allocation11 + $0x1f0] sm:$0x1]  ;;  %v98_v37 = vld [vmem:[#allocation10 + $0x8] sm:$0xff] }
  0x60   :  { %4458 = vmatprep.subr.msk.bf16.mxu0 %vm5968_vm2, %v4456_v5  ;;  %4468 = vmatprep.subr.msk.bf16.mxu1 %vm5968_vm2, %v4466_v9  ;;  %v97_v36 = vld [vmem:[#allocation10] sm:$0xff]  ;;  %v4479_v38 = vpack.c.bf16 %v166_v32, %v150_v30  ;;  %v4489_v39 = vpack.c.bf16 %v168_v35, %v152_v34  ;;  %v800_v41 = vcombine.high %v98_v37, %v98_v37  ;;  %v99_v42 = vld [vmem:[#allocation10 + $0x10] sm:$0xff]  ;;  %v100_v43 = vld [vmem:[#allocation10 + $0x18] sm:$0xff] }
  0x61   :  { %571 = vmatprep.mubr.f32.mxu0 %v5869_v0  ;;  %642 = vmatprep.mubr.f32.mxu1 %v5869_v0  ;;  %v799_v40 = vcombine.high %v97_v36, %v97_v36  ;;  %v801_v44 = vcombine.high %v99_v42, %v99_v42  ;;  %v802_v45 = vcombine.high %v100_v43, %v100_v43  ;;  %v101_v46 = vld [vmem:[#allocation10 + $0x20] sm:$0xff]  ;;  %v96_v47 = vld [vmem:[#allocation5] sm:$0xf]  ;;  %v102_v48 = vld [vmem:[#allocation10 + $0x28] sm:$0xff] }
  0x62   :  { %v803_v1 = vcombine.high %v101_v46, %v101_v46  ;;  %v804_v49 = vcombine.high %v102_v48, %v102_v48  ;;  %v104_v50 = vld [vmem:[#allocation10 + $0x38] sm:$0xff] }
  0x63   :  { %4461 = vmatpush1.bf16.msk.msra.mxu0 %vm5968_vm2, %v4459_v15  ;;  %4471 = vmatpush1.bf16.msk.msra.mxu1 %vm5968_vm2, %v4469_v16  ;;  %v806_v52 = vcombine.high %v104_v50, %v104_v50 }
  0x64   :  { %4473 = vmatprep.subr.bf16.mxu0 %v4472_v17  ;;  %4483 = vmatprep.subr.bf16.mxu1 %v4482_v21 }
  0x66   :  { %4202 = vmatmul.mubr.msk.f32.vlgmr.msra.gmra.mrb[4].mxu0 %vm170_vm3, %v5976_v31  ;;  %4205 = vmatmul.mubr.msk.f32.vlgmr.msra.gmra.mrb[4].mxu1 %vm170_vm3, %v5976_v31 }
  0x67   :  { %4475 = vmatpush1.bf16.msra.mxu0 %v4474_v27  ;;  %4485 = vmatpush1.bf16.msra.mxu1 %v4484_v28 }
  0x68   :  { %4478 = vmatprep.subr.msk.bf16.mxu0 %vm5968_vm2, %v4476_v29  ;;  %4488 = vmatprep.subr.msk.bf16.mxu1 %vm5968_vm2, %v4486_v33 }
  0x69   :  { %713 = vmatprep.mubr.f32.mxu0 %v5869_v0  ;;  %784 = vmatprep.mubr.f32.mxu1 %v5869_v0 }
  0x6b   :  { %4481 = vmatpush1.bf16.msk.msra.mxu0 %vm5968_vm2, %v4479_v38  ;;  %4491 = vmatpush1.bf16.msk.msra.mxu1 %vm5968_vm2, %v4489_v39 }
  0x6c   :  { %4212 = vmatprep.subr.msk.mxu0 %vm811_vm4, %v799_v40  ;;  %4215 = vmatprep.subr.msk.mxu1 %vm811_vm4, %v800_v41 }
  0x6e   :  { %4208 = vmatmul.mubr.msk.f32.vlgmr.msra.gmra.mrb[6].mxu0 %vm170_vm3, %v5976_v31  ;;  %4211 = vmatmul.mubr.msk.f32.vlgmr.msra.gmra.mrb[6].mxu1 %vm170_vm3, %v5976_v31  ;;  %v103_v31 = vld [vmem:[#allocation10 + $0x30] sm:$0xff] }
  0x6f   :  { %4213 = vmatpush1.msk.msra.mxu0 %vm811_vm4, %v97_v36  ;;  %4216 = vmatpush1.msk.msra.mxu1 %vm811_vm4, %v98_v37  ;;  %v805_v51 = vcombine.high %v103_v31, %v103_v31 }
  0x70   :  { %908 = vmatprep.mubr.f32.mxu0 %v5869_v0  ;;  %979 = vmatprep.mubr.f32.mxu1 %v5869_v0 }
  0x71   :  { %4218 = vmatprep.subr.msk.mxu0 %vm811_vm4, %v801_v44  ;;  %4221 = vmatprep.subr.msk.mxu1 %vm811_vm4, %v802_v45 }
  0x72   :  { %4214 = vmatmul.mubr.msk.f32.vlgmr.msra.gmra.mrb[0].mxu0 %vm807_vm5, %v96_v47  ;;  %4217 = vmatmul.mubr.msk.f32.vlgmr.msra.gmra.mrb[0].mxu1 %vm807_vm5, %v96_v47 }
  0x73   :  { %4219 = vmatpush1.msk.msra.mxu0 %vm811_vm4, %v99_v42  ;;  %4222 = vmatpush1.msk.msra.mxu1 %vm811_vm4, %v100_v43 }
  0x74   :  { %1050 = vmatprep.mubr.f32.mxu0 %v5869_v0  ;;  %1121 = vmatprep.mubr.f32.mxu1 %v5869_v0 }
  0x75   :  { %4224 = vmatprep.subr.msk.mxu0 %vm811_vm4, %v803_v1  ;;  %4227 = vmatprep.subr.msk.mxu1 %vm811_vm4, %v804_v49 }
  0x76   :  { %4220 = vmatmul.mubr.msk.f32.vlgmr.msra.gmra.mrb[2].mxu0 %vm807_vm5, %v96_v47  ;;  %4223 = vmatmul.mubr.msk.f32.vlgmr.msra.gmra.mrb[2].mxu1 %vm807_vm5, %v96_v47 }
  0x77   :  { %4225 = vmatpush1.msk.msra.mxu0 %vm811_vm4, %v101_v46  ;;  %4228 = vmatpush1.msk.msra.mxu1 %vm811_vm4, %v102_v48 }
  0x78   :  { %1192 = vmatprep.mubr.f32.mxu0 %v5869_v0  ;;  %1263 = vmatprep.mubr.f32.mxu1 %v5869_v0 }
  0x79   :  { %4230 = vmatprep.subr.msk.mxu0 %vm811_vm4, %v805_v51  ;;  %4233 = vmatprep.subr.msk.mxu1 %vm811_vm4, %v806_v52 }
  0x7a   :  { %4226 = vmatmul.mubr.msk.f32.vlgmr.msra.gmra.mrb[4].mxu0 %vm807_vm5, %v96_v47  ;;  %4229 = vmatmul.mubr.msk.f32.vlgmr.msra.gmra.mrb[4].mxu1 %vm807_vm5, %v96_v47 }
  0x7b   :  { %4231 = vmatpush1.msk.msra.mxu0 %vm811_vm4, %v103_v31  ;;  %4234 = vmatpush1.msk.msra.mxu1 %vm811_vm4, %v104_v50 }
  0x7c   :  { %1334 = vmatprep.mubr.f32.mxu0 %v5869_v0  ;;  %1405 = vmatprep.mubr.f32.mxu1 %v5869_v0 }
  0x7e   :  { %4232 = vmatmul.mubr.msk.f32.vlgmr.msra.gmra.mrb[6].mxu0 %vm807_vm5, %v96_v47  ;;  %4235 = vmatmul.mubr.msk.f32.vlgmr.msra.gmra.mrb[6].mxu1 %vm807_vm5, %v96_v47 }
  0x7f   :  { %5794 = shalt.err (!%p5791_p6)  }
  0x80   :  { %s5795_s30 = scalar_lea.vmem %s81_s19, 131072  ;;  %p5800_p8 = scmp.lt.s32.totalorder %s81_s19, %s81_s19 }
  0x81   :  { %p5796_p7 = scmp.ne.s32.totalorder %s81_s19, %s5795_s30  ;;  %p5801_p9 = scmp.lt.s32.totalorder %s5795_s30, %s5795_s30 }
  0x83   :  { %p5802_p10 = por %p5801_p9, %p5800_p8 }
  0x85   :  { %p5803_p11 = pnand %p5802_p10, %p5796_p7 }
  0x87   :  { %5806 = shalt.err (!%p5803_p11)  }
  0x88   :  { %83 = dma.hbm_to_vmem [thread:$0]  %s6220_s4, 131072, %s81_s19, [#allocation4] }
  0x89   :  { %s5807_s9 = scalar_lea.hbm %s6221_s5, 12288 }
  0x8a   :  { %p5808_p12 = scmp.ne.s32.totalorder %s6221_s5, %s5807_s9  ;;  %p5811_p13 = scmp.lt.u32.totalorder %s5807_s9, %s6221_s5 }
  0x8c   :  { %p5813_p0 = pnand %p5811_p13, %p5808_p12 }
  0x8e   :  { %5816 = shalt.err (!%p5813_p0)  }
  0x8f   :  { %s5817_s14 = scalar_lea.vmem %s93_s21, 12288  ;;  %p5822_p2 = scmp.lt.s32.totalorder %s93_s21, %s93_s21 }
  0x90   :  { %p5818_p1 = scmp.ne.s32.totalorder %s93_s21, %s5817_s14  ;;  %p5823_p3 = scmp.lt.s32.totalorder %s5817_s14, %s5817_s14 }
  0x92   :  { %p5824_p4 = por %p5823_p3, %p5822_p2 }
  0x94   :  { %p5825_p5 = pnand %p5824_p4, %p5818_p1 }
  0x96   :  { %5828 = shalt.err (!%p5825_p5)  }
  0x97   :  { %95 = dma.hbm_to_vmem [thread:$0]  %s6221_s5, 12288, %s93_s21, [#allocation4 + $0x1]  ;;  %v1422_v53 = vlaneseq  ;;  %v1413_v55 = vld [vmem:[#allocation11 + $0x181] ss:$8 sm:$0xf] }
  0x98   :  { %v1414_v56 = vld [vmem:[#allocation11 + $0x181] ss:$8 sm:$0xf0] }
  0x99   :  { %v6084_v54 = vshrl.u32 %v1422_v53, 7  ;;  %v1415_v57 = vor.u32 %v1414_v56, %v1413_v55  ;;  %v1417_v62 = vld [vmem:[#allocation11 + $0x1c1] ss:$8 sm:$0xf] }
  0x9a   :  { %v1418_v63 = vld [vmem:[#allocation11 + $0x1c1] ss:$8 sm:$0xf0] }
  0x9b   :  { %v6087_v58 = vsub.s32 0, %v6084_v54  ;;  %v6090_v59 = vsub.s32 2, %v6084_v54  ;;  %v6093_v60 = vsub.s32 1, %v6084_v54  ;;  %v6096_v61 = vsub.s32 3, %v6084_v54 }
  0x9c   :  { %v1440_v3 = vsub.s32 4, %v6084_v54  ;;  %v1448_v4 = vsub.s32 6, %v6084_v54  ;;  %v1444_v5 = vsub.s32 5, %v6084_v54  ;;  %v1452_v8 = vsub.s32 7, %v6084_v54 }
  0x9d   :  { %v1425_v2 = vrot.slane %v1415_v57, %v6087_v58  ;;  %v1433_v6 = vrot.slane %v1415_v57, %v6090_v59  ;;  %v1429_v7 = vrot.slane %v1415_v57, %v6093_v60  ;;  %v1419_v9 = vor.u32 %v1418_v63, %v1417_v62 }
  0x9e   :  { %v1437_v10 = vrot.slane %v1415_v57, %v6096_v61  ;;  %v1441_v15 = vrot.slane %v1415_v57, %v1440_v3  ;;  %v1449_v16 = vrot.slane %v1415_v57, %v1448_v4  ;;  %v1445_v17 = vrot.slane %v1415_v57, %v1444_v5 }
  0x9f   :  { %v1453_v21 = vrot.slane %v1415_v57, %v1452_v8  ;;  %v1457_v22 = vrot.slane %v1419_v9, %v6087_v58  ;;  %v1465_v25 = vrot.slane %v1419_v9, %v6090_v59  ;;  %v1461_v33 = vrot.slane %v1419_v9, %v6093_v60 }
  0xa0   :  { %v1469_v43 = vrot.slane %v1419_v9, %v6096_v61  ;;  %v1473_v50 = vrot.slane %v1419_v9, %v1440_v3  ;;  %v1481_v51 = vrot.slane %v1419_v9, %v1448_v4 }
 0x145   :  { %v910_v11 = vpop.f32.mrb[0].mxu0  ;;  %v981_v13 = vpop.f32.mrb[0].mxu1 }
 0x146   :  { %v1502_v12 = vadd.f32 %v1425_v2, %v910_v11  ;;  %v912_v14 = vpop.f32.mrb[1].mxu0  ;;  %v1504_v18 = vadd.f32 %v1433_v6, %v981_v13  ;;  %v983_v20 = vpop.f32.mrb[1].mxu1 }
 0x147   :  { %v1503_v19 = vadd.f32 %v1429_v7, %v912_v14  ;;  %v1505_v24 = vadd.f32 %v1437_v10, %v983_v20  ;;  %v1477_v7 = vrot.slane %v1419_v9, %v1444_v5  ;;  %v1485_v10 = vrot.slane %v1419_v9, %v1452_v8 }
 0x148   :  { %vm1518_vm6 = vcmp.ge.f32.partialorder %v1502_v12, 0.0  ;;  %v1534_v23 = vmul.f32 0.2, %v1502_v12  ;;  %vm1520_vm7 = vcmp.ge.f32.partialorder %v1504_v18, 0.0  ;;  %v1536_v26 = vmul.f32 0.2, %v1504_v18 }
 0x149   :  { %vm1519_vm8 = vcmp.ge.f32.partialorder %v1503_v19, 0.0  ;;  %v1535_v27 = vmul.f32 0.2, %v1503_v19  ;;  %vm1521_vm9 = vcmp.ge.f32.partialorder %v1505_v24, 0.0  ;;  %v1537_v29 = vmul.f32 0.2, %v1505_v24 }
 0x14a   :  { %v6112_v28 = vsel %vm1518_vm6, %v1502_v12, %v1534_v23  ;;  %v1052_v30 = vpop.f32.mrb[2].mxu0  ;;  %v1123_v32 = vpop.f32.mrb[2].mxu1  ;;  %v6115_v34 = vsel %vm1520_vm7, %v1504_v18, %v1536_v26 }
 0x14b   :  { %v6117_v35 = vsel %vm1519_vm8, %v1503_v19, %v1535_v27  ;;  %v1506_v36 = vadd.f32 %v1441_v15, %v1052_v30  ;;  %v1508_v37 = vadd.f32 %v1449_v16, %v1123_v32  ;;  %v1054_v38 = vpop.f32.mrb[3].mxu0  ;;  %v1125_v39 = vpop.f32.mrb[3].mxu1  ;;  %v6119_v40 = vsel %vm1521_vm9, %v1505_v24, %v1537_v29 }
 0x14c   :  { %v1507_v41 = vadd.f32 %v1445_v17, %v1054_v38  ;;  %v1509_v42 = vadd.f32 %v1453_v21, %v1125_v39 }
 0x14d   :  { %vm1522_vm10 = vcmp.ge.f32.partialorder %v1506_v36, 0.0  ;;  %v1538_v44 = vmul.f32 0.2, %v1506_v36  ;;  %vm1524_vm11 = vcmp.ge.f32.partialorder %v1508_v37, 0.0  ;;  %v1540_v45 = vmul.f32 0.2, %v1508_v37 }
 0x14e   :  { %vm1523_vm12 = vcmp.ge.f32.partialorder %v1507_v41, 0.0  ;;  %v1539_v46 = vmul.f32 0.2, %v1507_v41  ;;  %vm1525_vm13 = vcmp.ge.f32.partialorder %v1509_v42, 0.0  ;;  %v1541_v47 = vmul.f32 0.2, %v1509_v42 }
 0x14f   :  { %v6122_v48 = vsel %vm1522_vm10, %v1506_v36, %v1538_v44  ;;  %v6124_v1 = vsel %vm1524_vm11, %v1508_v37, %v1540_v45  ;;  %v1194_v49 = vpop.f32.mrb[4].mxu0  ;;  %v1265_v31 = vpop.f32.mrb[4].mxu1 }
 0x150   :  { %v6126_v52 = vsel %vm1523_vm12, %v1507_v41, %v1539_v46  ;;  %v6128_v53 = vsel %vm1525_vm13, %v1509_v42, %v1541_v47  ;;  %v1510_v55 = vadd.f32 %v1457_v22, %v1194_v49  ;;  %v1512_v56 = vadd.f32 %v1465_v25, %v1265_v31  ;;  %v1196_v57 = vpop.f32.mrb[5].mxu0  ;;  %v1267_v62 = vpop.f32.mrb[5].mxu1 }
 0x151   :  { %v1511_v63 = vadd.f32 %v1461_v33, %v1196_v57  ;;  %v1513_v2 = vadd.f32 %v1469_v43, %v1267_v62  ;;  %v1336_v6 = vpop.f32.mrb[6].mxu0  ;;  %v1407_v16 = vpop.f32.mrb[6].mxu1 }
 0x152   :  { %vm1526_vm14 = vcmp.ge.f32.partialorder %v1510_v55, 0.0  ;;  %v1542_v3 = vmul.f32 0.2, %v1510_v55  ;;  %vm1528_vm15 = vcmp.ge.f32.partialorder %v1512_v56, 0.0  ;;  %v1544_v4 = vmul.f32 0.2, %v1512_v56 }
 0x153   :  { %vm1527_vm0 = vcmp.ge.f32.partialorder %v1511_v63, 0.0  ;;  %v1543_v11 = vmul.f32 0.2, %v1511_v63  ;;  %vm1529_vm1 = vcmp.ge.f32.partialorder %v1513_v2, 0.0  ;;  %v1545_v12 = vmul.f32 0.2, %v1513_v2 }
 0x154   :  { %v6134_v13 = vsel %vm1526_vm14, %v1510_v55, %v1542_v3  ;;  %v6136_v14 = vsel %vm1528_vm15, %v1512_v56, %v1544_v4  ;;  %v1514_v15 = vadd.f32 %v1473_v50, %v1336_v6  ;;  %v1338_v17 = vpop.f32.mrb[7].mxu0  ;;  %v1516_v54 = vadd.f32 %v1481_v51, %v1407_v16  ;;  %v1409_v9 = vpop.f32.mrb[7].mxu1 }
 0x155   :  { %v6138_v18 = vsel %vm1527_vm0, %v1511_v63, %v1543_v11  ;;  %v6140_v5 = vsel %vm1529_vm1, %v1513_v2, %v1545_v12  ;;  %v1515_v8 = vadd.f32 %v1477_v7, %v1338_v17  ;;  %v1517_v20 = vadd.f32 %v1485_v10, %v1409_v9 }
 0x156   :  { %vm1530_vm2 = vcmp.ge.f32.partialorder %v1514_v15, 0.0  ;;  %v1546_v19 = vmul.f32 0.2, %v1514_v15  ;;  %vm1532_vm3 = vcmp.ge.f32.partialorder %v1516_v54, 0.0  ;;  %v1548_v21 = vmul.f32 0.2, %v1516_v54 }
 0x157   :  { %vm1531_vm4 = vcmp.ge.f32.partialorder %v1515_v8, 0.0  ;;  %v1547_v22 = vmul.f32 0.2, %v1515_v8  ;;  %vm1533_vm5 = vcmp.ge.f32.partialorder %v1517_v20, 0.0  ;;  %v1549_v24 = vmul.f32 0.2, %v1517_v20 }
 0x158   :  { %v6142_v23 = vsel %vm1530_vm2, %v1514_v15, %v1546_v19  ;;  %v6144_v25 = vsel %vm1532_vm3, %v1516_v54, %v1548_v21 }
 0x159   :  { %v6146_v26 = vsel %vm1531_vm4, %v1515_v8, %v1547_v22  ;;  %v6148_v27 = vsel %vm1533_vm5, %v1517_v20, %v1549_v24 }
 0x15a   :  { %5857 = dma.done.wait [#allocation4], 131072 }
 0x15b   :  { %5858 = vsyncadd [#allocation4], 4294836224 }
 0x15c   :  { %5859 = dma.done.wait [#allocation4 + $0x1], 12288 }
 0x15d   :  { %5860 = vsyncadd [#allocation4 + $0x1], 4294955008  ;;  %2688 = vmatprep.mubr.f32.mxu0 %v6117_v35  ;;  %3256 = vmatprep.mubr.f32.mxu1 %v6117_v35  ;;  %v1578_v29 = vld [vmem:[#allocation2 + $0x8] sm:$0xff]  ;;  %v1580_v32 = vld [vmem:[#allocation2 + $0x18] sm:$0xff]  ;;  %vm5874_vm10 = vmmov 0   ;;  %s5875_s5 = smov [#allocation13]  }
 0x15e   :  { %v1582_v30 = vld [vmem:[#allocation2 + $0x28] sm:$0xff]  ;;  %v1584_v36 = vld [vmem:[#allocation2 + $0x38] sm:$0xff]  ;;  %v1577_v37 = vld [vmem:[#allocation2] sm:$0xff]  ;;  %s4164_s16 = sshll.u32 %s5875_s5, 4  ;;  %s4165_s16 = int_to_ptr.vmem [resolvable:$true] %s4164_s16 }
 0x15f   :  { %v4492_v33 = vpack.c.bf16 %v1582_v30, %v1578_v29  ;;  %v1581_v38 = vld [vmem:[#allocation2 + $0x20] sm:$0xff]  ;;  %v5004_v39 = vpack.c.bf16 %v1584_v36, %v1580_v32  ;;  %v1579_v42 = vld [vmem:[#allocation2 + $0x10] sm:$0xff]  ;;  %v1586_v44 = vld [vmem:[#allocation2 + $0x48] sm:$0xff]  ;;  %s5829_s2 = scalar_lea.vmem %s4165_s16, 64  ;;  %p5834_p7 = scmp.lt.s32.totalorder %s4165_s16, %s4165_s16 }
 0x160   :  { %v4494_v41 = vpack.c.bf16 %v1581_v38, %v1577_v37  ;;  %v1583_v43 = vld [vmem:[#allocation2 + $0x30] sm:$0xff]  ;;  %v1590_v46 = vld [vmem:[#allocation2 + $0x68] sm:$0xff]  ;;  %v1588_v47 = vld [vmem:[#allocation2 + $0x58] sm:$0xff]  ;;  %p5830_p6 = scmp.ne.s32.totalorder %s4165_s16, %s5829_s2  ;;  %p5835_p8 = scmp.lt.s32.totalorder %s5829_s2, %s5829_s2 }
 0x161   :  { %4493 = vmatprep.subr.bf16.mxu0 %v4492_v33  ;;  %v5006_v45 = vpack.c.bf16 %v1583_v43, %v1579_v42  ;;  %v1592_v49 = vld [vmem:[#allocation2 + $0x78] sm:$0xff]  ;;  %5005 = vmatprep.subr.bf16.mxu1 %v5004_v39  ;;  %v4496_v35 = vpack.c.bf16 %v1590_v46, %v1586_v44  ;;  %v1585_v50 = vld [vmem:[#allocation2 + $0x40] sm:$0xff]  ;;  %v1587_v55 = vld [vmem:[#allocation2 + $0x50] sm:$0xff] }
 0x162   :  { %4495 = vmatpush1.bf16.msra.mxu0 %v4494_v41  ;;  %v5008_v31 = vpack.c.bf16 %v1592_v49, %v1588_v47  ;;  %v1589_v51 = vld [vmem:[#allocation2 + $0x60] sm:$0xff]  ;;  %v1591_v57 = vld [vmem:[#allocation2 + $0x70] sm:$0xff]  ;;  %v1594_v62 = vld [vmem:[#allocation2 + $0x88] sm:$0xff]  ;;  %p5836_p9 = por %p5835_p8, %p5834_p7 }
 0x163   :  { %5007 = vmatpush1.bf16.msra.mxu1 %v5006_v45  ;;  %v4498_v56 = vpack.c.bf16 %v1589_v51, %v1585_v50  ;;  %v1598_v63 = vld [vmem:[#allocation2 + $0xa8] sm:$0xff]  ;;  %4497 = vmatprep.subr.bf16.mxu0 %v4496_v35  ;;  %v5010_v2 = vpack.c.bf16 %v1591_v57, %v1587_v55  ;;  %v1596_v7 = vld [vmem:[#allocation2 + $0x98] sm:$0xff]  ;;  %v1593_v3 = vld [vmem:[#allocation2 + $0x80] sm:$0xff] }
 0x164   :  { %5009 = vmatprep.subr.bf16.mxu1 %v5008_v31  ;;  %v4500_v6 = vpack.c.bf16 %v1598_v63, %v1594_v62  ;;  %v1600_v10 = vld [vmem:[#allocation2 + $0xb8] sm:$0xff]  ;;  %v1597_v11 = vld [vmem:[#allocation2 + $0xa0] sm:$0xff]  ;;  %v1595_v12 = vld [vmem:[#allocation2 + $0x90] sm:$0xff]  ;;  %p5837_p10 = pnand %p5836_p9, %p5830_p6 }
 0x165   :  { %v5012_v4 = vpack.c.bf16 %v1600_v10, %v1596_v7  ;;  %v1599_v15 = vld [vmem:[#allocation2 + $0xb0] sm:$0xff]  ;;  %v4502_v16 = vpack.c.bf16 %v1597_v11, %v1593_v3  ;;  %v1602_v17 = vld [vmem:[#allocation2 + $0xc8] sm:$0xff]  ;;  %v1604_v8 = vld [vmem:[#allocation2 + $0xd8] sm:$0xff] }
 0x166   :  { %4499 = vmatpush1.bf16.msra.mxu0 %v4498_v56  ;;  %v1606_v54 = vld [vmem:[#allocation2 + $0xe8] sm:$0xff]  ;;  %v5014_v9 = vpack.c.bf16 %v1599_v15, %v1595_v12  ;;  %v1608_v20 = vld [vmem:[#allocation2 + $0xf8] sm:$0xff]  ;;  %v1601_v21 = vld [vmem:[#allocation2 + $0xc0] sm:$0xff] }
 0x167   :  { %5011 = vmatpush1.bf16.msra.mxu1 %v5010_v2  ;;  %4501 = vmatprep.subr.bf16.mxu0 %v4500_v6  ;;  %v4504_v19 = vpack.c.bf16 %v1606_v54, %v1602_v17  ;;  %v1605_v22 = vld [vmem:[#allocation2 + $0xe0] sm:$0xff]  ;;  %v5016_v24 = vpack.c.bf16 %v1608_v20, %v1604_v8  ;;  %v1603_v29 = vld [vmem:[#allocation2 + $0xd0] sm:$0xff]  ;;  %v1610_v32 = vld [vmem:[#allocation2 + $0x108] sm:$0xff] }
 0x168   :  { %5013 = vmatprep.subr.bf16.mxu1 %v5012_v4  ;;  %v1607_v30 = vld [vmem:[#allocation2 + $0xf0] sm:$0xff]  ;;  %v1614_v33 = vld [vmem:[#allocation2 + $0x128] sm:$0xff]  ;;  %v1612_v36 = vld [vmem:[#allocation2 + $0x118] sm:$0xff]  ;;  %v4506_v38 = vpack.c.bf16 %v1605_v22, %v1601_v21 }
 0x169   :  { %v1616_v37 = vld [vmem:[#allocation2 + $0x138] sm:$0xff]  ;;  %v5018_v39 = vpack.c.bf16 %v1607_v30, %v1603_v29  ;;  %v4508_v41 = vpack.c.bf16 %v1614_v33, %v1610_v32  ;;  %v1609_v42 = vld [vmem:[#allocation2 + $0x100] sm:$0xff]  ;;  %v1611_v44 = vld [vmem:[#allocation2 + $0x110] sm:$0xff] }
 0x16a   :  { %4503 = vmatpush1.bf16.msra.mxu0 %v4502_v16  ;;  %v1613_v43 = vld [vmem:[#allocation2 + $0x120] sm:$0xff]  ;;  %v5020_v45 = vpack.c.bf16 %v1616_v37, %v1612_v36  ;;  %v1615_v46 = vld [vmem:[#allocation2 + $0x130] sm:$0xff]  ;;  %v1618_v47 = vld [vmem:[#allocation2 + $0x148] sm:$0xff] }
 0x16b   :  { %5015 = vmatpush1.bf16.msra.mxu1 %v5014_v9  ;;  %4505 = vmatprep.subr.bf16.mxu0 %v4504_v19  ;;  %v1622_v49 = vld [vmem:[#allocation2 + $0x168] sm:$0xff]  ;;  %v1620_v35 = vld [vmem:[#allocation2 + $0x158] sm:$0xff]  ;;  %v4510_v50 = vpack.c.bf16 %v1613_v43, %v1609_v42  ;;  %v5022_v51 = vpack.c.bf16 %v1615_v46, %v1611_v44  ;;  %v1617_v56 = vld [vmem:[#allocation2 + $0x140] sm:$0xff] }
 0x16c   :  { %5017 = vmatprep.subr.bf16.mxu1 %v5016_v24  ;;  %v1624_v31 = vld [vmem:[#allocation2 + $0x178] sm:$0xff]  ;;  %v4512_v55 = vpack.c.bf16 %v1622_v49, %v1618_v47  ;;  %v1621_v57 = vld [vmem:[#allocation2 + $0x160] sm:$0xff]  ;;  %v1619_v62 = vld [vmem:[#allocation2 + $0x150] sm:$0xff] }
 0x16d   :  { %v5024_v63 = vpack.c.bf16 %v1624_v31, %v1620_v35  ;;  %v1623_v2 = vld [vmem:[#allocation2 + $0x170] sm:$0xff]  ;;  %v1626_v6 = vld [vmem:[#allocation2 + $0x188] sm:$0xff]  ;;  %v1628_v10 = vld [vmem:[#allocation2 + $0x198] sm:$0xff]  ;;  %v4514_v4 = vpack.c.bf16 %v1621_v57, %v1617_v56 }
 0x16e   :  { %4507 = vmatpush1.bf16.msra.mxu0 %v4506_v38  ;;  %v1630_v7 = vld [vmem:[#allocation2 + $0x1a8] sm:$0xff]  ;;  %v1632_v3 = vld [vmem:[#allocation2 + $0x1b8] sm:$0xff]  ;;  %v5026_v11 = vpack.c.bf16 %v1623_v2, %v1619_v62  ;;  %v1625_v15 = vld [vmem:[#allocation2 + $0x180] sm:$0xff] }
 0x16f   :  { %5019 = vmatpush1.bf16.msra.mxu1 %v5018_v39  ;;  %4509 = vmatprep.subr.bf16.mxu0 %v4508_v41  ;;  %v4516_v12 = vpack.c.bf16 %v1630_v7, %v1626_v6  ;;  %v1629_v16 = vld [vmem:[#allocation2 + $0x1a0] sm:$0xff]  ;;  %v1627_v17 = vld [vmem:[#allocation2 + $0x190] sm:$0xff]  ;;  %v5028_v54 = vpack.c.bf16 %v1632_v3, %v1628_v10  ;;  %v1634_v9 = vld [vmem:[#allocation2 + $0x1c8] sm:$0xff] }
 0x170   :  { %5021 = vmatprep.subr.bf16.mxu1 %v5020_v45  ;;  %v1631_v8 = vld [vmem:[#allocation2 + $0x1b0] sm:$0xff]  ;;  %v1638_v19 = vld [vmem:[#allocation2 + $0x1e8] sm:$0xff]  ;;  %v1636_v20 = vld [vmem:[#allocation2 + $0x1d8] sm:$0xff]  ;;  %v4518_v22 = vpack.c.bf16 %v1629_v16, %v1625_v15 }
 0x171   :  { %v1640_v21 = vld [vmem:[#allocation2 + $0x1f8] sm:$0xff]  ;;  %v5030_v24 = vpack.c.bf16 %v1631_v8, %v1627_v17  ;;  %v4520_v29 = vpack.c.bf16 %v1638_v19, %v1634_v9  ;;  %v1633_v30 = vld [vmem:[#allocation2 + $0x1c0] sm:$0xff]  ;;  %v1635_v33 = vld [vmem:[#allocation2 + $0x1d0] sm:$0xff] }
 0x172   :  { %4511 = vmatpush1.bf16.msra.mxu0 %v4510_v50  ;;  %v1637_v32 = vld [vmem:[#allocation2 + $0x1e0] sm:$0xff]  ;;  %v5032_v36 = vpack.c.bf16 %v1640_v21, %v1636_v20  ;;  %v1639_v37 = vld [vmem:[#allocation2 + $0x1f0] sm:$0xff]  ;;  %v1642_v38 = vld [vmem:[#allocation2 + $0x208] sm:$0xff] }
 0x173   :  { %5023 = vmatpush1.bf16.msra.mxu1 %v5022_v51  ;;  %4513 = vmatprep.subr.bf16.mxu0 %v4512_v55  ;;  %v1646_v39 = vld [vmem:[#allocation2 + $0x228] sm:$0xff]  ;;  %v1644_v41 = vld [vmem:[#allocation2 + $0x218] sm:$0xff]  ;;  %v4522_v43 = vpack.c.bf16 %v1637_v32, %v1633_v30  ;;  %v5034_v44 = vpack.c.bf16 %v1639_v37, %v1635_v33  ;;  %v1641_v46 = vld [vmem:[#allocation2 + $0x200] sm:$0xff] }
 0x174   :  { %5025 = vmatprep.subr.bf16.mxu1 %v5024_v63  ;;  %v1648_v42 = vld [vmem:[#allocation2 + $0x238] sm:$0xff]  ;;  %v4524_v45 = vpack.c.bf16 %v1646_v39, %v1642_v38  ;;  %v1645_v47 = vld [vmem:[#allocation2 + $0x220] sm:$0xff]  ;;  %v1643_v49 = vld [vmem:[#allocation2 + $0x210] sm:$0xff] }
 0x175   :  { %v5036_v35 = vpack.c.bf16 %v1648_v42, %v1644_v41  ;;  %v1647_v31 = vld [vmem:[#allocation2 + $0x230] sm:$0xff]  ;;  %v1650_v50 = vld [vmem:[#allocation2 + $0x248] sm:$0xff]  ;;  %v1652_v55 = vld [vmem:[#allocation2 + $0x258] sm:$0xff]  ;;  %v4526_v57 = vpack.c.bf16 %v1645_v47, %v1641_v46 }
 0x176   :  { %4515 = vmatpush1.bf16.msra.mxu0 %v4514_v4  ;;  %v1654_v51 = vld [vmem:[#allocation2 + $0x268] sm:$0xff]  ;;  %v1656_v56 = vld [vmem:[#allocation2 + $0x278] sm:$0xff]  ;;  %v5038_v62 = vpack.c.bf16 %v1647_v31, %v1643_v49  ;;  %v1649_v2 = vld [vmem:[#allocation2 + $0x240] sm:$0xff] }
 0x177   :  { %5027 = vmatpush1.bf16.msra.mxu1 %v5026_v11  ;;  %4517 = vmatprep.subr.bf16.mxu0 %v4516_v12  ;;  %v4528_v63 = vpack.c.bf16 %v1654_v51, %v1650_v50  ;;  %v1653_v6 = vld [vmem:[#allocation2 + $0x260] sm:$0xff]  ;;  %v1651_v7 = vld [vmem:[#allocation2 + $0x250] sm:$0xff]  ;;  %v5040_v10 = vpack.c.bf16 %v1656_v56, %v1652_v55  ;;  %v1658_v4 = vld [vmem:[#allocation2 + $0x288] sm:$0xff] }
 0x178   :  { %5029 = vmatprep.subr.bf16.mxu1 %v5028_v54  ;;  %v1655_v3 = vld [vmem:[#allocation2 + $0x270] sm:$0xff]  ;;  %v1662_v11 = vld [vmem:[#allocation2 + $0x2a8] sm:$0xff]  ;;  %v1660_v12 = vld [vmem:[#allocation2 + $0x298] sm:$0xff]  ;;  %v4530_v16 = vpack.c.bf16 %v1653_v6, %v1649_v2 }
 0x179   :  { %v1664_v15 = vld [vmem:[#allocation2 + $0x2b8] sm:$0xff]  ;;  %v5042_v17 = vpack.c.bf16 %v1655_v3, %v1651_v7  ;;  %v4532_v54 = vpack.c.bf16 %v1662_v11, %v1658_v4  ;;  %v1657_v8 = vld [vmem:[#allocation2 + $0x280] sm:$0xff]  ;;  %v1659_v19 = vld [vmem:[#allocation2 + $0x290] sm:$0xff] }
 0x17a   :  { %4519 = vmatpush1.bf16.msra.mxu0 %v4518_v22  ;;  %v1661_v9 = vld [vmem:[#allocation2 + $0x2a0] sm:$0xff]  ;;  %v5044_v20 = vpack.c.bf16 %v1664_v15, %v1660_v12  ;;  %v1663_v21 = vld [vmem:[#allocation2 + $0x2b0] sm:$0xff]  ;;  %v1666_v22 = vld [vmem:[#allocation2 + $0x2c8] sm:$0xff] }
 0x17b   :  { %5031 = vmatpush1.bf16.msra.mxu1 %v5030_v24  ;;  %4521 = vmatprep.subr.bf16.mxu0 %v4520_v29  ;;  %v1670_v24 = vld [vmem:[#allocation2 + $0x2e8] sm:$0xff]  ;;  %v1668_v29 = vld [vmem:[#allocation2 + $0x2d8] sm:$0xff]  ;;  %v4534_v32 = vpack.c.bf16 %v1661_v9, %v1657_v8  ;;  %v5046_v33 = vpack.c.bf16 %v1663_v21, %v1659_v19  ;;  %v1665_v37 = vld [vmem:[#allocation2 + $0x2c0] sm:$0xff] }
 0x17c   :  { %5033 = vmatprep.subr.bf16.mxu1 %v5032_v36  ;;  %v1672_v30 = vld [vmem:[#allocation2 + $0x2f8] sm:$0xff]  ;;  %v4536_v36 = vpack.c.bf16 %v1670_v24, %v1666_v22  ;;  %v1669_v38 = vld [vmem:[#allocation2 + $0x2e0] sm:$0xff]  ;;  %v1667_v39 = vld [vmem:[#allocation2 + $0x2d0] sm:$0xff] }
 0x17d   :  { %v5048_v41 = vpack.c.bf16 %v1672_v30, %v1668_v29  ;;  %v1671_v42 = vld [vmem:[#allocation2 + $0x2f0] sm:$0xff]  ;;  %v1680_v46 = vld [vmem:[#allocation2 + $0x338] sm:$0xff]  ;;  %v4538_v47 = vpack.c.bf16 %v1669_v38, %v1665_v37  ;;  %v1673_v31 = vld [vmem:[#allocation2 + $0x300] sm:$0xff] }
 0x17e   :  { %4523 = vmatpush1.bf16.msra.mxu0 %v4522_v43  ;;  %v1674_v43 = vld [vmem:[#allocation2 + $0x308] sm:$0xff]  ;;  %v5050_v49 = vpack.c.bf16 %v1671_v42, %v1667_v39  ;;  %v1677_v50 = vld [vmem:[#allocation2 + $0x320] sm:$0xff]  ;;  %v1675_v51 = vld [vmem:[#allocation2 + $0x310] sm:$0xff] }
 0x17f   :  { %5035 = vmatpush1.bf16.msra.mxu1 %v5034_v44  ;;  %4525 = vmatprep.subr.bf16.mxu0 %v4524_v45  ;;  %v1678_v44 = vld [vmem:[#allocation2 + $0x328] sm:$0xff]  ;;  %v1676_v45 = vld [vmem:[#allocation2 + $0x318] sm:$0xff]  ;;  %v1679_v56 = vld [vmem:[#allocation2 + $0x330] sm:$0xff]  ;;  %v4542_v6 = vpack.c.bf16 %v1677_v50, %v1673_v31 }
 0x180   :  { %5037 = vmatprep.subr.bf16.mxu1 %v5036_v35  ;;  %v4540_v35 = vpack.c.bf16 %v1678_v44, %v1674_v43  ;;  %v5052_v55 = vpack.c.bf16 %v1680_v46, %v1676_v45  ;;  %v1688_v2 = vld [vmem:[#allocation2 + $0x378] sm:$0xff]  ;;  %v5054_v7 = vpack.c.bf16 %v1679_v56, %v1675_v51  ;;  %v1681_v3 = vld [vmem:[#allocation2 + $0x340] sm:$0xff]  ;;  %v1683_v11 = vld [vmem:[#allocation2 + $0x350] sm:$0xff] }
 0x181   :  { %v1685_v4 = vld [vmem:[#allocation2 + $0x360] sm:$0xff]  ;;  %v1687_v15 = vld [vmem:[#allocation2 + $0x370] sm:$0xff]  ;;  %v1696_v8 = vld [vmem:[#allocation2 + $0x3b8] sm:$0xff] }
 0x182   :  { %4527 = vmatpush1.bf16.msra.mxu0 %v4526_v57  ;;  %v1682_v57 = vld [vmem:[#allocation2 + $0x348] sm:$0xff]  ;;  %v4546_v9 = vpack.c.bf16 %v1685_v4, %v1681_v3  ;;  %v5058_v19 = vpack.c.bf16 %v1687_v15, %v1683_v11  ;;  %v1689_v21 = vld [vmem:[#allocation2 + $0x380] sm:$0xff]  ;;  %v1691_v24 = vld [vmem:[#allocation2 + $0x390] sm:$0xff] }
 0x183   :  { %5039 = vmatpush1.bf16.msra.mxu1 %v5038_v62  ;;  %4529 = vmatprep.subr.bf16.mxu0 %v4528_v63  ;;  %v1686_v62 = vld [vmem:[#allocation2 + $0x368] sm:$0xff]  ;;  %v1684_v63 = vld [vmem:[#allocation2 + $0x358] sm:$0xff]  ;;  %v1693_v22 = vld [vmem:[#allocation2 + $0x3a0] sm:$0xff] }
 0x184   :  { %5041 = vmatprep.subr.bf16.mxu1 %v5040_v10  ;;  %v4544_v10 = vpack.c.bf16 %v1686_v62, %v1682_v57  ;;  %v5056_v12 = vpack.c.bf16 %v1688_v2, %v1684_v63  ;;  %v1695_v30 = vld [vmem:[#allocation2 + $0x3b0] sm:$0xff]  ;;  %v1704_v37 = vld [vmem:[#allocation2 + $0x3f8] sm:$0xff]  ;;  %v4550_v38 = vpack.c.bf16 %v1693_v22, %v1689_v21  ;;  %v1697_v42 = vld [vmem:[#allocation2 + $0x3c0] sm:$0xff] }
 0x185   :  { %v5062_v39 = vpack.c.bf16 %v1695_v30, %v1691_v24  ;;  %v1701_v43 = vld [vmem:[#allocation2 + $0x3e0] sm:$0xff]  ;;  %v1699_v44 = vld [vmem:[#allocation2 + $0x3d0] sm:$0xff]  ;;  %v1712_v31 = vld [vmem:[#allocation2 + $0x438] sm:$0xff] }
 0x186   :  { %4531 = vmatpush1.bf16.msra.mxu0 %v4530_v16  ;;  %v1690_v16 = vld [vmem:[#allocation2 + $0x388] sm:$0xff]  ;;  %v1703_v46 = vld [vmem:[#allocation2 + $0x3f0] sm:$0xff]  ;;  %v4554_v50 = vpack.c.bf16 %v1701_v43, %v1697_v42  ;;  %v1705_v56 = vld [vmem:[#allocation2 + $0x400] sm:$0xff] }
 0x187   :  { %5043 = vmatpush1.bf16.msra.mxu1 %v5042_v17  ;;  %4533 = vmatprep.subr.bf16.mxu0 %v4532_v54  ;;  %v1694_v17 = vld [vmem:[#allocation2 + $0x3a8] sm:$0xff]  ;;  %v1692_v54 = vld [vmem:[#allocation2 + $0x398] sm:$0xff]  ;;  %v5066_v51 = vpack.c.bf16 %v1703_v46, %v1699_v44  ;;  %v1709_v57 = vld [vmem:[#allocation2 + $0x420] sm:$0xff] }
 0x188   :  { %5045 = vmatprep.subr.bf16.mxu1 %v5044_v20  ;;  %v4548_v20 = vpack.c.bf16 %v1694_v17, %v1690_v16  ;;  %v5060_v29 = vpack.c.bf16 %v1696_v8, %v1692_v54  ;;  %v1707_v62 = vld [vmem:[#allocation2 + $0x410] sm:$0xff]  ;;  %v1720_v3 = vld [vmem:[#allocation2 + $0x478] sm:$0xff]  ;;  %v4558_v4 = vpack.c.bf16 %v1709_v57, %v1705_v56  ;;  %v1713_v15 = vld [vmem:[#allocation2 + $0x440] sm:$0xff] }
 0x189   :  { %v1711_v2 = vld [vmem:[#allocation2 + $0x430] sm:$0xff]  ;;  %v1717_v16 = vld [vmem:[#allocation2 + $0x460] sm:$0xff]  ;;  %v1728_v21 = vld [vmem:[#allocation2 + $0x4b8] sm:$0xff] }
 0x18a   :  { %4535 = vmatpush1.bf16.msra.mxu0 %v4534_v32  ;;  %v1698_v32 = vld [vmem:[#allocation2 + $0x3c8] sm:$0xff]  ;;  %v5070_v11 = vpack.c.bf16 %v1711_v2, %v1707_v62  ;;  %v1715_v17 = vld [vmem:[#allocation2 + $0x450] sm:$0xff]  ;;  %v4562_v22 = vpack.c.bf16 %v1717_v16, %v1713_v15  ;;  %v1721_v30 = vld [vmem:[#allocation2 + $0x480] sm:$0xff] }
 0x18b   :  { %5047 = vmatpush1.bf16.msra.mxu1 %v5046_v33  ;;  %4537 = vmatprep.subr.bf16.mxu0 %v4536_v36  ;;  %v1702_v33 = vld [vmem:[#allocation2 + $0x3e8] sm:$0xff]  ;;  %v1700_v36 = vld [vmem:[#allocation2 + $0x3d8] sm:$0xff]  ;;  %v1719_v8 = vld [vmem:[#allocation2 + $0x470] sm:$0xff] }
 0x18c   :  { %5049 = vmatprep.subr.bf16.mxu1 %v5048_v41  ;;  %v4552_v41 = vpack.c.bf16 %v1702_v33, %v1698_v32  ;;  %v5064_v45 = vpack.c.bf16 %v1704_v37, %v1700_v36  ;;  %v5074_v24 = vpack.c.bf16 %v1719_v8, %v1715_v17  ;;  %v1725_v32 = vld [vmem:[#allocation2 + $0x4a0] sm:$0xff]  ;;  %v1723_v33 = vld [vmem:[#allocation2 + $0x490] sm:$0xff]  ;;  %v1736_v42 = vld [vmem:[#allocation2 + $0x4f8] sm:$0xff] }
 0x18d   :  { %v1727_v37 = vld [vmem:[#allocation2 + $0x4b0] sm:$0xff]  ;;  %v1733_v46 = vld [vmem:[#allocation2 + $0x4e0] sm:$0xff] }
 0x18e   :  { %4539 = vmatpush1.bf16.msra.mxu0 %v4538_v47  ;;  %v1706_v47 = vld [vmem:[#allocation2 + $0x408] sm:$0xff]  ;;  %v5078_v43 = vpack.c.bf16 %v1727_v37, %v1723_v33  ;;  %v1737_v62 = vld [vmem:[#allocation2 + $0x500] sm:$0xff]  ;;  %v1739_v2 = vld [vmem:[#allocation2 + $0x510] sm:$0xff] }
 0x18f   :  { %5051 = vmatpush1.bf16.msra.mxu1 %v5050_v49  ;;  %4541 = vmatprep.subr.bf16.mxu0 %v4540_v35  ;;  %v1710_v49 = vld [vmem:[#allocation2 + $0x428] sm:$0xff]  ;;  %v1708_v35 = vld [vmem:[#allocation2 + $0x418] sm:$0xff]  ;;  %v1745_v17 = vld [vmem:[#allocation2 + $0x540] sm:$0xff] }
 0x190   :  { %5053 = vmatprep.subr.bf16.mxu1 %v5052_v55  ;;  %v4556_v55 = vpack.c.bf16 %v1710_v49, %v1706_v47  ;;  %v5068_v63 = vpack.c.bf16 %v1712_v31, %v1708_v35  ;;  %v1731_v47 = vld [vmem:[#allocation2 + $0x4d0] sm:$0xff]  ;;  %v1738_v31 = vld [vmem:[#allocation2 + $0x508] sm:$0xff]  ;;  %v1753_v33 = vld [vmem:[#allocation2 + $0x580] sm:$0xff] }
 0x191   :  { %v1735_v35 = vld [vmem:[#allocation2 + $0x4f0] sm:$0xff] }
 0x192   :  { %4543 = vmatpush1.bf16.msra.mxu0 %v4542_v6  ;;  %v1714_v6 = vld [vmem:[#allocation2 + $0x448] sm:$0xff]  ;;  %v1747_v8 = vld [vmem:[#allocation2 + $0x550] sm:$0xff] }
 0x193   :  { %5055 = vmatpush1.bf16.msra.mxu1 %v5054_v7  ;;  %4545 = vmatprep.subr.bf16.mxu0 %v4544_v10  ;;  %v1718_v7 = vld [vmem:[#allocation2 + $0x468] sm:$0xff]  ;;  %v1716_v10 = vld [vmem:[#allocation2 + $0x458] sm:$0xff]  ;;  %v1755_v37 = vld [vmem:[#allocation2 + $0x590] sm:$0xff] }
 0x194   :  { %5057 = vmatprep.subr.bf16.mxu1 %v5056_v12  ;;  %v4560_v12 = vpack.c.bf16 %v1718_v7, %v1714_v6  ;;  %v5072_v54 = vpack.c.bf16 %v1720_v3, %v1716_v10  ;;  %v1743_v7 = vld [vmem:[#allocation2 + $0x530] sm:$0xff]  ;;  %v1746_v10 = vld [vmem:[#allocation2 + $0x548] sm:$0xff] }
 0x195   :  { %v1750_v3 = vld [vmem:[#allocation2 + $0x568] sm:$0xff]  ;;  %v5086_v15 = vpack.c.bf16 %v1743_v7, %v1739_v2  ;;  %v1769_v2 = vld [vmem:[#allocation2 + $0x600] sm:$0xff]  ;;  %v1771_v7 = vld [vmem:[#allocation2 + $0x610] sm:$0xff] }
 0x196   :  { %4547 = vmatpush1.bf16.msra.mxu0 %v4546_v9  ;;  %v1722_v9 = vld [vmem:[#allocation2 + $0x488] sm:$0xff]  ;;  %v4576_v16 = vpack.c.bf16 %v1750_v3, %v1746_v10  ;;  %v1775_v3 = vld [vmem:[#allocation2 + $0x630] sm:$0xff] }
 0x197   :  { %5059 = vmatpush1.bf16.msra.mxu1 %v5058_v19  ;;  %4549 = vmatprep.subr.bf16.mxu0 %v4548_v20  ;;  %v1726_v19 = vld [vmem:[#allocation2 + $0x4a8] sm:$0xff]  ;;  %v1724_v20 = vld [vmem:[#allocation2 + $0x498] sm:$0xff] }
 0x198   :  { %5061 = vmatprep.subr.bf16.mxu1 %v5060_v29  ;;  %v4564_v29 = vpack.c.bf16 %v1726_v19, %v1722_v9  ;;  %v5076_v36 = vpack.c.bf16 %v1728_v21, %v1724_v20  ;;  %v1751_v19 = vld [vmem:[#allocation2 + $0x570] sm:$0xff]  ;;  %v1754_v20 = vld [vmem:[#allocation2 + $0x588] sm:$0xff] }
 0x199   :  { %v1758_v21 = vld [vmem:[#allocation2 + $0x5a8] sm:$0xff] }
 0x19a   :  { %4551 = vmatpush1.bf16.msra.mxu0 %v4550_v38  ;;  %v1730_v38 = vld [vmem:[#allocation2 + $0x4c8] sm:$0xff] }
 0x19b   :  { %5063 = vmatpush1.bf16.msra.mxu1 %v5062_v39  ;;  %4553 = vmatprep.subr.bf16.mxu0 %v4552_v41  ;;  %v1734_v39 = vld [vmem:[#allocation2 + $0x4e8] sm:$0xff]  ;;  %v1732_v41 = vld [vmem:[#allocation2 + $0x4d8] sm:$0xff] }
 0x19c   :  { %5065 = vmatprep.subr.bf16.mxu1 %v5064_v45  ;;  %v4568_v44 = vpack.c.bf16 %v1734_v39, %v1730_v38  ;;  %v1729_v45 = vld [vmem:[#allocation2 + $0x4c0] sm:$0xff]  ;;  %v5080_v49 = vpack.c.bf16 %v1736_v42, %v1732_v41  ;;  %v1759_v39 = vld [vmem:[#allocation2 + $0x5b0] sm:$0xff]  ;;  %v1762_v41 = vld [vmem:[#allocation2 + $0x5c8] sm:$0xff] }
 0x19d   :  { %v4570_v56 = vpack.c.bf16 %v1733_v46, %v1729_v45  ;;  %v1766_v42 = vld [vmem:[#allocation2 + $0x5e8] sm:$0xff]  ;;  %v5094_v45 = vpack.c.bf16 %v1759_v39, %v1755_v37  ;;  %v1785_v37 = vld [vmem:[#allocation2 + $0x680] sm:$0xff]  ;;  %v1787_v39 = vld [vmem:[#allocation2 + $0x690] sm:$0xff] }
 0x19e   :  { %4555 = vmatpush1.bf16.msra.mxu0 %v4554_v50  ;;  %v1742_v50 = vld [vmem:[#allocation2 + $0x528] sm:$0xff]  ;;  %v4584_v46 = vpack.c.bf16 %v1766_v42, %v1762_v41  ;;  %v1791_v42 = vld [vmem:[#allocation2 + $0x6b0] sm:$0xff] }
 0x19f   :  { %5067 = vmatpush1.bf16.msra.mxu1 %v5066_v51  ;;  %4557 = vmatprep.subr.bf16.mxu0 %v4556_v55  ;;  %v1740_v51 = vld [vmem:[#allocation2 + $0x518] sm:$0xff]  ;;  %v4572_v57 = vpack.c.bf16 %v1742_v50, %v1738_v31  ;;  %v1767_v50 = vld [vmem:[#allocation2 + $0x5f0] sm:$0xff] }
 0x1a0   :  { %5069 = vmatprep.subr.bf16.mxu1 %v5068_v63  ;;  %v1744_v55 = vld [vmem:[#allocation2 + $0x538] sm:$0xff]  ;;  %v1741_v63 = vld [vmem:[#allocation2 + $0x520] sm:$0xff] }
 0x1a1   :  { %2689 = vmatmul.mubr.f32.vlgmr.msra.gmra.mrb[8].mxu0 %v6112_v28  ;;  %v5084_v6 = vpack.c.bf16 %v1744_v55, %v1740_v51  ;;  %v1770_v51 = vld [vmem:[#allocation2 + $0x608] sm:$0xff] }
 0x1a2   :  { %4559 = vmatpush1.bf16.msra.mxu0 %v4558_v4  ;;  %3257 = vmatmul.mubr.f32.vlgmr.msra.gmra.mrb[8].mxu1 %v6112_v28  ;;  %v4566_v28 = vpack.c.bf16 %v1725_v32, %v1721_v30  ;;  %v1748_v4 = vld [vmem:[#allocation2 + $0x558] sm:$0xff]  ;;  %v5090_v30 = vpack.c.bf16 %v1751_v19, %v1747_v8  ;;  %v4580_v32 = vpack.c.bf16 %v1758_v21, %v1754_v20  ;;  %v1774_v55 = vld [vmem:[#allocation2 + $0x628] sm:$0xff]  ;;  %v1777_v8 = vld [vmem:[#allocation2 + $0x640] sm:$0xff] }
 0x1a3   :  { %5071 = vmatpush1.bf16.msra.mxu1 %v5070_v11  ;;  %4561 = vmatprep.subr.bf16.mxu0 %v4560_v12  ;;  %v1752_v11 = vld [vmem:[#allocation2 + $0x578] sm:$0xff]  ;;  %v4574_v12 = vpack.c.bf16 %v1741_v63, %v1737_v62  ;;  %v4588_v63 = vpack.c.bf16 %v1774_v55, %v1770_v51  ;;  %v1779_v19 = vld [vmem:[#allocation2 + $0x650] sm:$0xff] }
 0x1a4   :  { %5073 = vmatprep.subr.bf16.mxu1 %v5072_v54  ;;  %2759 = vmatprep.mubr.f32.mxu0 %v6119_v40  ;;  %v1749_v54 = vld [vmem:[#allocation2 + $0x560] sm:$0xff]  ;;  %v5088_v9 = vpack.c.bf16 %v1752_v11, %v1748_v4  ;;  %v1778_v4 = vld [vmem:[#allocation2 + $0x648] sm:$0xff]  ;;  %v1783_v21 = vld [vmem:[#allocation2 + $0x670] sm:$0xff] }
 0x1a5   :  { %3327 = vmatprep.mubr.f32.mxu1 %v6119_v40  ;;  %v5082_v40 = vpack.c.bf16 %v1735_v35, %v1731_v47  ;;  %v1761_v47 = vld [vmem:[#allocation2 + $0x5c0] sm:$0xff]  ;;  %v1763_v35 = vld [vmem:[#allocation2 + $0x5d0] sm:$0xff]  ;;  %v1782_v11 = vld [vmem:[#allocation2 + $0x668] sm:$0xff] }
 0x1a6   :  { %4563 = vmatpush1.bf16.msra.mxu0 %v4562_v22  ;;  %v1756_v22 = vld [vmem:[#allocation2 + $0x598] sm:$0xff]  ;;  %v5098_v62 = vpack.c.bf16 %v1767_v50, %v1763_v35  ;;  %v1793_v35 = vld [vmem:[#allocation2 + $0x6c0] sm:$0xff]  ;;  %v1795_v50 = vld [vmem:[#allocation2 + $0x6d0] sm:$0xff] }
 0x1a7   :  { %5075 = vmatpush1.bf16.msra.mxu1 %v5074_v24  ;;  %4565 = vmatprep.subr.bf16.mxu0 %v4564_v29  ;;  %v1760_v24 = vld [vmem:[#allocation2 + $0x5b8] sm:$0xff]  ;;  %v4578_v29 = vpack.c.bf16 %v1749_v54, %v1745_v17  ;;  %v5102_v17 = vpack.c.bf16 %v1775_v3, %v1771_v7  ;;  %v4592_v54 = vpack.c.bf16 %v1782_v11, %v1778_v4  ;;  %v1799_v55 = vld [vmem:[#allocation2 + $0x6f0] sm:$0xff]  ;;  %v1801_v7 = vld [vmem:[#allocation2 + $0x700] sm:$0xff] }
 0x1a8   :  { %5077 = vmatprep.subr.bf16.mxu1 %v5076_v36  ;;  %v1757_v36 = vld [vmem:[#allocation2 + $0x5a0] sm:$0xff]  ;;  %v5092_v38 = vpack.c.bf16 %v1760_v24, %v1756_v22  ;;  %v1786_v22 = vld [vmem:[#allocation2 + $0x688] sm:$0xff]  ;;  %v1803_v3 = vld [vmem:[#allocation2 + $0x710] sm:$0xff] }
 0x1a9   :  { %v1790_v24 = vld [vmem:[#allocation2 + $0x6a8] sm:$0xff]  ;;  %v1807_v11 = vld [vmem:[#allocation2 + $0x730] sm:$0xff] }
 0x1aa   :  { %4567 = vmatpush1.bf16.msra.mxu0 %v4566_v28  ;;  %v1764_v28 = vld [vmem:[#allocation2 + $0x5d8] sm:$0xff] }
 0x1ab   :  { %5079 = vmatpush1.bf16.msra.mxu1 %v5078_v43  ;;  %4569 = vmatprep.subr.bf16.mxu0 %v4568_v44  ;;  %v1768_v43 = vld [vmem:[#allocation2 + $0x5f8] sm:$0xff]  ;;  %v4582_v44 = vpack.c.bf16 %v1757_v36, %v1753_v33  ;;  %v5106_v33 = vpack.c.bf16 %v1783_v21, %v1779_v19  ;;  %v4596_v36 = vpack.c.bf16 %v1790_v24, %v1786_v22  ;;  %v1809_v19 = vld [vmem:[#allocation2 + $0x740] sm:$0xff]  ;;  %v1811_v21 = vld [vmem:[#allocation2 + $0x750] sm:$0xff] }
 0x1ac   :  { %5081 = vmatprep.subr.bf16.mxu1 %v5080_v49  ;;  %v1765_v49 = vld [vmem:[#allocation2 + $0x5e0] sm:$0xff]  ;;  %v5096_v31 = vpack.c.bf16 %v1768_v43, %v1764_v28  ;;  %v1794_v28 = vld [vmem:[#allocation2 + $0x6c8] sm:$0xff]  ;;  %v1815_v24 = vld [vmem:[#allocation2 + $0x770] sm:$0xff] }
 0x1ad   :  { %v1798_v43 = vld [vmem:[#allocation2 + $0x6e8] sm:$0xff] }
 0x1ae   :  { %4571 = vmatpush1.bf16.msra.mxu0 %v4570_v56  ;;  %v1772_v56 = vld [vmem:[#allocation2 + $0x618] sm:$0xff] }
 0x1af   :  { %5083 = vmatpush1.bf16.msra.mxu1 %v5082_v40  ;;  %4573 = vmatprep.subr.bf16.mxu0 %v4572_v57  ;;  %v1776_v40 = vld [vmem:[#allocation2 + $0x638] sm:$0xff]  ;;  %v4586_v57 = vpack.c.bf16 %v1765_v49, %v1761_v47  ;;  %v5110_v47 = vpack.c.bf16 %v1791_v42, %v1787_v39  ;;  %v4600_v49 = vpack.c.bf16 %v1798_v43, %v1794_v28  ;;  %v1817_v39 = vld [vmem:[#allocation2 + $0x780] sm:$0xff]  ;;  %v1819_v42 = vld [vmem:[#allocation2 + $0x790] sm:$0xff] }
 0x1b0   :  { %5085 = vmatprep.subr.bf16.mxu1 %v5084_v6  ;;  %v1773_v6 = vld [vmem:[#allocation2 + $0x620] sm:$0xff]  ;;  %v5100_v10 = vpack.c.bf16 %v1776_v40, %v1772_v56  ;;  %v1802_v56 = vld [vmem:[#allocation2 + $0x708] sm:$0xff]  ;;  %v1823_v43 = vld [vmem:[#allocation2 + $0x7b0] sm:$0xff] }
 0x1b1   :  { %v1806_v40 = vld [vmem:[#allocation2 + $0x728] sm:$0xff] }
 0x1b2   :  { %4575 = vmatpush1.bf16.msra.mxu0 %v4574_v12  ;;  %v1780_v12 = vld [vmem:[#allocation2 + $0x658] sm:$0xff] }
 0x1b3   :  { %5087 = vmatpush1.bf16.msra.mxu1 %v5086_v15  ;;  %4577 = vmatprep.subr.bf16.mxu0 %v4576_v16  ;;  %v1784_v15 = vld [vmem:[#allocation2 + $0x678] sm:$0xff]  ;;  %v4590_v16 = vpack.c.bf16 %v1773_v6, %v1769_v2  ;;  %v5114_v2 = vpack.c.bf16 %v1799_v55, %v1795_v50  ;;  %v4604_v6 = vpack.c.bf16 %v1806_v40, %v1802_v56  ;;  %v1825_v50 = vld [vmem:[#allocation2 + $0x7c0] sm:$0xff]  ;;  %v1827_v55 = vld [vmem:[#allocation2 + $0x7d0] sm:$0xff] }
 0x1b4   :  { %5089 = vmatprep.subr.bf16.mxu1 %v5088_v9  ;;  %v1781_v9 = vld [vmem:[#allocation2 + $0x660] sm:$0xff]  ;;  %v5104_v20 = vpack.c.bf16 %v1784_v15, %v1780_v12  ;;  %v1810_v12 = vld [vmem:[#allocation2 + $0x748] sm:$0xff]  ;;  %v1831_v40 = vld [vmem:[#allocation2 + $0x7f0] sm:$0xff] }
 0x1b5   :  { %v1814_v15 = vld [vmem:[#allocation2 + $0x768] sm:$0xff] }
 0x1b6   :  { %4579 = vmatpush1.bf16.msra.mxu0 %v4578_v29  ;;  %v1788_v29 = vld [vmem:[#allocation2 + $0x698] sm:$0xff] }
 0x1b7   :  { %5091 = vmatpush1.bf16.msra.mxu1 %v5090_v30  ;;  %4581 = vmatprep.subr.bf16.mxu0 %v4580_v32  ;;  %v1792_v30 = vld [vmem:[#allocation2 + $0x6b8] sm:$0xff]  ;;  %v4594_v32 = vpack.c.bf16 %v1781_v9, %v1777_v8  ;;  %v5118_v8 = vpack.c.bf16 %v1807_v11, %v1803_v3  ;;  %v4608_v9 = vpack.c.bf16 %v1814_v15, %v1810_v12  ;;  %v1833_v3 = vld [vmem:[#allocation2 + $0x800] sm:$0xff]  ;;  %v1835_v11 = vld [vmem:[#allocation2 + $0x810] sm:$0xff] }
 0x1b8   :  { %5093 = vmatprep.subr.bf16.mxu1 %v5092_v38  ;;  %v1789_v38 = vld [vmem:[#allocation2 + $0x6a0] sm:$0xff]  ;;  %v5108_v41 = vpack.c.bf16 %v1792_v30, %v1788_v29  ;;  %v1818_v29 = vld [vmem:[#allocation2 + $0x788] sm:$0xff]  ;;  %v1839_v15 = vld [vmem:[#allocation2 + $0x830] sm:$0xff] }
 0x1b9   :  { %v1822_v30 = vld [vmem:[#allocation2 + $0x7a8] sm:$0xff] }
 0x1ba   :  { %4583 = vmatpush1.bf16.msra.mxu0 %v4582_v44  ;;  %v1796_v44 = vld [vmem:[#allocation2 + $0x6d8] sm:$0xff] }
 0x1bb   :  { %5095 = vmatpush1.bf16.msra.mxu1 %v5094_v45  ;;  %4585 = vmatprep.subr.bf16.mxu0 %v4584_v46  ;;  %v1800_v45 = vld [vmem:[#allocation2 + $0x6f8] sm:$0xff]  ;;  %v4598_v46 = vpack.c.bf16 %v1789_v38, %v1785_v37  ;;  %v5122_v37 = vpack.c.bf16 %v1815_v24, %v1811_v21  ;;  %v4612_v38 = vpack.c.bf16 %v1822_v30, %v1818_v29  ;;  %v1841_v21 = vld [vmem:[#allocation2 + $0x840] sm:$0xff]  ;;  %v1843_v24 = vld [vmem:[#allocation2 + $0x850] sm:$0xff] }
 0x1bc   :  { %5097 = vmatprep.subr.bf16.mxu1 %v5096_v31  ;;  %v1797_v31 = vld [vmem:[#allocation2 + $0x6e0] sm:$0xff]  ;;  %v5112_v51 = vpack.c.bf16 %v1800_v45, %v1796_v44  ;;  %v1826_v44 = vld [vmem:[#allocation2 + $0x7c8] sm:$0xff]  ;;  %v1847_v30 = vld [vmem:[#allocation2 + $0x870] sm:$0xff] }
 0x1bd   :  { %v1830_v45 = vld [vmem:[#allocation2 + $0x7e8] sm:$0xff] }
 0x1be   :  { %4587 = vmatpush1.bf16.msra.mxu0 %v4586_v57  ;;  %v1804_v57 = vld [vmem:[#allocation2 + $0x718] sm:$0xff] }
 0x1bf   :  { %5099 = vmatpush1.bf16.msra.mxu1 %v5098_v62  ;;  %4589 = vmatprep.subr.bf16.mxu0 %v4588_v63  ;;  %v1808_v62 = vld [vmem:[#allocation2 + $0x738] sm:$0xff]  ;;  %v4602_v63 = vpack.c.bf16 %v1797_v31, %v1793_v35  ;;  %v5126_v35 = vpack.c.bf16 %v1823_v43, %v1819_v42  ;;  %v4616_v31 = vpack.c.bf16 %v1830_v45, %v1826_v44  ;;  %v1849_v42 = vld [vmem:[#allocation2 + $0x880] sm:$0xff]  ;;  %v1851_v43 = vld [vmem:[#allocation2 + $0x890] sm:$0xff] }
 0x1c0   :  { %5101 = vmatprep.subr.bf16.mxu1 %v5100_v10  ;;  %v1805_v10 = vld [vmem:[#allocation2 + $0x720] sm:$0xff]  ;;  %v5116_v4 = vpack.c.bf16 %v1808_v62, %v1804_v57  ;;  %v1834_v57 = vld [vmem:[#allocation2 + $0x808] sm:$0xff]  ;;  %v1855_v45 = vld [vmem:[#allocation2 + $0x8b0] sm:$0xff] }
 0x1c1   :  { %v1838_v62 = vld [vmem:[#allocation2 + $0x828] sm:$0xff] }
 0x1c2   :  { %4591 = vmatpush1.bf16.msra.mxu0 %v4590_v16  ;;  %v1812_v16 = vld [vmem:[#allocation2 + $0x758] sm:$0xff] }
 0x1c3   :  { %5103 = vmatpush1.bf16.msra.mxu1 %v5102_v17  ;;  %4593 = vmatprep.subr.bf16.mxu0 %v4592_v54  ;;  %v1816_v17 = vld [vmem:[#allocation2 + $0x778] sm:$0xff]  ;;  %v4606_v54 = vpack.c.bf16 %v1805_v10, %v1801_v7  ;;  %v5130_v7 = vpack.c.bf16 %v1831_v40, %v1827_v55  ;;  %v4620_v10 = vpack.c.bf16 %v1838_v62, %v1834_v57  ;;  %v1861_v55 = vld [vmem:[#allocation2 + $0x8e0] sm:$0xff]  ;;  %v1863_v57 = vld [vmem:[#allocation2 + $0x8f0] sm:$0xff] }
 0x1c4   :  { %5105 = vmatprep.subr.bf16.mxu1 %v5104_v20  ;;  %v1813_v20 = vld [vmem:[#allocation2 + $0x760] sm:$0xff]  ;;  %v5120_v22 = vpack.c.bf16 %v1816_v17, %v1812_v16  ;;  %v1842_v16 = vld [vmem:[#allocation2 + $0x848] sm:$0xff] }
 0x1c5   :  { %v1846_v17 = vld [vmem:[#allocation2 + $0x868] sm:$0xff] }
 0x1c6   :  { %4595 = vmatpush1.bf16.msra.mxu0 %v4594_v32  ;;  %v1820_v32 = vld [vmem:[#allocation2 + $0x798] sm:$0xff]  ;;  %v1866_v62 = vld [vmem:[#allocation2 + $0x908] sm:$0xff] }
 0x1c7   :  { %5107 = vmatpush1.bf16.msra.mxu1 %v5106_v33  ;;  %4597 = vmatprep.subr.bf16.mxu0 %v4596_v36  ;;  %v1824_v33 = vld [vmem:[#allocation2 + $0x7b8] sm:$0xff]  ;;  %v4610_v36 = vpack.c.bf16 %v1813_v20, %v1809_v19  ;;  %v5134_v19 = vpack.c.bf16 %v1839_v15, %v1835_v11  ;;  %v4624_v20 = vpack.c.bf16 %v1846_v17, %v1842_v16  ;;  %v1867_v11 = vld [vmem:[#allocation2 + $0x910] sm:$0xff]  ;;  %v1874_v16 = vld [vmem:[#allocation2 + $0x948] sm:$0xff] }
 0x1c8   :  { %5109 = vmatprep.subr.bf16.mxu1 %v5108_v41  ;;  %v1821_v41 = vld [vmem:[#allocation2 + $0x7a0] sm:$0xff]  ;;  %v5124_v28 = vpack.c.bf16 %v1824_v33, %v1820_v32  ;;  %v1850_v32 = vld [vmem:[#allocation2 + $0x888] sm:$0xff]  ;;  %v1871_v15 = vld [vmem:[#allocation2 + $0x930] sm:$0xff] }
 0x1c9   :  { %v1854_v33 = vld [vmem:[#allocation2 + $0x8a8] sm:$0xff] }
 0x1ca   :  { %4599 = vmatpush1.bf16.msra.mxu0 %v4598_v46  ;;  %v1828_v46 = vld [vmem:[#allocation2 + $0x7d8] sm:$0xff]  ;;  %v1878_v17 = vld [vmem:[#allocation2 + $0x968] sm:$0xff] }
 0x1cb   :  { %5111 = vmatpush1.bf16.msra.mxu1 %v5110_v47  ;;  %4601 = vmatprep.subr.bf16.mxu0 %v4600_v49  ;;  %v1832_v47 = vld [vmem:[#allocation2 + $0x7f8] sm:$0xff]  ;;  %v4614_v49 = vpack.c.bf16 %v1821_v41, %v1817_v39  ;;  %v5138_v39 = vpack.c.bf16 %v1847_v30, %v1843_v24  ;;  %v4628_v41 = vpack.c.bf16 %v1854_v33, %v1850_v32  ;;  %v1875_v24 = vld [vmem:[#allocation2 + $0x950] sm:$0xff]  ;;  %v1882_v32 = vld [vmem:[#allocation2 + $0x988] sm:$0xff] }
 0x1cc   :  { %5113 = vmatprep.subr.bf16.mxu1 %v5112_v51  ;;  %v1829_v51 = vld [vmem:[#allocation2 + $0x7e0] sm:$0xff]  ;;  %v5128_v56 = vpack.c.bf16 %v1832_v47, %v1828_v46  ;;  %v1858_v46 = vld [vmem:[#allocation2 + $0x8c8] sm:$0xff]  ;;  %v1879_v30 = vld [vmem:[#allocation2 + $0x970] sm:$0xff] }
 0x1cd   :  { %v1862_v47 = vld [vmem:[#allocation2 + $0x8e8] sm:$0xff] }
 0x1ce   :  { %4603 = vmatpush1.bf16.msra.mxu0 %v4602_v63  ;;  %v1836_v63 = vld [vmem:[#allocation2 + $0x818] sm:$0xff]  ;;  %v1886_v33 = vld [vmem:[#allocation2 + $0x9a8] sm:$0xff] }
 0x1cf   :  { %5115 = vmatpush1.bf16.msra.mxu1 %v5114_v2  ;;  %4605 = vmatprep.subr.bf16.mxu0 %v4604_v6  ;;  %v1840_v2 = vld [vmem:[#allocation2 + $0x838] sm:$0xff]  ;;  %v4618_v6 = vpack.c.bf16 %v1829_v51, %v1825_v50  ;;  %v4632_v50 = vpack.c.bf16 %v1862_v47, %v1858_v46  ;;  %v1857_v51 = vld [vmem:[#allocation2 + $0x8c0] sm:$0xff]  ;;  %v1890_v46 = vld [vmem:[#allocation2 + $0x9c8] sm:$0xff] }
 0x1d0   :  { %5117 = vmatprep.subr.bf16.mxu1 %v5116_v4  ;;  %v1837_v4 = vld [vmem:[#allocation2 + $0x820] sm:$0xff]  ;;  %v5132_v12 = vpack.c.bf16 %v1840_v2, %v1836_v63  ;;  %v1870_v63 = vld [vmem:[#allocation2 + $0x928] sm:$0xff]  ;;  %v1868_v2 = vld [vmem:[#allocation2 + $0x918] sm:$0xff] }
 0x1d1   :  { %v1894_v47 = vld [vmem:[#allocation2 + $0x9e8] sm:$0xff] }
 0x1d2   :  { %4607 = vmatpush1.bf16.msra.mxu0 %v4606_v54  ;;  %v1844_v54 = vld [vmem:[#allocation2 + $0x858] sm:$0xff] }
 0x1d3   :  { %5119 = vmatpush1.bf16.msra.mxu1 %v5118_v8  ;;  %4609 = vmatprep.subr.bf16.mxu0 %v4608_v9  ;;  %v1848_v8 = vld [vmem:[#allocation2 + $0x878] sm:$0xff]  ;;  %v4622_v9 = vpack.c.bf16 %v1837_v4, %v1833_v3  ;;  %v1865_v3 = vld [vmem:[#allocation2 + $0x900] sm:$0xff] }
 0x1d4   :  { %5121 = vmatprep.subr.bf16.mxu1 %v5120_v22  ;;  %v1845_v22 = vld [vmem:[#allocation2 + $0x860] sm:$0xff]  ;;  %v5136_v29 = vpack.c.bf16 %v1848_v8, %v1844_v54  ;;  %v1876_v54 = vld [vmem:[#allocation2 + $0x958] sm:$0xff] }
 0x1d5   :  { %v1869_v4 = vld [vmem:[#allocation2 + $0x920] sm:$0xff]  ;;  %v1880_v8 = vld [vmem:[#allocation2 + $0x978] sm:$0xff] }
 0x1d6   :  { %4611 = vmatpush1.bf16.msra.mxu0 %v4610_v36  ;;  %v1852_v36 = vld [vmem:[#allocation2 + $0x898] sm:$0xff] }
 0x1d7   :  { %5123 = vmatpush1.bf16.msra.mxu1 %v5122_v37  ;;  %4613 = vmatprep.subr.bf16.mxu0 %v4612_v38  ;;  %v1856_v37 = vld [vmem:[#allocation2 + $0x8b8] sm:$0xff]  ;;  %v4626_v38 = vpack.c.bf16 %v1845_v22, %v1841_v21  ;;  %v1873_v21 = vld [vmem:[#allocation2 + $0x940] sm:$0xff] }
 0x1d8   :  { %5125 = vmatprep.subr.bf16.mxu1 %v5124_v28  ;;  %v1853_v28 = vld [vmem:[#allocation2 + $0x8a0] sm:$0xff]  ;;  %v5140_v44 = vpack.c.bf16 %v1856_v37, %v1852_v36  ;;  %v1884_v36 = vld [vmem:[#allocation2 + $0x998] sm:$0xff] }
 0x1d9   :  { %v1877_v22 = vld [vmem:[#allocation2 + $0x960] sm:$0xff]  ;;  %v1888_v37 = vld [vmem:[#allocation2 + $0x9b8] sm:$0xff] }
 0x1da   :  { %4615 = vmatpush1.bf16.msra.mxu0 %v4614_v49  ;;  %v1860_v49 = vld [vmem:[#allocation2 + $0x8d8] sm:$0xff] }
 0x1db   :  { %5127 = vmatpush1.bf16.msra.mxu1 %v5126_v35  ;;  %4617 = vmatprep.subr.bf16.mxu0 %v4616_v31  ;;  %v1864_v35 = vld [vmem:[#allocation2 + $0x8f8] sm:$0xff]  ;;  %v5142_v31 = vpack.c.bf16 %v1855_v45, %v1851_v43  ;;  %v1883_v43 = vld [vmem:[#allocation2 + $0x990] sm:$0xff] }
 0x1dc   :  { %5129 = vmatprep.subr.bf16.mxu1 %v5128_v56  ;;  %v1859_v56 = vld [vmem:[#allocation2 + $0x8d0] sm:$0xff]  ;;  %v5144_v40 = vpack.c.bf16 %v1864_v35, %v1860_v49  ;;  %v1892_v49 = vld [vmem:[#allocation2 + $0x9d8] sm:$0xff] }
 0x1dd   :  { %v1887_v45 = vld [vmem:[#allocation2 + $0x9b0] sm:$0xff]  ;;  %v1896_v35 = vld [vmem:[#allocation2 + $0x9f8] sm:$0xff] }
 0x1de   :  { %4619 = vmatpush1.bf16.msra.mxu0 %v4618_v6  ;;  %v1872_v6 = vld [vmem:[#allocation2 + $0x938] sm:$0xff] }
 0x1df   :  { %5131 = vmatpush1.bf16.msra.mxu1 %v5130_v7  ;;  %4621 = vmatprep.subr.bf16.mxu0 %v4620_v10  ;;  %v4634_v7 = vpack.c.bf16 %v1861_v55, %v1857_v51  ;;  %v4636_v10 = vpack.c.bf16 %v1870_v63, %v1866_v62  ;;  %v1889_v51 = vld [vmem:[#allocation2 + $0x9c0] sm:$0xff]  ;;  %v1898_v62 = vld [vmem:[#allocation2 + $0xa08] sm:$0xff] }
 0x1e0   :  { %5133 = vmatprep.subr.bf16.mxu1 %v5132_v12  ;;  %v5148_v12 = vpack.c.bf16 %v1872_v6, %v1868_v2  ;;  %v1893_v55 = vld [vmem:[#allocation2 + $0x9e0] sm:$0xff]  ;;  %v1902_v63 = vld [vmem:[#allocation2 + $0xa28] sm:$0xff]  ;;  %v1900_v2 = vld [vmem:[#allocation2 + $0xa18] sm:$0xff] }
 0x1e1   :  { %2760 = vmatmul.mubr.f32.vlgmr.msra.gmra.mrb[8].mxu0 %v6115_v34  ;;  %v1904_v6 = vld [vmem:[#allocation2 + $0xa38] sm:$0xff] }
 0x1e2   :  { %4623 = vmatpush1.bf16.msra.mxu0 %v4622_v9  ;;  %3328 = vmatmul.mubr.f32.vlgmr.msra.gmra.mrb[8].mxu1 %v6115_v34  ;;  %v4630_v34 = vpack.c.bf16 %v1853_v28, %v1849_v42  ;;  %v4638_v9 = vpack.c.bf16 %v1869_v4, %v1865_v3  ;;  %v1881_v42 = vld [vmem:[#allocation2 + $0x980] sm:$0xff] }
 0x1e3   :  { %5135 = vmatpush1.bf16.msra.mxu1 %v5134_v19  ;;  %4625 = vmatprep.subr.bf16.mxu0 %v4624_v20  ;;  %v5150_v19 = vpack.c.bf16 %v1871_v15, %v1867_v11  ;;  %v4640_v20 = vpack.c.bf16 %v1878_v17, %v1874_v16  ;;  %v1885_v28 = vld [vmem:[#allocation2 + $0x9a0] sm:$0xff]  ;;  %v1899_v11 = vld [vmem:[#allocation2 + $0xa10] sm:$0xff]  ;;  %v1906_v16 = vld [vmem:[#allocation2 + $0xa48] sm:$0xff] }
 0x1e4   :  { %5137 = vmatprep.subr.bf16.mxu1 %v5136_v29  ;;  %2830 = vmatprep.mubr.f32.mxu0 %v6126_v52  ;;  %v5152_v29 = vpack.c.bf16 %v1880_v8, %v1876_v54  ;;  %v1897_v3 = vld [vmem:[#allocation2 + $0xa00] sm:$0xff]  ;;  %v1903_v15 = vld [vmem:[#allocation2 + $0xa30] sm:$0xff]  ;;  %v1910_v17 = vld [vmem:[#allocation2 + $0xa68] sm:$0xff] }
 0x1e5   :  { %3398 = vmatprep.mubr.f32.mxu1 %v6126_v52  ;;  %v5146_v52 = vpack.c.bf16 %v1863_v57, %v1859_v56  ;;  %v1891_v56 = vld [vmem:[#allocation2 + $0x9d0] sm:$0xff]  ;;  %v1901_v4 = vld [vmem:[#allocation2 + $0xa20] sm:$0xff]  ;;  %v1908_v54 = vld [vmem:[#allocation2 + $0xa58] sm:$0xff] }
 0x1e6   :  { %4627 = vmatpush1.bf16.msra.mxu0 %v4626_v38  ;;  %v4642_v38 = vpack.c.bf16 %v1877_v22, %v1873_v21  ;;  %v1895_v57 = vld [vmem:[#allocation2 + $0x9f0] sm:$0xff]  ;;  %v1912_v8 = vld [vmem:[#allocation2 + $0xa78] sm:$0xff]  ;;  %v1905_v21 = vld [vmem:[#allocation2 + $0xa40] sm:$0xff] }
 0x1e7   :  { %5139 = vmatpush1.bf16.msra.mxu1 %v5138_v39  ;;  %4629 = vmatprep.subr.bf16.mxu0 %v4628_v41  ;;  %v5154_v39 = vpack.c.bf16 %v1879_v30, %v1875_v24  ;;  %v4644_v41 = vpack.c.bf16 %v1886_v33, %v1882_v32  ;;  %v1909_v22 = vld [vmem:[#allocation2 + $0xa60] sm:$0xff]  ;;  %v1907_v24 = vld [vmem:[#allocation2 + $0xa50] sm:$0xff]  ;;  %v1914_v32 = vld [vmem:[#allocation2 + $0xa88] sm:$0xff] }
 0x1e8   :  { %5141 = vmatprep.subr.bf16.mxu1 %v5140_v44  ;;  %v5156_v44 = vpack.c.bf16 %v1888_v37, %v1884_v36  ;;  %v1911_v30 = vld [vmem:[#allocation2 + $0xa70] sm:$0xff]  ;;  %v1918_v33 = vld [vmem:[#allocation2 + $0xaa8] sm:$0xff]  ;;  %v1916_v36 = vld [vmem:[#allocation2 + $0xa98] sm:$0xff] }
 0x1e9   :  { %v1920_v37 = vld [vmem:[#allocation2 + $0xab8] sm:$0xff] }
 0x1ea   :  { %4631 = vmatpush1.bf16.msra.mxu0 %v4630_v34  ;;  %v4646_v34 = vpack.c.bf16 %v1885_v28, %v1881_v42  ;;  %v1913_v42 = vld [vmem:[#allocation2 + $0xa80] sm:$0xff] }
 0x1eb   :  { %5143 = vmatpush1.bf16.msra.mxu1 %v5142_v31  ;;  %4633 = vmatprep.subr.bf16.mxu0 %v4632_v50  ;;  %v5158_v31 = vpack.c.bf16 %v1887_v45, %v1883_v43  ;;  %v4648_v50 = vpack.c.bf16 %v1894_v47, %v1890_v46  ;;  %v1917_v28 = vld [vmem:[#allocation2 + $0xaa0] sm:$0xff]  ;;  %v1915_v43 = vld [vmem:[#allocation2 + $0xa90] sm:$0xff]  ;;  %v1922_v46 = vld [vmem:[#allocation2 + $0xac8] sm:$0xff] }
 0x1ec   :  { %5145 = vmatprep.subr.bf16.mxu1 %v5144_v40  ;;  %v5160_v40 = vpack.c.bf16 %v1896_v35, %v1892_v49  ;;  %v1919_v45 = vld [vmem:[#allocation2 + $0xab0] sm:$0xff]  ;;  %v1926_v47 = vld [vmem:[#allocation2 + $0xae8] sm:$0xff]  ;;  %v1924_v49 = vld [vmem:[#allocation2 + $0xad8] sm:$0xff] }
 0x1ed   :  { %v1928_v35 = vld [vmem:[#allocation2 + $0xaf8] sm:$0xff] }
 0x1ee   :  { %4635 = vmatpush1.bf16.msra.mxu0 %v4634_v7  ;;  %v4650_v7 = vpack.c.bf16 %v1893_v55, %v1889_v51  ;;  %v1921_v51 = vld [vmem:[#allocation2 + $0xac0] sm:$0xff] }
 0x1ef   :  { %5147 = vmatpush1.bf16.msra.mxu1 %v5146_v52  ;;  %4637 = vmatprep.subr.bf16.mxu0 %v4636_v10  ;;  %v5162_v52 = vpack.c.bf16 %v1895_v57, %v1891_v56  ;;  %v4652_v10 = vpack.c.bf16 %v1902_v63, %v1898_v62  ;;  %v1925_v55 = vld [vmem:[#allocation2 + $0xae0] sm:$0xff]  ;;  %v1923_v56 = vld [vmem:[#allocation2 + $0xad0] sm:$0xff]  ;;  %v1930_v62 = vld [vmem:[#allocation2 + $0xb08] sm:$0xff] }
 0x1f0   :  { %5149 = vmatprep.subr.bf16.mxu1 %v5148_v12  ;;  %v5164_v12 = vpack.c.bf16 %v1904_v6, %v1900_v2  ;;  %v1927_v57 = vld [vmem:[#allocation2 + $0xaf0] sm:$0xff]  ;;  %v1934_v63 = vld [vmem:[#allocation2 + $0xb28] sm:$0xff]  ;;  %v1932_v2 = vld [vmem:[#allocation2 + $0xb18] sm:$0xff] }
 0x1f1   :  { %v1936_v6 = vld [vmem:[#allocation2 + $0xb38] sm:$0xff] }
 0x1f2   :  { %4639 = vmatpush1.bf16.msra.mxu0 %v4638_v9  ;;  %v4654_v9 = vpack.c.bf16 %v1901_v4, %v1897_v3  ;;  %v1929_v3 = vld [vmem:[#allocation2 + $0xb00] sm:$0xff] }
 0x1f3   :  { %5151 = vmatpush1.bf16.msra.mxu1 %v5150_v19  ;;  %4641 = vmatprep.subr.bf16.mxu0 %v4640_v20  ;;  %v5166_v19 = vpack.c.bf16 %v1903_v15, %v1899_v11  ;;  %v4656_v20 = vpack.c.bf16 %v1910_v17, %v1906_v16  ;;  %v1933_v4 = vld [vmem:[#allocation2 + $0xb20] sm:$0xff]  ;;  %v1931_v11 = vld [vmem:[#allocation2 + $0xb10] sm:$0xff]  ;;  %v1938_v16 = vld [vmem:[#allocation2 + $0xb48] sm:$0xff] }
 0x1f4   :  { %5153 = vmatprep.subr.bf16.mxu1 %v5152_v29  ;;  %v5168_v29 = vpack.c.bf16 %v1912_v8, %v1908_v54  ;;  %v1935_v15 = vld [vmem:[#allocation2 + $0xb30] sm:$0xff]  ;;  %v1942_v17 = vld [vmem:[#allocation2 + $0xb68] sm:$0xff]  ;;  %v1940_v54 = vld [vmem:[#allocation2 + $0xb58] sm:$0xff] }
 0x1f5   :  { %v1944_v8 = vld [vmem:[#allocation2 + $0xb78] sm:$0xff] }
 0x1f6   :  { %4643 = vmatpush1.bf16.msra.mxu0 %v4642_v38  ;;  %v4658_v38 = vpack.c.bf16 %v1909_v22, %v1905_v21  ;;  %v1937_v21 = vld [vmem:[#allocation2 + $0xb40] sm:$0xff] }
 0x1f7   :  { %5155 = vmatpush1.bf16.msra.mxu1 %v5154_v39  ;;  %4645 = vmatprep.subr.bf16.mxu0 %v4644_v41  ;;  %v5170_v39 = vpack.c.bf16 %v1911_v30, %v1907_v24  ;;  %v4660_v41 = vpack.c.bf16 %v1918_v33, %v1914_v32  ;;  %v1941_v22 = vld [vmem:[#allocation2 + $0xb60] sm:$0xff]  ;;  %v1939_v24 = vld [vmem:[#allocation2 + $0xb50] sm:$0xff]  ;;  %v1946_v32 = vld [vmem:[#allocation2 + $0xb88] sm:$0xff] }
 0x1f8   :  { %5157 = vmatprep.subr.bf16.mxu1 %v5156_v44  ;;  %v5172_v44 = vpack.c.bf16 %v1920_v37, %v1916_v36  ;;  %v1943_v30 = vld [vmem:[#allocation2 + $0xb70] sm:$0xff]  ;;  %v1950_v33 = vld [vmem:[#allocation2 + $0xba8] sm:$0xff]  ;;  %v1948_v36 = vld [vmem:[#allocation2 + $0xb98] sm:$0xff] }
 0x1f9   :  { %v1952_v37 = vld [vmem:[#allocation2 + $0xbb8] sm:$0xff] }
 0x1fa   :  { %4647 = vmatpush1.bf16.msra.mxu0 %v4646_v34  ;;  %v4662_v34 = vpack.c.bf16 %v1917_v28, %v1913_v42  ;;  %v1945_v42 = vld [vmem:[#allocation2 + $0xb80] sm:$0xff] }
 0x1fb   :  { %5159 = vmatpush1.bf16.msra.mxu1 %v5158_v31  ;;  %4649 = vmatprep.subr.bf16.mxu0 %v4648_v50  ;;  %v5174_v31 = vpack.c.bf16 %v1919_v45, %v1915_v43  ;;  %v4664_v50 = vpack.c.bf16 %v1926_v47, %v1922_v46  ;;  %v1949_v28 = vld [vmem:[#allocation2 + $0xba0] sm:$0xff]  ;;  %v1947_v43 = vld [vmem:[#allocation2 + $0xb90] sm:$0xff]  ;;  %v1954_v46 = vld [vmem:[#allocation2 + $0xbc8] sm:$0xff] }
 0x1fc   :  { %5161 = vmatprep.subr.bf16.mxu1 %v5160_v40  ;;  %v5176_v40 = vpack.c.bf16 %v1928_v35, %v1924_v49  ;;  %v1951_v45 = vld [vmem:[#allocation2 + $0xbb0] sm:$0xff]  ;;  %v1958_v47 = vld [vmem:[#allocation2 + $0xbe8] sm:$0xff]  ;;  %v1956_v49 = vld [vmem:[#allocation2 + $0xbd8] sm:$0xff] }
 0x1fd   :  { %v1960_v35 = vld [vmem:[#allocation2 + $0xbf8] sm:$0xff] }
 0x1fe   :  { %4651 = vmatpush1.bf16.msra.mxu0 %v4650_v7  ;;  %v4666_v7 = vpack.c.bf16 %v1925_v55, %v1921_v51  ;;  %v1953_v51 = vld [vmem:[#allocation2 + $0xbc0] sm:$0xff] }
 0x1ff   :  { %5163 = vmatpush1.bf16.msra.mxu1 %v5162_v52  ;;  %4653 = vmatprep.subr.bf16.mxu0 %v4652_v10  ;;  %v5178_v52 = vpack.c.bf16 %v1927_v57, %v1923_v56  ;;  %v4668_v10 = vpack.c.bf16 %v1934_v63, %v1930_v62  ;;  %v1957_v55 = vld [vmem:[#allocation2 + $0xbe0] sm:$0xff]  ;;  %v1955_v56 = vld [vmem:[#allocation2 + $0xbd0] sm:$0xff]  ;;  %v1962_v62 = vld [vmem:[#allocation2 + $0xc08] sm:$0xff] }
 0x200   :  { %5165 = vmatprep.subr.bf16.mxu1 %v5164_v12  ;;  %v5180_v12 = vpack.c.bf16 %v1936_v6, %v1932_v2  ;;  %v1959_v57 = vld [vmem:[#allocation2 + $0xbf0] sm:$0xff]  ;;  %v1966_v63 = vld [vmem:[#allocation2 + $0xc28] sm:$0xff]  ;;  %v1964_v2 = vld [vmem:[#allocation2 + $0xc18] sm:$0xff] }
 0x201   :  { %v1968_v6 = vld [vmem:[#allocation2 + $0xc38] sm:$0xff] }
 0x202   :  { %4655 = vmatpush1.bf16.msra.mxu0 %v4654_v9  ;;  %v4670_v9 = vpack.c.bf16 %v1933_v4, %v1929_v3  ;;  %v1961_v3 = vld [vmem:[#allocation2 + $0xc00] sm:$0xff] }
 0x203   :  { %5167 = vmatpush1.bf16.msra.mxu1 %v5166_v19  ;;  %4657 = vmatprep.subr.bf16.mxu0 %v4656_v20  ;;  %v5182_v19 = vpack.c.bf16 %v1935_v15, %v1931_v11  ;;  %v4672_v20 = vpack.c.bf16 %v1942_v17, %v1938_v16  ;;  %v1965_v4 = vld [vmem:[#allocation2 + $0xc20] sm:$0xff]  ;;  %v1963_v11 = vld [vmem:[#allocation2 + $0xc10] sm:$0xff]  ;;  %v1970_v16 = vld [vmem:[#allocation2 + $0xc48] sm:$0xff] }
 0x204   :  { %5169 = vmatprep.subr.bf16.mxu1 %v5168_v29  ;;  %v5184_v29 = vpack.c.bf16 %v1944_v8, %v1940_v54  ;;  %v1967_v15 = vld [vmem:[#allocation2 + $0xc30] sm:$0xff]  ;;  %v1974_v17 = vld [vmem:[#allocation2 + $0xc68] sm:$0xff]  ;;  %v1972_v54 = vld [vmem:[#allocation2 + $0xc58] sm:$0xff] }
 0x205   :  { %v1976_v8 = vld [vmem:[#allocation2 + $0xc78] sm:$0xff] }
 0x206   :  { %4659 = vmatpush1.bf16.msra.mxu0 %v4658_v38  ;;  %v4674_v38 = vpack.c.bf16 %v1941_v22, %v1937_v21  ;;  %v1969_v21 = vld [vmem:[#allocation2 + $0xc40] sm:$0xff] }
 0x207   :  { %5171 = vmatpush1.bf16.msra.mxu1 %v5170_v39  ;;  %4661 = vmatprep.subr.bf16.mxu0 %v4660_v41  ;;  %v5186_v39 = vpack.c.bf16 %v1943_v30, %v1939_v24  ;;  %v4676_v41 = vpack.c.bf16 %v1950_v33, %v1946_v32  ;;  %v1973_v22 = vld [vmem:[#allocation2 + $0xc60] sm:$0xff]  ;;  %v1971_v24 = vld [vmem:[#allocation2 + $0xc50] sm:$0xff]  ;;  %v1978_v32 = vld [vmem:[#allocation2 + $0xc88] sm:$0xff] }
 0x208   :  { %5173 = vmatprep.subr.bf16.mxu1 %v5172_v44  ;;  %v5188_v44 = vpack.c.bf16 %v1952_v37, %v1948_v36  ;;  %v1975_v30 = vld [vmem:[#allocation2 + $0xc70] sm:$0xff]  ;;  %v1982_v33 = vld [vmem:[#allocation2 + $0xca8] sm:$0xff]  ;;  %v1980_v36 = vld [vmem:[#allocation2 + $0xc98] sm:$0xff] }
 0x209   :  { %v1984_v37 = vld [vmem:[#allocation2 + $0xcb8] sm:$0xff] }
 0x20a   :  { %4663 = vmatpush1.bf16.msra.mxu0 %v4662_v34  ;;  %v4678_v34 = vpack.c.bf16 %v1949_v28, %v1945_v42  ;;  %v1977_v42 = vld [vmem:[#allocation2 + $0xc80] sm:$0xff] }
 0x20b   :  { %5175 = vmatpush1.bf16.msra.mxu1 %v5174_v31  ;;  %4665 = vmatprep.subr.bf16.mxu0 %v4664_v50  ;;  %v5190_v31 = vpack.c.bf16 %v1951_v45, %v1947_v43  ;;  %v4680_v50 = vpack.c.bf16 %v1958_v47, %v1954_v46  ;;  %v1981_v28 = vld [vmem:[#allocation2 + $0xca0] sm:$0xff]  ;;  %v1979_v43 = vld [vmem:[#allocation2 + $0xc90] sm:$0xff]  ;;  %v1986_v46 = vld [vmem:[#allocation2 + $0xcc8] sm:$0xff] }
 0x20c   :  { %5177 = vmatprep.subr.bf16.mxu1 %v5176_v40  ;;  %v5192_v40 = vpack.c.bf16 %v1960_v35, %v1956_v49  ;;  %v1983_v45 = vld [vmem:[#allocation2 + $0xcb0] sm:$0xff]  ;;  %v1990_v47 = vld [vmem:[#allocation2 + $0xce8] sm:$0xff]  ;;  %v1988_v49 = vld [vmem:[#allocation2 + $0xcd8] sm:$0xff] }
 0x20d   :  { %v1992_v35 = vld [vmem:[#allocation2 + $0xcf8] sm:$0xff] }
 0x20e   :  { %4667 = vmatpush1.bf16.msra.mxu0 %v4666_v7  ;;  %v4682_v7 = vpack.c.bf16 %v1957_v55, %v1953_v51  ;;  %v1989_v51 = vld [vmem:[#allocation2 + $0xce0] sm:$0xff]  ;;  %v1987_v55 = vld [vmem:[#allocation2 + $0xcd0] sm:$0xff] }
 0x20f   :  { %5179 = vmatpush1.bf16.msra.mxu1 %v5178_v52  ;;  %4669 = vmatprep.subr.bf16.mxu0 %v4668_v10  ;;  %v5194_v52 = vpack.c.bf16 %v1959_v57, %v1955_v56  ;;  %v4684_v10 = vpack.c.bf16 %v1966_v63, %v1962_v62  ;;  %v5208_v56 = vpack.c.bf16 %v1992_v35, %v1988_v49  ;;  %v1994_v57 = vld [vmem:[#allocation2 + $0xd08] sm:$0xff]  ;;  %v1996_v63 = vld [vmem:[#allocation2 + $0xd18] sm:$0xff] }
 0x210   :  { %5181 = vmatprep.subr.bf16.mxu1 %v5180_v12  ;;  %v5196_v12 = vpack.c.bf16 %v1968_v6, %v1964_v2  ;;  %v1998_v62 = vld [vmem:[#allocation2 + $0xd28] sm:$0xff]  ;;  %v2000_v2 = vld [vmem:[#allocation2 + $0xd38] sm:$0xff] }
 0x212   :  { %4671 = vmatpush1.bf16.msra.mxu0 %v4670_v9  ;;  %v4686_v9 = vpack.c.bf16 %v1965_v4, %v1961_v3  ;;  %v1995_v3 = vld [vmem:[#allocation2 + $0xd10] sm:$0xff]  ;;  %v5212_v4 = vpack.c.bf16 %v2000_v2, %v1996_v63 }
 0x213   :  { %5183 = vmatpush1.bf16.msra.mxu1 %v5182_v19  ;;  %4673 = vmatprep.subr.bf16.mxu0 %v4672_v20  ;;  %v5198_v19 = vpack.c.bf16 %v1967_v15, %v1963_v11  ;;  %v4688_v20 = vpack.c.bf16 %v1974_v17, %v1970_v16  ;;  %v1999_v11 = vld [vmem:[#allocation2 + $0xd30] sm:$0xff]  ;;  %v2006_v15 = vld [vmem:[#allocation2 + $0xd68] sm:$0xff]  ;;  %v2004_v16 = vld [vmem:[#allocation2 + $0xd58] sm:$0xff] }
 0x214   :  { %5185 = vmatprep.subr.bf16.mxu1 %v5184_v29  ;;  %v5200_v29 = vpack.c.bf16 %v1976_v8, %v1972_v54  ;;  %v2008_v17 = vld [vmem:[#allocation2 + $0xd78] sm:$0xff]  ;;  %v5214_v8 = vpack.c.bf16 %v1999_v11, %v1995_v3  ;;  %v2031_v3 = vld [vmem:[#allocation2 + $0xe30] sm:$0xff]  ;;  %v2038_v11 = vld [vmem:[#allocation2 + $0xe68] sm:$0xff] }
 0x216   :  { %4675 = vmatpush1.bf16.msra.mxu0 %v4674_v38  ;;  %v4690_v38 = vpack.c.bf16 %v1973_v22, %v1969_v21  ;;  %v2003_v21 = vld [vmem:[#allocation2 + $0xd50] sm:$0xff]  ;;  %v5216_v22 = vpack.c.bf16 %v2008_v17, %v2004_v16 }
 0x217   :  { %5187 = vmatpush1.bf16.msra.mxu1 %v5186_v39  ;;  %4677 = vmatprep.subr.bf16.mxu0 %v4676_v41  ;;  %v5202_v39 = vpack.c.bf16 %v1975_v30, %v1971_v24  ;;  %v4692_v41 = vpack.c.bf16 %v1982_v33, %v1978_v32  ;;  %v2007_v24 = vld [vmem:[#allocation2 + $0xd70] sm:$0xff]  ;;  %v2014_v30 = vld [vmem:[#allocation2 + $0xda8] sm:$0xff]  ;;  %v2012_v32 = vld [vmem:[#allocation2 + $0xd98] sm:$0xff] }
 0x218   :  { %5189 = vmatprep.subr.bf16.mxu1 %v5188_v44  ;;  %v5204_v44 = vpack.c.bf16 %v1984_v37, %v1980_v36  ;;  %v2016_v33 = vld [vmem:[#allocation2 + $0xdb8] sm:$0xff]  ;;  %v5218_v37 = vpack.c.bf16 %v2007_v24, %v2003_v21  ;;  %v2039_v21 = vld [vmem:[#allocation2 + $0xe70] sm:$0xff]  ;;  %v2046_v24 = vld [vmem:[#allocation2 + $0xea8] sm:$0xff] }
 0x21a   :  { %4679 = vmatpush1.bf16.msra.mxu0 %v4678_v34  ;;  %v5206_v34 = vpack.c.bf16 %v1983_v45, %v1979_v43  ;;  %v2015_v43 = vld [vmem:[#allocation2 + $0xdb0] sm:$0xff]  ;;  %v2022_v45 = vld [vmem:[#allocation2 + $0xde8] sm:$0xff] }
 0x21b   :  { %5191 = vmatpush1.bf16.msra.mxu1 %v5190_v31  ;;  %4681 = vmatprep.subr.bf16.mxu0 %v4680_v50  ;;  %v4696_v31 = vpack.c.bf16 %v1990_v47, %v1986_v46  ;;  %v1985_v50 = vld [vmem:[#allocation2 + $0xcc0] sm:$0xff]  ;;  %v2020_v46 = vld [vmem:[#allocation2 + $0xdd8] sm:$0xff] }
 0x21c   :  { %5193 = vmatprep.subr.bf16.mxu1 %v5192_v40  ;;  %v1991_v40 = vld [vmem:[#allocation2 + $0xcf0] sm:$0xff]  ;;  %v4698_v6 = vpack.c.bf16 %v1989_v51, %v1985_v50  ;;  %v2024_v47 = vld [vmem:[#allocation2 + $0xdf8] sm:$0xff] }
 0x21d   :  { %v2019_v50 = vld [vmem:[#allocation2 + $0xdd0] sm:$0xff]  ;;  %v5224_v51 = vpack.c.bf16 %v2024_v47, %v2020_v46 }
 0x21e   :  { %4683 = vmatpush1.bf16.msra.mxu0 %v4682_v7  ;;  %v4700_v7 = vpack.c.bf16 %v1998_v62, %v1994_v57  ;;  %v2028_v57 = vld [vmem:[#allocation2 + $0xe18] sm:$0xff] }
 0x21f   :  { %5195 = vmatpush1.bf16.msra.mxu1 %v5194_v52  ;;  %4685 = vmatprep.subr.bf16.mxu0 %v4684_v10  ;;  %v1993_v52 = vld [vmem:[#allocation2 + $0xd00] sm:$0xff]  ;;  %v2032_v62 = vld [vmem:[#allocation2 + $0xe38] sm:$0xff] }
 0x220   :  { %5197 = vmatprep.subr.bf16.mxu1 %v5196_v12  ;;  %v1997_v10 = vld [vmem:[#allocation2 + $0xd20] sm:$0xff]  ;;  %v2002_v12 = vld [vmem:[#allocation2 + $0xd48] sm:$0xff] }
 0x221   :  { %2831 = vmatmul.mubr.f32.vlgmr.msra.gmra.mrb[8].mxu0 %v6122_v48  ;;  %v4702_v54 = vpack.c.bf16 %v1997_v10, %v1993_v52  ;;  %v2027_v52 = vld [vmem:[#allocation2 + $0xe10] sm:$0xff]  ;;  %v5228_v10 = vpack.c.bf16 %v2032_v62, %v2028_v57 }
 0x222   :  { %4687 = vmatpush1.bf16.msra.mxu0 %v4686_v9  ;;  %3399 = vmatmul.mubr.f32.vlgmr.msra.gmra.mrb[8].mxu1 %v6122_v48  ;;  %v4694_v48 = vpack.c.bf16 %v1981_v28, %v1977_v42  ;;  %v4704_v9 = vpack.c.bf16 %v2006_v15, %v2002_v12  ;;  %v2011_v42 = vld [vmem:[#allocation2 + $0xd90] sm:$0xff]  ;;  %v5220_v28 = vpack.c.bf16 %v2016_v33, %v2012_v32  ;;  %v2036_v12 = vld [vmem:[#allocation2 + $0xe58] sm:$0xff] }
 0x223   :  { %5199 = vmatpush1.bf16.msra.mxu1 %v5198_v19  ;;  %4689 = vmatprep.subr.bf16.mxu0 %v4688_v20  ;;  %v2001_v19 = vld [vmem:[#allocation2 + $0xd40] sm:$0xff]  ;;  %v5222_v35 = vpack.c.bf16 %v2015_v43, %v2011_v42  ;;  %v2040_v15 = vld [vmem:[#allocation2 + $0xe78] sm:$0xff]  ;;  %v5230_v17 = vpack.c.bf16 %v2031_v3, %v2027_v52  ;;  %v2047_v42 = vld [vmem:[#allocation2 + $0xeb0] sm:$0xff] }
 0x224   :  { %5201 = vmatprep.subr.bf16.mxu1 %v5200_v29  ;;  %2901 = vmatprep.mubr.f32.mxu0 %v6128_v53  ;;  %v2005_v20 = vld [vmem:[#allocation2 + $0xd60] sm:$0xff]  ;;  %v2010_v29 = vld [vmem:[#allocation2 + $0xd88] sm:$0xff]  ;;  %v2063_v52 = vld [vmem:[#allocation2 + $0xf30] sm:$0xff] }
 0x225   :  { %3469 = vmatprep.mubr.f32.mxu1 %v6128_v53  ;;  %v5210_v53 = vpack.c.bf16 %v1991_v40, %v1987_v55  ;;  %v4706_v36 = vpack.c.bf16 %v2005_v20, %v2001_v19  ;;  %v2023_v55 = vld [vmem:[#allocation2 + $0xdf0] sm:$0xff]  ;;  %v2030_v40 = vld [vmem:[#allocation2 + $0xe28] sm:$0xff]  ;;  %v5232_v20 = vpack.c.bf16 %v2040_v15, %v2036_v12 }
 0x226   :  { %4691 = vmatpush1.bf16.msra.mxu0 %v4690_v38  ;;  %v4708_v38 = vpack.c.bf16 %v2014_v30, %v2010_v29  ;;  %v5226_v2 = vpack.c.bf16 %v2023_v55, %v2019_v50  ;;  %v2035_v19 = vld [vmem:[#allocation2 + $0xe50] sm:$0xff]  ;;  %v2044_v29 = vld [vmem:[#allocation2 + $0xe98] sm:$0xff]  ;;  %v2054_v43 = vld [vmem:[#allocation2 + $0xee8] sm:$0xff] }
 0x227   :  { %5203 = vmatpush1.bf16.msra.mxu1 %v5202_v39  ;;  %4693 = vmatprep.subr.bf16.mxu0 %v4692_v41  ;;  %v2009_v39 = vld [vmem:[#allocation2 + $0xd80] sm:$0xff]  ;;  %v2048_v30 = vld [vmem:[#allocation2 + $0xeb8] sm:$0xff]  ;;  %v5234_v33 = vpack.c.bf16 %v2039_v21, %v2035_v19  ;;  %v2055_v50 = vld [vmem:[#allocation2 + $0xef0] sm:$0xff] }
 0x228   :  { %5205 = vmatprep.subr.bf16.mxu1 %v5204_v44  ;;  %v2013_v41 = vld [vmem:[#allocation2 + $0xda0] sm:$0xff]  ;;  %v2018_v44 = vld [vmem:[#allocation2 + $0xdc8] sm:$0xff]  ;;  %v2071_v19 = vld [vmem:[#allocation2 + $0xf70] sm:$0xff] }
 0x229   :  { %v4710_v49 = vpack.c.bf16 %v2013_v41, %v2009_v39  ;;  %v2043_v39 = vld [vmem:[#allocation2 + $0xe90] sm:$0xff]  ;;  %v5236_v41 = vpack.c.bf16 %v2048_v30, %v2044_v29  ;;  %v2062_v55 = vld [vmem:[#allocation2 + $0xf28] sm:$0xff] }
 0x22a   :  { %4695 = vmatpush1.bf16.msra.mxu0 %v4694_v48  ;;  %v4712_v48 = vpack.c.bf16 %v2022_v45, %v2018_v44  ;;  %v2052_v44 = vld [vmem:[#allocation2 + $0xed8] sm:$0xff]  ;;  %v5238_v47 = vpack.c.bf16 %v2047_v42, %v2043_v39  ;;  %v2070_v3 = vld [vmem:[#allocation2 + $0xf68] sm:$0xff]  ;;  %v2079_v39 = vld [vmem:[#allocation2 + $0xfb0] sm:$0xff] }
 0x22b   :  { %5207 = vmatpush1.bf16.msra.mxu1 %v5206_v34  ;;  %4697 = vmatprep.subr.bf16.mxu0 %v4696_v31  ;;  %v2017_v34 = vld [vmem:[#allocation2 + $0xdc0] sm:$0xff]  ;;  %v2056_v45 = vld [vmem:[#allocation2 + $0xef8] sm:$0xff]  ;;  %v2078_v21 = vld [vmem:[#allocation2 + $0xfa8] sm:$0xff] }
 0x22c   :  { %5209 = vmatprep.subr.bf16.mxu1 %v5208_v56  ;;  %v2021_v31 = vld [vmem:[#allocation2 + $0xde0] sm:$0xff]  ;;  %v2026_v56 = vld [vmem:[#allocation2 + $0xe08] sm:$0xff] }
 0x22d   :  { %v4714_v63 = vpack.c.bf16 %v2021_v31, %v2017_v34  ;;  %v2051_v34 = vld [vmem:[#allocation2 + $0xed0] sm:$0xff]  ;;  %v5240_v31 = vpack.c.bf16 %v2056_v45, %v2052_v44  ;;  %v2086_v42 = vld [vmem:[#allocation2 + $0xfe8] sm:$0xff] }
 0x22e   :  { %4699 = vmatpush1.bf16.msra.mxu0 %v4698_v6  ;;  %v4716_v6 = vpack.c.bf16 %v2030_v40, %v2026_v56  ;;  %v2060_v56 = vld [vmem:[#allocation2 + $0xf18] sm:$0xff]  ;;  %v5242_v62 = vpack.c.bf16 %v2055_v50, %v2051_v34  ;;  %v2087_v34 = vld [vmem:[#allocation2 + $0xff0] sm:$0xff]  ;;  %v2094_v50 = vld [vmem:[#allocation2 + $0x1028] sm:$0xff] }
 0x22f   :  { %5211 = vmatpush1.bf16.msra.mxu1 %v5210_v53  ;;  %4701 = vmatprep.subr.bf16.mxu0 %v4700_v7  ;;  %v2025_v53 = vld [vmem:[#allocation2 + $0xe00] sm:$0xff]  ;;  %v2064_v40 = vld [vmem:[#allocation2 + $0xf38] sm:$0xff] }
 0x230   :  { %5213 = vmatprep.subr.bf16.mxu1 %v5212_v4  ;;  %v2029_v7 = vld [vmem:[#allocation2 + $0xe20] sm:$0xff]  ;;  %v2034_v4 = vld [vmem:[#allocation2 + $0xe48] sm:$0xff] }
 0x231   :  { %v4718_v16 = vpack.c.bf16 %v2029_v7, %v2025_v53  ;;  %v2059_v53 = vld [vmem:[#allocation2 + $0xf10] sm:$0xff]  ;;  %v5244_v7 = vpack.c.bf16 %v2064_v40, %v2060_v56 }
 0x232   :  { %4703 = vmatpush1.bf16.msra.mxu0 %v4702_v54  ;;  %v4720_v54 = vpack.c.bf16 %v2038_v11, %v2034_v4  ;;  %v2068_v4 = vld [vmem:[#allocation2 + $0xf58] sm:$0xff]  ;;  %v5246_v15 = vpack.c.bf16 %v2063_v52, %v2059_v53  ;;  %v2095_v53 = vld [vmem:[#allocation2 + $0x1030] sm:$0xff]  ;;  %v2102_v52 = vld [vmem:[#allocation2 + $0x1068] sm:$0xff] }
 0x233   :  { %5215 = vmatpush1.bf16.msra.mxu1 %v5214_v8  ;;  %4705 = vmatprep.subr.bf16.mxu0 %v4704_v9  ;;  %v2033_v8 = vld [vmem:[#allocation2 + $0xe40] sm:$0xff]  ;;  %v2072_v11 = vld [vmem:[#allocation2 + $0xf78] sm:$0xff] }
 0x234   :  { %5217 = vmatprep.subr.bf16.mxu1 %v5216_v22  ;;  %v2037_v9 = vld [vmem:[#allocation2 + $0xe60] sm:$0xff]  ;;  %v2042_v22 = vld [vmem:[#allocation2 + $0xe88] sm:$0xff] }
 0x235   :  { %v4722_v32 = vpack.c.bf16 %v2037_v9, %v2033_v8  ;;  %v2067_v8 = vld [vmem:[#allocation2 + $0xf50] sm:$0xff]  ;;  %v5248_v9 = vpack.c.bf16 %v2072_v11, %v2068_v4 }
 0x236   :  { %4707 = vmatpush1.bf16.msra.mxu0 %v4706_v36  ;;  %v4724_v36 = vpack.c.bf16 %v2046_v24, %v2042_v22  ;;  %v2076_v22 = vld [vmem:[#allocation2 + $0xf98] sm:$0xff]  ;;  %v5250_v30 = vpack.c.bf16 %v2071_v19, %v2067_v8  ;;  %v2103_v8 = vld [vmem:[#allocation2 + $0x1070] sm:$0xff]  ;;  %v2110_v19 = vld [vmem:[#allocation2 + $0x10a8] sm:$0xff] }
 0x237   :  { %5219 = vmatpush1.bf16.msra.mxu1 %v5218_v37  ;;  %4709 = vmatprep.subr.bf16.mxu0 %v4708_v38  ;;  %v2041_v37 = vld [vmem:[#allocation2 + $0xe80] sm:$0xff]  ;;  %v2080_v24 = vld [vmem:[#allocation2 + $0xfb8] sm:$0xff] }
 0x238   :  { %5221 = vmatprep.subr.bf16.mxu1 %v5220_v28  ;;  %v2045_v38 = vld [vmem:[#allocation2 + $0xea0] sm:$0xff]  ;;  %v2050_v28 = vld [vmem:[#allocation2 + $0xec8] sm:$0xff] }
 0x239   :  { %v4726_v46 = vpack.c.bf16 %v2045_v38, %v2041_v37  ;;  %v2075_v37 = vld [vmem:[#allocation2 + $0xf90] sm:$0xff]  ;;  %v5252_v38 = vpack.c.bf16 %v2080_v24, %v2076_v22 }
 0x23a   :  { %4711 = vmatpush1.bf16.msra.mxu0 %v4710_v49  ;;  %v4728_v49 = vpack.c.bf16 %v2054_v43, %v2050_v28  ;;  %v2084_v28 = vld [vmem:[#allocation2 + $0xfd8] sm:$0xff]  ;;  %v5254_v45 = vpack.c.bf16 %v2079_v39, %v2075_v37  ;;  %v2111_v37 = vld [vmem:[#allocation2 + $0x10b0] sm:$0xff]  ;;  %v2118_v39 = vld [vmem:[#allocation2 + $0x10e8] sm:$0xff] }
 0x23b   :  { %5223 = vmatpush1.bf16.msra.mxu1 %v5222_v35  ;;  %4713 = vmatprep.subr.bf16.mxu0 %v4712_v48  ;;  %v2049_v35 = vld [vmem:[#allocation2 + $0xec0] sm:$0xff]  ;;  %v2088_v43 = vld [vmem:[#allocation2 + $0xff8] sm:$0xff] }
 0x23c   :  { %5225 = vmatprep.subr.bf16.mxu1 %v5224_v51  ;;  %v2053_v48 = vld [vmem:[#allocation2 + $0xee0] sm:$0xff]  ;;  %v2058_v51 = vld [vmem:[#allocation2 + $0xf08] sm:$0xff] }
 0x23d   :  { %v4730_v57 = vpack.c.bf16 %v2053_v48, %v2049_v35  ;;  %v2083_v35 = vld [vmem:[#allocation2 + $0xfd0] sm:$0xff]  ;;  %v5256_v48 = vpack.c.bf16 %v2088_v43, %v2084_v28 }
 0x23e   :  { %4715 = vmatpush1.bf16.msra.mxu0 %v4714_v63  ;;  %v4732_v63 = vpack.c.bf16 %v2062_v55, %v2058_v51  ;;  %v2092_v51 = vld [vmem:[#allocation2 + $0x1018] sm:$0xff]  ;;  %v5258_v40 = vpack.c.bf16 %v2087_v34, %v2083_v35  ;;  %v2122_v35 = vld [vmem:[#allocation2 + $0x1108] sm:$0xff] }
 0x23f   :  { %5227 = vmatpush1.bf16.msra.mxu1 %v5226_v2  ;;  %4717 = vmatprep.subr.bf16.mxu0 %v4716_v6  ;;  %v2057_v2 = vld [vmem:[#allocation2 + $0xf00] sm:$0xff]  ;;  %v2096_v55 = vld [vmem:[#allocation2 + $0x1038] sm:$0xff] }
 0x240   :  { %5229 = vmatprep.subr.bf16.mxu1 %v5228_v10  ;;  %v2061_v6 = vld [vmem:[#allocation2 + $0xf20] sm:$0xff]  ;;  %v2066_v10 = vld [vmem:[#allocation2 + $0xf48] sm:$0xff]  ;;  %v2124_v34 = vld [vmem:[#allocation2 + $0x1118] sm:$0xff] }
 0x241   :  { %v4734_v12 = vpack.c.bf16 %v2061_v6, %v2057_v2  ;;  %v2091_v2 = vld [vmem:[#allocation2 + $0x1010] sm:$0xff]  ;;  %v5260_v6 = vpack.c.bf16 %v2096_v55, %v2092_v51  ;;  %v2121_v55 = vld [vmem:[#allocation2 + $0x1100] sm:$0xff] }
 0x242   :  { %4719 = vmatpush1.bf16.msra.mxu0 %v4718_v16  ;;  %v4736_v16 = vpack.c.bf16 %v2070_v3, %v2066_v10  ;;  %v2100_v10 = vld [vmem:[#allocation2 + $0x1058] sm:$0xff]  ;;  %v5262_v11 = vpack.c.bf16 %v2095_v53, %v2091_v2  ;;  %v2134_v2 = vld [vmem:[#allocation2 + $0x1168] sm:$0xff] }
 0x243   :  { %5231 = vmatpush1.bf16.msra.mxu1 %v5230_v17  ;;  %4721 = vmatprep.subr.bf16.mxu0 %v4720_v54  ;;  %v2065_v17 = vld [vmem:[#allocation2 + $0xf40] sm:$0xff]  ;;  %v2104_v3 = vld [vmem:[#allocation2 + $0x1078] sm:$0xff] }
 0x244   :  { %5233 = vmatprep.subr.bf16.mxu1 %v5232_v20  ;;  %v2069_v54 = vld [vmem:[#allocation2 + $0xf60] sm:$0xff]  ;;  %v2074_v20 = vld [vmem:[#allocation2 + $0xf88] sm:$0xff]  ;;  %v2136_v53 = vld [vmem:[#allocation2 + $0x1178] sm:$0xff] }
 0x245   :  { %v4738_v29 = vpack.c.bf16 %v2069_v54, %v2065_v17  ;;  %v2099_v17 = vld [vmem:[#allocation2 + $0x1050] sm:$0xff]  ;;  %v5264_v54 = vpack.c.bf16 %v2104_v3, %v2100_v10  ;;  %v2129_v3 = vld [vmem:[#allocation2 + $0x1140] sm:$0xff] }
 0x246   :  { %4723 = vmatpush1.bf16.msra.mxu0 %v4722_v32  ;;  %v4740_v32 = vpack.c.bf16 %v2078_v21, %v2074_v20  ;;  %v2108_v20 = vld [vmem:[#allocation2 + $0x1098] sm:$0xff]  ;;  %v5266_v24 = vpack.c.bf16 %v2103_v8, %v2099_v17  ;;  %v2142_v17 = vld [vmem:[#allocation2 + $0x11a8] sm:$0xff] }
 0x247   :  { %5235 = vmatpush1.bf16.msra.mxu1 %v5234_v33  ;;  %4725 = vmatprep.subr.bf16.mxu0 %v4724_v36  ;;  %v2073_v33 = vld [vmem:[#allocation2 + $0xf80] sm:$0xff]  ;;  %v2112_v21 = vld [vmem:[#allocation2 + $0x10b8] sm:$0xff] }
 0x248   :  { %5237 = vmatprep.subr.bf16.mxu1 %v5236_v41  ;;  %v2077_v36 = vld [vmem:[#allocation2 + $0xfa0] sm:$0xff]  ;;  %v2082_v41 = vld [vmem:[#allocation2 + $0xfc8] sm:$0xff]  ;;  %v2144_v8 = vld [vmem:[#allocation2 + $0x11b8] sm:$0xff] }
 0x249   :  { %v4742_v44 = vpack.c.bf16 %v2077_v36, %v2073_v33  ;;  %v2107_v33 = vld [vmem:[#allocation2 + $0x1090] sm:$0xff]  ;;  %v5268_v36 = vpack.c.bf16 %v2112_v21, %v2108_v20  ;;  %v2137_v21 = vld [vmem:[#allocation2 + $0x1180] sm:$0xff] }
 0x24a   :  { %4727 = vmatpush1.bf16.msra.mxu0 %v4726_v46  ;;  %v4744_v46 = vpack.c.bf16 %v2086_v42, %v2082_v41  ;;  %v2116_v41 = vld [vmem:[#allocation2 + $0x10d8] sm:$0xff]  ;;  %v5270_v28 = vpack.c.bf16 %v2111_v37, %v2107_v33  ;;  %v2150_v33 = vld [vmem:[#allocation2 + $0x11e8] sm:$0xff] }
 0x24b   :  { %5239 = vmatpush1.bf16.msra.mxu1 %v5238_v47  ;;  %4729 = vmatprep.subr.bf16.mxu0 %v4728_v49  ;;  %v2081_v47 = vld [vmem:[#allocation2 + $0xfc0] sm:$0xff]  ;;  %v2120_v42 = vld [vmem:[#allocation2 + $0x10f8] sm:$0xff] }
 0x24c   :  { %5241 = vmatprep.subr.bf16.mxu1 %v5240_v31  ;;  %v2085_v49 = vld [vmem:[#allocation2 + $0xfe0] sm:$0xff]  ;;  %v2090_v31 = vld [vmem:[#allocation2 + $0x1008] sm:$0xff]  ;;  %v2152_v37 = vld [vmem:[#allocation2 + $0x11f8] sm:$0xff] }
 0x24d   :  { %v4746_v56 = vpack.c.bf16 %v2085_v49, %v2081_v47  ;;  %v5272_v47 = vpack.c.bf16 %v2120_v42, %v2116_v41  ;;  %v2119_v49 = vld [vmem:[#allocation2 + $0x10f0] sm:$0xff]  ;;  %v2145_v42 = vld [vmem:[#allocation2 + $0x11c0] sm:$0xff] }
 0x24e   :  { %4731 = vmatpush1.bf16.msra.mxu0 %v4730_v57  ;;  %v4748_v57 = vpack.c.bf16 %v2094_v50, %v2090_v31  ;;  %v2128_v31 = vld [vmem:[#allocation2 + $0x1138] sm:$0xff] }
 0x24f   :  { %5243 = vmatpush1.bf16.msra.mxu1 %v5242_v62  ;;  %4733 = vmatprep.subr.bf16.mxu0 %v4732_v63  ;;  %v2089_v62 = vld [vmem:[#allocation2 + $0x1000] sm:$0xff] }
 0x250   :  { %5245 = vmatprep.subr.bf16.mxu1 %v5244_v7  ;;  %v2093_v63 = vld [vmem:[#allocation2 + $0x1020] sm:$0xff]  ;;  %v2098_v7 = vld [vmem:[#allocation2 + $0x1048] sm:$0xff] }
 0x251   :  { %v4750_v4 = vpack.c.bf16 %v2093_v63, %v2089_v62  ;;  %v2127_v62 = vld [vmem:[#allocation2 + $0x1130] sm:$0xff]  ;;  %v2130_v63 = vld [vmem:[#allocation2 + $0x1148] sm:$0xff] }
 0x252   :  { %4735 = vmatpush1.bf16.msra.mxu0 %v4734_v12  ;;  %v4752_v12 = vpack.c.bf16 %v2102_v52, %v2098_v7  ;;  %v4768_v10 = vpack.c.bf16 %v2134_v2, %v2130_v63 }
 0x253   :  { %5247 = vmatpush1.bf16.msra.mxu1 %v5246_v15  ;;  %4737 = vmatprep.subr.bf16.mxu0 %v4736_v16  ;;  %v2097_v15 = vld [vmem:[#allocation2 + $0x1040] sm:$0xff] }
 0x254   :  { %5249 = vmatprep.subr.bf16.mxu1 %v5248_v9  ;;  %v2101_v16 = vld [vmem:[#allocation2 + $0x1060] sm:$0xff]  ;;  %v2106_v9 = vld [vmem:[#allocation2 + $0x1088] sm:$0xff] }
 0x255   :  { %v4754_v22 = vpack.c.bf16 %v2101_v16, %v2097_v15  ;;  %v2135_v15 = vld [vmem:[#allocation2 + $0x1170] sm:$0xff]  ;;  %v2138_v16 = vld [vmem:[#allocation2 + $0x1188] sm:$0xff] }
 0x256   :  { %4739 = vmatpush1.bf16.msra.mxu0 %v4738_v29  ;;  %v4756_v29 = vpack.c.bf16 %v2110_v19, %v2106_v9  ;;  %v4772_v20 = vpack.c.bf16 %v2142_v17, %v2138_v16 }
 0x257   :  { %5251 = vmatpush1.bf16.msra.mxu1 %v5250_v30  ;;  %4741 = vmatprep.subr.bf16.mxu0 %v4740_v32  ;;  %v2105_v30 = vld [vmem:[#allocation2 + $0x1080] sm:$0xff] }
 0x258   :  { %5253 = vmatprep.subr.bf16.mxu1 %v5252_v38  ;;  %v2109_v32 = vld [vmem:[#allocation2 + $0x10a0] sm:$0xff]  ;;  %v2114_v38 = vld [vmem:[#allocation2 + $0x10c8] sm:$0xff] }
 0x259   :  { %v4760_v43 = vpack.c.bf16 %v2118_v39, %v2114_v38 }
 0x25a   :  { %4743 = vmatpush1.bf16.msra.mxu0 %v4742_v44  ;;  %v2113_v44 = vld [vmem:[#allocation2 + $0x10c0] sm:$0xff] }
 0x25b   :  { %5255 = vmatpush1.bf16.msra.mxu1 %v5254_v45  ;;  %4745 = vmatprep.subr.bf16.mxu0 %v4744_v46  ;;  %v2117_v45 = vld [vmem:[#allocation2 + $0x10e0] sm:$0xff]  ;;  %v2115_v46 = vld [vmem:[#allocation2 + $0x10d0] sm:$0xff] }
 0x25c   :  { %5257 = vmatprep.subr.bf16.mxu1 %v5256_v48  ;;  %v2126_v48 = vld [vmem:[#allocation2 + $0x1128] sm:$0xff]  ;;  %v4762_v50 = vpack.c.bf16 %v2117_v45, %v2113_v44  ;;  %v2151_v44 = vld [vmem:[#allocation2 + $0x11f0] sm:$0xff] }
 0x25d   :  { %v4764_v51 = vpack.c.bf16 %v2126_v48, %v2122_v35  ;;  %v2154_v45 = vld [vmem:[#allocation2 + $0x1208] sm:$0xff] }
 0x25e   :  { %4747 = vmatpush1.bf16.msra.mxu0 %v4746_v56  ;;  %v2125_v56 = vld [vmem:[#allocation2 + $0x1120] sm:$0xff] }
 0x25f   :  { %5259 = vmatpush1.bf16.msra.mxu1 %v5258_v40  ;;  %4749 = vmatprep.subr.bf16.mxu0 %v4748_v57  ;;  %v2123_v40 = vld [vmem:[#allocation2 + $0x1110] sm:$0xff]  ;;  %v5276_v57 = vpack.c.bf16 %v2128_v31, %v2124_v34  ;;  %v4766_v7 = vpack.c.bf16 %v2125_v56, %v2121_v55  ;;  %v2153_v31 = vld [vmem:[#allocation2 + $0x1200] sm:$0xff]  ;;  %v2162_v56 = vld [vmem:[#allocation2 + $0x1248] sm:$0xff] }
 0x260   :  { %5261 = vmatprep.subr.bf16.mxu1 %v5260_v6  ;;  %v2132_v6 = vld [vmem:[#allocation2 + $0x1158] sm:$0xff]  ;;  %v5278_v52 = vpack.c.bf16 %v2127_v62, %v2123_v40  ;;  %v2159_v55 = vld [vmem:[#allocation2 + $0x1230] sm:$0xff]  ;;  %v2166_v40 = vld [vmem:[#allocation2 + $0x1268] sm:$0xff] }
 0x261   :  { %2902 = vmatmul.mubr.f32.vlgmr.msra.gmra.mrb[8].mxu0 %v6124_v1  ;;  %v2168_v62 = vld [vmem:[#allocation2 + $0x1278] sm:$0xff] }
 0x262   :  { %4751 = vmatpush1.bf16.msra.mxu0 %v4750_v4  ;;  %3470 = vmatmul.mubr.f32.vlgmr.msra.gmra.mrb[8].mxu1 %v6124_v1  ;;  %v4758_v1 = vpack.c.bf16 %v2109_v32, %v2105_v30  ;;  %v2133_v4 = vld [vmem:[#allocation2 + $0x1160] sm:$0xff]  ;;  %v2143_v30 = vld [vmem:[#allocation2 + $0x11b0] sm:$0xff]  ;;  %v2146_v32 = vld [vmem:[#allocation2 + $0x11c8] sm:$0xff] }
 0x263   :  { %5263 = vmatpush1.bf16.msra.mxu1 %v5262_v11  ;;  %4753 = vmatprep.subr.bf16.mxu0 %v4752_v12  ;;  %v2131_v11 = vld [vmem:[#allocation2 + $0x1150] sm:$0xff]  ;;  %v5280_v12 = vpack.c.bf16 %v2136_v53, %v2132_v6  ;;  %v4770_v9 = vpack.c.bf16 %v2133_v4, %v2129_v3  ;;  %v4776_v41 = vpack.c.bf16 %v2150_v33, %v2146_v32  ;;  %v2161_v53 = vld [vmem:[#allocation2 + $0x1240] sm:$0xff]  ;;  %v2170_v4 = vld [vmem:[#allocation2 + $0x1288] sm:$0xff] }
 0x264   :  { %5265 = vmatprep.subr.bf16.mxu1 %v5264_v54  ;;  %2972 = vmatprep.mubr.f32.mxu0 %v6138_v18  ;;  %v2140_v54 = vld [vmem:[#allocation2 + $0x1198] sm:$0xff]  ;;  %v5282_v19 = vpack.c.bf16 %v2135_v15, %v2131_v11  ;;  %v4784_v6 = vpack.c.bf16 %v2166_v40, %v2162_v56  ;;  %v2167_v3 = vld [vmem:[#allocation2 + $0x1270] sm:$0xff]  ;;  %v2174_v11 = vld [vmem:[#allocation2 + $0x12a8] sm:$0xff] }
 0x265   :  { %3540 = vmatprep.mubr.f32.mxu1 %v6138_v18  ;;  %v5274_v18 = vpack.c.bf16 %v2119_v49, %v2115_v46  ;;  %v2158_v46 = vld [vmem:[#allocation2 + $0x1228] sm:$0xff]  ;;  %v2160_v49 = vld [vmem:[#allocation2 + $0x1238] sm:$0xff] }
 0x266   :  { %4755 = vmatpush1.bf16.msra.mxu0 %v4754_v22  ;;  %v2141_v22 = vld [vmem:[#allocation2 + $0x11a0] sm:$0xff]  ;;  %v4780_v34 = vpack.c.bf16 %v2158_v46, %v2154_v45  ;;  %v2176_v15 = vld [vmem:[#allocation2 + $0x12b8] sm:$0xff] }
 0x267   :  { %5267 = vmatpush1.bf16.msra.mxu1 %v5266_v24  ;;  %4757 = vmatprep.subr.bf16.mxu0 %v4756_v29  ;;  %v2139_v24 = vld [vmem:[#allocation2 + $0x1190] sm:$0xff]  ;;  %v5284_v29 = vpack.c.bf16 %v2144_v8, %v2140_v54  ;;  %v4774_v38 = vpack.c.bf16 %v2141_v22, %v2137_v21  ;;  %v4788_v54 = vpack.c.bf16 %v2174_v11, %v2170_v4  ;;  %v2169_v8 = vld [vmem:[#allocation2 + $0x1280] sm:$0xff]  ;;  %v2178_v22 = vld [vmem:[#allocation2 + $0x12c8] sm:$0xff] }
 0x268   :  { %5269 = vmatprep.subr.bf16.mxu1 %v5268_v36  ;;  %v2148_v36 = vld [vmem:[#allocation2 + $0x11d8] sm:$0xff]  ;;  %v5286_v39 = vpack.c.bf16 %v2143_v30, %v2139_v24  ;;  %v2175_v21 = vld [vmem:[#allocation2 + $0x12b0] sm:$0xff]  ;;  %v2182_v24 = vld [vmem:[#allocation2 + $0x12e8] sm:$0xff] }
 0x269   :  { %v2184_v30 = vld [vmem:[#allocation2 + $0x12f8] sm:$0xff] }
 0x26a   :  { %4759 = vmatpush1.bf16.msra.mxu0 %v4758_v1  ;;  %v2149_v1 = vld [vmem:[#allocation2 + $0x11e0] sm:$0xff] }
 0x26b   :  { %5271 = vmatpush1.bf16.msra.mxu1 %v5270_v28  ;;  %4761 = vmatprep.subr.bf16.mxu0 %v4760_v43  ;;  %v2147_v28 = vld [vmem:[#allocation2 + $0x11d0] sm:$0xff]  ;;  %v5288_v43 = vpack.c.bf16 %v2152_v37, %v2148_v36  ;;  %v4778_v35 = vpack.c.bf16 %v2149_v1, %v2145_v42  ;;  %v4792_v36 = vpack.c.bf16 %v2182_v24, %v2178_v22  ;;  %v2177_v37 = vld [vmem:[#allocation2 + $0x12c0] sm:$0xff]  ;;  %v2186_v1 = vld [vmem:[#allocation2 + $0x1308] sm:$0xff] }
 0x26c   :  { %5273 = vmatprep.subr.bf16.mxu1 %v5272_v47  ;;  %v2156_v47 = vld [vmem:[#allocation2 + $0x1218] sm:$0xff]  ;;  %v5290_v48 = vpack.c.bf16 %v2151_v44, %v2147_v28  ;;  %v2183_v42 = vld [vmem:[#allocation2 + $0x12f0] sm:$0xff]  ;;  %v2190_v28 = vld [vmem:[#allocation2 + $0x1328] sm:$0xff] }
 0x26d   :  { %v2192_v44 = vld [vmem:[#allocation2 + $0x1338] sm:$0xff] }
 0x26e   :  { %4763 = vmatpush1.bf16.msra.mxu0 %v4762_v50  ;;  %v2157_v50 = vld [vmem:[#allocation2 + $0x1220] sm:$0xff] }
 0x26f   :  { %5275 = vmatpush1.bf16.msra.mxu1 %v5274_v18  ;;  %4765 = vmatprep.subr.bf16.mxu0 %v4764_v51  ;;  %v2155_v18 = vld [vmem:[#allocation2 + $0x1210] sm:$0xff]  ;;  %v5292_v51 = vpack.c.bf16 %v2160_v49, %v2156_v47  ;;  %v4782_v63 = vpack.c.bf16 %v2157_v50, %v2153_v31  ;;  %v4796_v47 = vpack.c.bf16 %v2190_v28, %v2186_v1  ;;  %v2185_v49 = vld [vmem:[#allocation2 + $0x1300] sm:$0xff]  ;;  %v2194_v50 = vld [vmem:[#allocation2 + $0x1348] sm:$0xff] }
 0x270   :  { %5277 = vmatprep.subr.bf16.mxu1 %v5276_v57  ;;  %v2164_v57 = vld [vmem:[#allocation2 + $0x1258] sm:$0xff]  ;;  %v5294_v2 = vpack.c.bf16 %v2159_v55, %v2155_v18  ;;  %v2191_v31 = vld [vmem:[#allocation2 + $0x1330] sm:$0xff]  ;;  %v2198_v18 = vld [vmem:[#allocation2 + $0x1368] sm:$0xff] }
 0x271   :  { %v2200_v55 = vld [vmem:[#allocation2 + $0x1378] sm:$0xff] }
 0x272   :  { %4767 = vmatpush1.bf16.msra.mxu0 %v4766_v7  ;;  %v2165_v7 = vld [vmem:[#allocation2 + $0x1260] sm:$0xff] }
 0x273   :  { %5279 = vmatpush1.bf16.msra.mxu1 %v5278_v52  ;;  %4769 = vmatprep.subr.bf16.mxu0 %v4768_v10  ;;  %v2163_v52 = vld [vmem:[#allocation2 + $0x1250] sm:$0xff]  ;;  %v5296_v10 = vpack.c.bf16 %v2168_v62, %v2164_v57  ;;  %v4786_v16 = vpack.c.bf16 %v2165_v7, %v2161_v53  ;;  %v4800_v57 = vpack.c.bf16 %v2198_v18, %v2194_v50  ;;  %v2193_v62 = vld [vmem:[#allocation2 + $0x1340] sm:$0xff]  ;;  %v2202_v7 = vld [vmem:[#allocation2 + $0x1388] sm:$0xff] }
 0x274   :  { %5281 = vmatprep.subr.bf16.mxu1 %v5280_v12  ;;  %v2172_v12 = vld [vmem:[#allocation2 + $0x1298] sm:$0xff]  ;;  %v5298_v17 = vpack.c.bf16 %v2167_v3, %v2163_v52  ;;  %v2199_v53 = vld [vmem:[#allocation2 + $0x1370] sm:$0xff]  ;;  %v2206_v52 = vld [vmem:[#allocation2 + $0x13a8] sm:$0xff] }
 0x275   :  { %v2208_v3 = vld [vmem:[#allocation2 + $0x13b8] sm:$0xff] }
 0x276   :  { %4771 = vmatpush1.bf16.msra.mxu0 %v4770_v9  ;;  %v2173_v9 = vld [vmem:[#allocation2 + $0x12a0] sm:$0xff] }
 0x277   :  { %5283 = vmatpush1.bf16.msra.mxu1 %v5282_v19  ;;  %4773 = vmatprep.subr.bf16.mxu0 %v4772_v20  ;;  %v2171_v19 = vld [vmem:[#allocation2 + $0x1290] sm:$0xff]  ;;  %v5300_v20 = vpack.c.bf16 %v2176_v15, %v2172_v12  ;;  %v4790_v32 = vpack.c.bf16 %v2173_v9, %v2169_v8  ;;  %v4804_v12 = vpack.c.bf16 %v2206_v52, %v2202_v7  ;;  %v2201_v15 = vld [vmem:[#allocation2 + $0x1380] sm:$0xff]  ;;  %v2210_v9 = vld [vmem:[#allocation2 + $0x13c8] sm:$0xff] }
 0x278   :  { %5285 = vmatprep.subr.bf16.mxu1 %v5284_v29  ;;  %v2180_v29 = vld [vmem:[#allocation2 + $0x12d8] sm:$0xff]  ;;  %v5302_v33 = vpack.c.bf16 %v2175_v21, %v2171_v19  ;;  %v2207_v8 = vld [vmem:[#allocation2 + $0x13b0] sm:$0xff]  ;;  %v2214_v19 = vld [vmem:[#allocation2 + $0x13e8] sm:$0xff] }
 0x279   :  { %v2216_v21 = vld [vmem:[#allocation2 + $0x13f8] sm:$0xff] }
 0x27a   :  { %4775 = vmatpush1.bf16.msra.mxu0 %v4774_v38  ;;  %v2181_v38 = vld [vmem:[#allocation2 + $0x12e0] sm:$0xff] }
 0x27b   :  { %5287 = vmatpush1.bf16.msra.mxu1 %v5286_v39  ;;  %4777 = vmatprep.subr.bf16.mxu0 %v4776_v41  ;;  %v2179_v39 = vld [vmem:[#allocation2 + $0x12d0] sm:$0xff]  ;;  %v5304_v41 = vpack.c.bf16 %v2184_v30, %v2180_v29  ;;  %v4794_v45 = vpack.c.bf16 %v2181_v38, %v2177_v37  ;;  %v4808_v29 = vpack.c.bf16 %v2214_v19, %v2210_v9  ;;  %v2209_v30 = vld [vmem:[#allocation2 + $0x13c0] sm:$0xff]  ;;  %v2218_v38 = vld [vmem:[#allocation2 + $0x1408] sm:$0xff] }
 0x27c   :  { %5289 = vmatprep.subr.bf16.mxu1 %v5288_v43  ;;  %v2188_v43 = vld [vmem:[#allocation2 + $0x1318] sm:$0xff]  ;;  %v5306_v46 = vpack.c.bf16 %v2183_v42, %v2179_v39  ;;  %v2215_v37 = vld [vmem:[#allocation2 + $0x13f0] sm:$0xff]  ;;  %v2222_v39 = vld [vmem:[#allocation2 + $0x1428] sm:$0xff] }
 0x27d   :  { %v2224_v42 = vld [vmem:[#allocation2 + $0x1438] sm:$0xff] }
 0x27e   :  { %4779 = vmatpush1.bf16.msra.mxu0 %v4778_v35  ;;  %v2189_v35 = vld [vmem:[#allocation2 + $0x1320] sm:$0xff] }
 0x27f   :  { %5291 = vmatpush1.bf16.msra.mxu1 %v5290_v48  ;;  %4781 = vmatprep.subr.bf16.mxu0 %v4780_v34  ;;  %v2187_v48 = vld [vmem:[#allocation2 + $0x1310] sm:$0xff]  ;;  %v5308_v34 = vpack.c.bf16 %v2192_v44, %v2188_v43  ;;  %v4798_v56 = vpack.c.bf16 %v2189_v35, %v2185_v49  ;;  %v4812_v43 = vpack.c.bf16 %v2222_v39, %v2218_v38  ;;  %v2217_v44 = vld [vmem:[#allocation2 + $0x1400] sm:$0xff]  ;;  %v2226_v35 = vld [vmem:[#allocation2 + $0x1448] sm:$0xff] }
 0x280   :  { %5293 = vmatprep.subr.bf16.mxu1 %v5292_v51  ;;  %v2196_v51 = vld [vmem:[#allocation2 + $0x1358] sm:$0xff]  ;;  %v5310_v40 = vpack.c.bf16 %v2191_v31, %v2187_v48  ;;  %v2223_v49 = vld [vmem:[#allocation2 + $0x1430] sm:$0xff]  ;;  %v2230_v48 = vld [vmem:[#allocation2 + $0x1468] sm:$0xff] }
 0x281   :  { %v2232_v31 = vld [vmem:[#allocation2 + $0x1478] sm:$0xff]  ;;  %v2249_v39 = vld [vmem:[#allocation2 + $0x1500] sm:$0xff] }
 0x282   :  { %4783 = vmatpush1.bf16.msra.mxu0 %v4782_v63  ;;  %v2197_v63 = vld [vmem:[#allocation2 + $0x1360] sm:$0xff] }
 0x283   :  { %5295 = vmatpush1.bf16.msra.mxu1 %v5294_v2  ;;  %4785 = vmatprep.subr.bf16.mxu0 %v4784_v6  ;;  %v2195_v2 = vld [vmem:[#allocation2 + $0x1350] sm:$0xff]  ;;  %v5312_v6 = vpack.c.bf16 %v2200_v55, %v2196_v51  ;;  %v4802_v4 = vpack.c.bf16 %v2197_v63, %v2193_v62  ;;  %v4816_v51 = vpack.c.bf16 %v2230_v48, %v2226_v35  ;;  %v2225_v55 = vld [vmem:[#allocation2 + $0x1440] sm:$0xff]  ;;  %v2234_v63 = vld [vmem:[#allocation2 + $0x1488] sm:$0xff] }
 0x284   :  { %5297 = vmatprep.subr.bf16.mxu1 %v5296_v10  ;;  %v2204_v10 = vld [vmem:[#allocation2 + $0x1398] sm:$0xff]  ;;  %v5314_v11 = vpack.c.bf16 %v2199_v53, %v2195_v2  ;;  %v2231_v62 = vld [vmem:[#allocation2 + $0x1470] sm:$0xff]  ;;  %v2238_v2 = vld [vmem:[#allocation2 + $0x14a8] sm:$0xff] }
 0x285   :  { %v2240_v53 = vld [vmem:[#allocation2 + $0x14b8] sm:$0xff]  ;;  %v2257_v48 = vld [vmem:[#allocation2 + $0x1540] sm:$0xff] }
 0x286   :  { %4787 = vmatpush1.bf16.msra.mxu0 %v4786_v16  ;;  %v2205_v16 = vld [vmem:[#allocation2 + $0x13a0] sm:$0xff] }
 0x287   :  { %5299 = vmatpush1.bf16.msra.mxu1 %v5298_v17  ;;  %4789 = vmatprep.subr.bf16.mxu0 %v4788_v54  ;;  %v2203_v17 = vld [vmem:[#allocation2 + $0x1390] sm:$0xff]  ;;  %v5316_v54 = vpack.c.bf16 %v2208_v3, %v2204_v10  ;;  %v4806_v22 = vpack.c.bf16 %v2205_v16, %v2201_v15  ;;  %v4820_v10 = vpack.c.bf16 %v2238_v2, %v2234_v63  ;;  %v2233_v3 = vld [vmem:[#allocation2 + $0x1480] sm:$0xff]  ;;  %v2242_v16 = vld [vmem:[#allocation2 + $0x14c8] sm:$0xff] }
 0x288   :  { %5301 = vmatprep.subr.bf16.mxu1 %v5300_v20  ;;  %v2212_v20 = vld [vmem:[#allocation2 + $0x13d8] sm:$0xff]  ;;  %v5318_v24 = vpack.c.bf16 %v2207_v8, %v2203_v17  ;;  %v2239_v15 = vld [vmem:[#allocation2 + $0x14b0] sm:$0xff]  ;;  %v2246_v17 = vld [vmem:[#allocation2 + $0x14e8] sm:$0xff] }
 0x289   :  { %v2248_v8 = vld [vmem:[#allocation2 + $0x14f8] sm:$0xff]  ;;  %v4824_v19 = vpack.c.bf16 %v2246_v17, %v2242_v16  ;;  %v2265_v2 = vld [vmem:[#allocation2 + $0x1580] sm:$0xff] }
 0x28a   :  { %4791 = vmatpush1.bf16.msra.mxu0 %v4790_v32  ;;  %v2213_v32 = vld [vmem:[#allocation2 + $0x13e0] sm:$0xff] }
 0x28b   :  { %5303 = vmatpush1.bf16.msra.mxu1 %v5302_v33  ;;  %4793 = vmatprep.subr.bf16.mxu0 %v4792_v36  ;;  %v2211_v33 = vld [vmem:[#allocation2 + $0x13d0] sm:$0xff]  ;;  %v5320_v36 = vpack.c.bf16 %v2216_v21, %v2212_v20  ;;  %v4810_v1 = vpack.c.bf16 %v2213_v32, %v2209_v30  ;;  %v2241_v20 = vld [vmem:[#allocation2 + $0x14c0] sm:$0xff]  ;;  %v2250_v30 = vld [vmem:[#allocation2 + $0x1508] sm:$0xff] }
 0x28c   :  { %5305 = vmatprep.subr.bf16.mxu1 %v5304_v41  ;;  %v2220_v41 = vld [vmem:[#allocation2 + $0x1418] sm:$0xff]  ;;  %v5322_v28 = vpack.c.bf16 %v2215_v37, %v2211_v33  ;;  %v2245_v21 = vld [vmem:[#allocation2 + $0x14e0] sm:$0xff]  ;;  %v2254_v32 = vld [vmem:[#allocation2 + $0x1528] sm:$0xff] }
 0x28d   :  { %v2252_v33 = vld [vmem:[#allocation2 + $0x1518] sm:$0xff]  ;;  %v4826_v37 = vpack.c.bf16 %v2245_v21, %v2241_v20  ;;  %v4828_v38 = vpack.c.bf16 %v2254_v32, %v2250_v30  ;;  %v2273_v17 = vld [vmem:[#allocation2 + $0x15c0] sm:$0xff]  ;;  %v2286_v20 = vld [vmem:[#allocation2 + $0x1628] sm:$0xff] }
 0x28e   :  { %4795 = vmatpush1.bf16.msra.mxu0 %v4794_v45  ;;  %v2221_v45 = vld [vmem:[#allocation2 + $0x1420] sm:$0xff]  ;;  %v2284_v21 = vld [vmem:[#allocation2 + $0x1618] sm:$0xff] }
 0x28f   :  { %5307 = vmatpush1.bf16.msra.mxu1 %v5306_v46  ;;  %4797 = vmatprep.subr.bf16.mxu0 %v4796_v47  ;;  %v2219_v46 = vld [vmem:[#allocation2 + $0x1410] sm:$0xff]  ;;  %v5324_v47 = vpack.c.bf16 %v2224_v42, %v2220_v41  ;;  %v4814_v50 = vpack.c.bf16 %v2221_v45, %v2217_v44  ;;  %v2253_v41 = vld [vmem:[#allocation2 + $0x1520] sm:$0xff]  ;;  %v2262_v44 = vld [vmem:[#allocation2 + $0x1568] sm:$0xff] }
 0x290   :  { %5309 = vmatprep.subr.bf16.mxu1 %v5308_v34  ;;  %v2228_v34 = vld [vmem:[#allocation2 + $0x1458] sm:$0xff]  ;;  %v5326_v18 = vpack.c.bf16 %v2223_v49, %v2219_v46  ;;  %v2251_v42 = vld [vmem:[#allocation2 + $0x1510] sm:$0xff]  ;;  %v2281_v32 = vld [vmem:[#allocation2 + $0x1600] sm:$0xff] }
 0x291   :  { %v2260_v45 = vld [vmem:[#allocation2 + $0x1558] sm:$0xff] }
 0x292   :  { %4799 = vmatpush1.bf16.msra.mxu0 %v4798_v56  ;;  %v2229_v56 = vld [vmem:[#allocation2 + $0x1460] sm:$0xff]  ;;  %v2264_v46 = vld [vmem:[#allocation2 + $0x1578] sm:$0xff] }
 0x293   :  { %5311 = vmatpush1.bf16.msra.mxu1 %v5310_v40  ;;  %4801 = vmatprep.subr.bf16.mxu0 %v4800_v57  ;;  %v2227_v40 = vld [vmem:[#allocation2 + $0x1450] sm:$0xff]  ;;  %v5328_v57 = vpack.c.bf16 %v2232_v31, %v2228_v34  ;;  %v4818_v7 = vpack.c.bf16 %v2229_v56, %v2225_v55  ;;  %v2261_v34 = vld [vmem:[#allocation2 + $0x1560] sm:$0xff]  ;;  %v2270_v55 = vld [vmem:[#allocation2 + $0x15a8] sm:$0xff] }
 0x294   :  { %5313 = vmatprep.subr.bf16.mxu1 %v5312_v6  ;;  %v2236_v6 = vld [vmem:[#allocation2 + $0x1498] sm:$0xff]  ;;  %v5330_v52 = vpack.c.bf16 %v2231_v62, %v2227_v40  ;;  %v2259_v31 = vld [vmem:[#allocation2 + $0x1550] sm:$0xff] }
 0x295   :  { %v2268_v56 = vld [vmem:[#allocation2 + $0x1598] sm:$0xff] }
 0x296   :  { %4803 = vmatpush1.bf16.msra.mxu0 %v4802_v4  ;;  %v2237_v4 = vld [vmem:[#allocation2 + $0x14a0] sm:$0xff]  ;;  %v2272_v40 = vld [vmem:[#allocation2 + $0x15b8] sm:$0xff] }
 0x297   :  { %5315 = vmatpush1.bf16.msra.mxu1 %v5314_v11  ;;  %4805 = vmatprep.subr.bf16.mxu0 %v4804_v12  ;;  %v2235_v11 = vld [vmem:[#allocation2 + $0x1490] sm:$0xff]  ;;  %v5332_v12 = vpack.c.bf16 %v2240_v53, %v2236_v6  ;;  %v2269_v6 = vld [vmem:[#allocation2 + $0x15a0] sm:$0xff] }
 0x298   :  { %5317 = vmatprep.subr.bf16.mxu1 %v5316_v54  ;;  %v2244_v54 = vld [vmem:[#allocation2 + $0x14d8] sm:$0xff]  ;;  %v5334_v9 = vpack.c.bf16 %v2239_v15, %v2235_v11  ;;  %v2267_v53 = vld [vmem:[#allocation2 + $0x1590] sm:$0xff] }
 0x299   :  { %v2280_v11 = vld [vmem:[#allocation2 + $0x15f8] sm:$0xff] }
 0x29a   :  { %4807 = vmatpush1.bf16.msra.mxu0 %v4806_v22  ;;  %v2243_v22 = vld [vmem:[#allocation2 + $0x14d0] sm:$0xff] }
 0x29b   :  { %5319 = vmatpush1.bf16.msra.mxu1 %v5318_v24  ;;  %4809 = vmatprep.subr.bf16.mxu0 %v4808_v29  ;;  %v5336_v24 = vpack.c.bf16 %v2248_v8, %v2244_v54  ;;  %v2247_v29 = vld [vmem:[#allocation2 + $0x14f0] sm:$0xff]  ;;  %v2277_v54 = vld [vmem:[#allocation2 + $0x15e0] sm:$0xff] }
 0x29c   :  { %5321 = vmatprep.subr.bf16.mxu1 %v5320_v36  ;;  %v2256_v36 = vld [vmem:[#allocation2 + $0x1538] sm:$0xff]  ;;  %v2275_v8 = vld [vmem:[#allocation2 + $0x15d0] sm:$0xff] }
 0x29e   :  { %4811 = vmatpush1.bf16.msra.mxu0 %v4810_v1  ;;  %v5340_v1 = vpack.c.bf16 %v2256_v36, %v2252_v33  ;;  %v2285_v33 = vld [vmem:[#allocation2 + $0x1620] sm:$0xff]  ;;  %v2283_v36 = vld [vmem:[#allocation2 + $0x1610] sm:$0xff] }
 0x29f   :  { %5323 = vmatpush1.bf16.msra.mxu1 %v5322_v28  ;;  %4813 = vmatprep.subr.bf16.mxu0 %v4812_v43  ;;  %v2255_v28 = vld [vmem:[#allocation2 + $0x1530] sm:$0xff]  ;;  %v2258_v43 = vld [vmem:[#allocation2 + $0x1548] sm:$0xff] }
 0x2a0   :  { %5325 = vmatprep.subr.bf16.mxu1 %v5324_v47  ;;  %v4830_v47 = vpack.c.bf16 %v2253_v41, %v2249_v39  ;;  %v5342_v49 = vpack.c.bf16 %v2255_v28, %v2251_v42  ;;  %v4832_v35 = vpack.c.bf16 %v2262_v44, %v2258_v43  ;;  %v2294_v39 = vld [vmem:[#allocation2 + $0x1668] sm:$0xff]  ;;  %v2292_v41 = vld [vmem:[#allocation2 + $0x1658] sm:$0xff]  ;;  %v2289_v44 = vld [vmem:[#allocation2 + $0x1640] sm:$0xff] }
 0x2a1   :  { %2973 = vmatmul.mubr.f32.vlgmr.msra.gmra.mrb[8].mxu0 %v6134_v13  ;;  %v2296_v42 = vld [vmem:[#allocation2 + $0x1678] sm:$0xff] }
 0x2a2   :  { %4815 = vmatpush1.bf16.msra.mxu0 %v4814_v50  ;;  %3541 = vmatmul.mubr.f32.vlgmr.msra.gmra.mrb[8].mxu1 %v6134_v13  ;;  %v4822_v13 = vpack.c.bf16 %v2237_v4, %v2233_v3  ;;  %v5344_v50 = vpack.c.bf16 %v2264_v46, %v2260_v45  ;;  %v2278_v3 = vld [vmem:[#allocation2 + $0x15e8] sm:$0xff]  ;;  %v2276_v4 = vld [vmem:[#allocation2 + $0x15d8] sm:$0xff]  ;;  %v2293_v45 = vld [vmem:[#allocation2 + $0x1660] sm:$0xff] }
 0x2a3   :  { %5327 = vmatpush1.bf16.msra.mxu1 %v5326_v18  ;;  %4817 = vmatprep.subr.bf16.mxu0 %v4816_v51  ;;  %v2263_v18 = vld [vmem:[#allocation2 + $0x1570] sm:$0xff]  ;;  %v2266_v51 = vld [vmem:[#allocation2 + $0x1588] sm:$0xff] }
 0x2a4   :  { %5329 = vmatprep.subr.bf16.mxu1 %v5328_v57  ;;  %3043 = vmatprep.mubr.f32.mxu0 %v6140_v5  ;;  %v4834_v57 = vpack.c.bf16 %v2261_v34, %v2257_v48  ;;  %v5346_v62 = vpack.c.bf16 %v2263_v18, %v2259_v31  ;;  %v4836_v63 = vpack.c.bf16 %v2270_v55, %v2266_v51  ;;  %v2291_v46 = vld [vmem:[#allocation2 + $0x1650] sm:$0xff]  ;;  %v2302_v48 = vld [vmem:[#allocation2 + $0x16a8] sm:$0xff]  ;;  %v2300_v34 = vld [vmem:[#allocation2 + $0x1698] sm:$0xff] }
 0x2a5   :  { %3611 = vmatprep.mubr.f32.mxu1 %v6140_v5  ;;  %v5338_v5 = vpack.c.bf16 %v2247_v29, %v2243_v22  ;;  %v2288_v22 = vld [vmem:[#allocation2 + $0x1638] sm:$0xff]  ;;  %v2297_v55 = vld [vmem:[#allocation2 + $0x1680] sm:$0xff] }
 0x2a6   :  { %4819 = vmatpush1.bf16.msra.mxu0 %v4818_v7  ;;  %v5348_v7 = vpack.c.bf16 %v2272_v40, %v2268_v56  ;;  %v2304_v31 = vld [vmem:[#allocation2 + $0x16b8] sm:$0xff]  ;;  %v2301_v56 = vld [vmem:[#allocation2 + $0x16a0] sm:$0xff]  ;;  %v2299_v40 = vld [vmem:[#allocation2 + $0x1690] sm:$0xff] }
 0x2a7   :  { %5331 = vmatpush1.bf16.msra.mxu1 %v5330_v52  ;;  %4821 = vmatprep.subr.bf16.mxu0 %v4820_v10  ;;  %v2271_v52 = vld [vmem:[#allocation2 + $0x15b0] sm:$0xff]  ;;  %v2274_v10 = vld [vmem:[#allocation2 + $0x15c8] sm:$0xff] }
 0x2a8   :  { %5333 = vmatprep.subr.bf16.mxu1 %v5332_v12  ;;  %v4838_v12 = vpack.c.bf16 %v2269_v6, %v2265_v2  ;;  %v5350_v15 = vpack.c.bf16 %v2271_v52, %v2267_v53  ;;  %v4840_v16 = vpack.c.bf16 %v2278_v3, %v2274_v10  ;;  %v2310_v2 = vld [vmem:[#allocation2 + $0x16e8] sm:$0xff]  ;;  %v2308_v6 = vld [vmem:[#allocation2 + $0x16d8] sm:$0xff]  ;;  %v2305_v3 = vld [vmem:[#allocation2 + $0x16c0] sm:$0xff] }
 0x2a9   :  { %v2312_v53 = vld [vmem:[#allocation2 + $0x16f8] sm:$0xff] }
 0x2aa   :  { %4823 = vmatpush1.bf16.msra.mxu0 %v4822_v13  ;;  %v5352_v13 = vpack.c.bf16 %v2280_v11, %v2276_v4  ;;  %v2309_v4 = vld [vmem:[#allocation2 + $0x16e0] sm:$0xff]  ;;  %v2307_v11 = vld [vmem:[#allocation2 + $0x16d0] sm:$0xff] }
 0x2ab   :  { %5335 = vmatpush1.bf16.msra.mxu1 %v5334_v9  ;;  %4825 = vmatprep.subr.bf16.mxu0 %v4824_v19  ;;  %v2279_v9 = vld [vmem:[#allocation2 + $0x15f0] sm:$0xff]  ;;  %v2282_v19 = vld [vmem:[#allocation2 + $0x1608] sm:$0xff] }
 0x2ac   :  { %5337 = vmatprep.subr.bf16.mxu1 %v5336_v24  ;;  %v4842_v24 = vpack.c.bf16 %v2277_v54, %v2273_v17  ;;  %v5354_v29 = vpack.c.bf16 %v2279_v9, %v2275_v8  ;;  %v4844_v30 = vpack.c.bf16 %v2286_v20, %v2282_v19  ;;  %v2318_v17 = vld [vmem:[#allocation2 + $0x1728] sm:$0xff]  ;;  %v2316_v54 = vld [vmem:[#allocation2 + $0x1718] sm:$0xff]  ;;  %v2313_v20 = vld [vmem:[#allocation2 + $0x1700] sm:$0xff] }
 0x2ad   :  { %v2320_v8 = vld [vmem:[#allocation2 + $0x1738] sm:$0xff] }
 0x2ae   :  { %4827 = vmatpush1.bf16.msra.mxu0 %v4826_v37  ;;  %v5356_v37 = vpack.c.bf16 %v2288_v22, %v2284_v21  ;;  %v2317_v21 = vld [vmem:[#allocation2 + $0x1720] sm:$0xff]  ;;  %v2315_v22 = vld [vmem:[#allocation2 + $0x1710] sm:$0xff] }
 0x2af   :  { %5339 = vmatpush1.bf16.msra.mxu1 %v5338_v5  ;;  %4829 = vmatprep.subr.bf16.mxu0 %v4828_v38  ;;  %v2287_v5 = vld [vmem:[#allocation2 + $0x1630] sm:$0xff]  ;;  %v2290_v38 = vld [vmem:[#allocation2 + $0x1648] sm:$0xff] }
 0x2b0   :  { %5341 = vmatprep.subr.bf16.mxu1 %v5340_v1  ;;  %v4846_v1 = vpack.c.bf16 %v2285_v33, %v2281_v32  ;;  %v5358_v28 = vpack.c.bf16 %v2287_v5, %v2283_v36  ;;  %v4848_v43 = vpack.c.bf16 %v2294_v39, %v2290_v38  ;;  %v2326_v32 = vld [vmem:[#allocation2 + $0x1768] sm:$0xff]  ;;  %v2324_v33 = vld [vmem:[#allocation2 + $0x1758] sm:$0xff]  ;;  %v2321_v39 = vld [vmem:[#allocation2 + $0x1740] sm:$0xff] }
 0x2b1   :  { %v2328_v36 = vld [vmem:[#allocation2 + $0x1778] sm:$0xff] }
 0x2b2   :  { %4831 = vmatpush1.bf16.msra.mxu0 %v4830_v47  ;;  %v5360_v47 = vpack.c.bf16 %v2296_v42, %v2292_v41  ;;  %v2325_v41 = vld [vmem:[#allocation2 + $0x1760] sm:$0xff]  ;;  %v2323_v42 = vld [vmem:[#allocation2 + $0x1750] sm:$0xff] }
 0x2b3   :  { %5343 = vmatpush1.bf16.msra.mxu1 %v5342_v49  ;;  %4833 = vmatprep.subr.bf16.mxu0 %v4832_v35  ;;  %v2295_v49 = vld [vmem:[#allocation2 + $0x1670] sm:$0xff]  ;;  %v2298_v35 = vld [vmem:[#allocation2 + $0x1688] sm:$0xff] }
 0x2b4   :  { %5345 = vmatprep.subr.bf16.mxu1 %v5344_v50  ;;  %v4850_v50 = vpack.c.bf16 %v2293_v45, %v2289_v44  ;;  %v5362_v18 = vpack.c.bf16 %v2295_v49, %v2291_v46  ;;  %v4852_v51 = vpack.c.bf16 %v2302_v48, %v2298_v35  ;;  %v2334_v44 = vld [vmem:[#allocation2 + $0x17a8] sm:$0xff]  ;;  %v2332_v45 = vld [vmem:[#allocation2 + $0x1798] sm:$0xff]  ;;  %v2329_v48 = vld [vmem:[#allocation2 + $0x1780] sm:$0xff] }
 0x2b5   :  { %v2336_v46 = vld [vmem:[#allocation2 + $0x17b8] sm:$0xff] }
 0x2b6   :  { %4835 = vmatpush1.bf16.msra.mxu0 %v4834_v57  ;;  %v5364_v57 = vpack.c.bf16 %v2304_v31, %v2300_v34  ;;  %v2333_v34 = vld [vmem:[#allocation2 + $0x17a0] sm:$0xff]  ;;  %v2331_v31 = vld [vmem:[#allocation2 + $0x1790] sm:$0xff] }
 0x2b7   :  { %5347 = vmatpush1.bf16.msra.mxu1 %v5346_v62  ;;  %4837 = vmatprep.subr.bf16.mxu0 %v4836_v63  ;;  %v2303_v62 = vld [vmem:[#allocation2 + $0x16b0] sm:$0xff]  ;;  %v2306_v63 = vld [vmem:[#allocation2 + $0x16c8] sm:$0xff] }
 0x2b8   :  { %5349 = vmatprep.subr.bf16.mxu1 %v5348_v7  ;;  %v4854_v7 = vpack.c.bf16 %v2301_v56, %v2297_v55  ;;  %v5366_v52 = vpack.c.bf16 %v2303_v62, %v2299_v40  ;;  %v4856_v10 = vpack.c.bf16 %v2310_v2, %v2306_v63  ;;  %v2342_v55 = vld [vmem:[#allocation2 + $0x17e8] sm:$0xff]  ;;  %v2340_v56 = vld [vmem:[#allocation2 + $0x17d8] sm:$0xff]  ;;  %v2337_v2 = vld [vmem:[#allocation2 + $0x17c0] sm:$0xff] }
 0x2b9   :  { %v2344_v40 = vld [vmem:[#allocation2 + $0x17f8] sm:$0xff] }
 0x2ba   :  { %4839 = vmatpush1.bf16.msra.mxu0 %v4838_v12  ;;  %v5368_v12 = vpack.c.bf16 %v2312_v53, %v2308_v6  ;;  %v2341_v6 = vld [vmem:[#allocation2 + $0x17e0] sm:$0xff]  ;;  %v2339_v53 = vld [vmem:[#allocation2 + $0x17d0] sm:$0xff] }
 0x2bb   :  { %5351 = vmatpush1.bf16.msra.mxu1 %v5350_v15  ;;  %4841 = vmatprep.subr.bf16.mxu0 %v4840_v16  ;;  %v2311_v15 = vld [vmem:[#allocation2 + $0x16f0] sm:$0xff]  ;;  %v2314_v16 = vld [vmem:[#allocation2 + $0x1708] sm:$0xff] }
 0x2bc   :  { %5353 = vmatprep.subr.bf16.mxu1 %v5352_v13  ;;  %v4858_v13 = vpack.c.bf16 %v2309_v4, %v2305_v3  ;;  %v5370_v9 = vpack.c.bf16 %v2311_v15, %v2307_v11  ;;  %v4860_v19 = vpack.c.bf16 %v2318_v17, %v2314_v16  ;;  %v2350_v3 = vld [vmem:[#allocation2 + $0x1828] sm:$0xff]  ;;  %v2348_v4 = vld [vmem:[#allocation2 + $0x1818] sm:$0xff]  ;;  %v2345_v17 = vld [vmem:[#allocation2 + $0x1800] sm:$0xff] }
 0x2bd   :  { %v2352_v11 = vld [vmem:[#allocation2 + $0x1838] sm:$0xff] }
 0x2be   :  { %4843 = vmatpush1.bf16.msra.mxu0 %v4842_v24  ;;  %v5372_v24 = vpack.c.bf16 %v2320_v8, %v2316_v54  ;;  %v2349_v54 = vld [vmem:[#allocation2 + $0x1820] sm:$0xff]  ;;  %v2347_v8 = vld [vmem:[#allocation2 + $0x1810] sm:$0xff] }
 0x2bf   :  { %5355 = vmatpush1.bf16.msra.mxu1 %v5354_v29  ;;  %4845 = vmatprep.subr.bf16.mxu0 %v4844_v30  ;;  %v2319_v29 = vld [vmem:[#allocation2 + $0x1730] sm:$0xff]  ;;  %v2322_v30 = vld [vmem:[#allocation2 + $0x1748] sm:$0xff] }
 0x2c0   :  { %5357 = vmatprep.subr.bf16.mxu1 %v5356_v37  ;;  %v4862_v37 = vpack.c.bf16 %v2317_v21, %v2313_v20  ;;  %v5374_v5 = vpack.c.bf16 %v2319_v29, %v2315_v22  ;;  %v4864_v38 = vpack.c.bf16 %v2326_v32, %v2322_v30  ;;  %v2358_v20 = vld [vmem:[#allocation2 + $0x1868] sm:$0xff]  ;;  %v2356_v21 = vld [vmem:[#allocation2 + $0x1858] sm:$0xff]  ;;  %v2353_v32 = vld [vmem:[#allocation2 + $0x1840] sm:$0xff] }
 0x2c1   :  { %v2360_v22 = vld [vmem:[#allocation2 + $0x1878] sm:$0xff] }
 0x2c2   :  { %4847 = vmatpush1.bf16.msra.mxu0 %v4846_v1  ;;  %v5376_v1 = vpack.c.bf16 %v2328_v36, %v2324_v33  ;;  %v2357_v33 = vld [vmem:[#allocation2 + $0x1860] sm:$0xff]  ;;  %v2355_v36 = vld [vmem:[#allocation2 + $0x1850] sm:$0xff] }
 0x2c3   :  { %5359 = vmatpush1.bf16.msra.mxu1 %v5358_v28  ;;  %4849 = vmatprep.subr.bf16.mxu0 %v4848_v43  ;;  %v2327_v28 = vld [vmem:[#allocation2 + $0x1770] sm:$0xff]  ;;  %v2330_v43 = vld [vmem:[#allocation2 + $0x1788] sm:$0xff] }
 0x2c4   :  { %5361 = vmatprep.subr.bf16.mxu1 %v5360_v47  ;;  %v4866_v47 = vpack.c.bf16 %v2325_v41, %v2321_v39  ;;  %v5378_v49 = vpack.c.bf16 %v2327_v28, %v2323_v42  ;;  %v4868_v35 = vpack.c.bf16 %v2334_v44, %v2330_v43  ;;  %v2366_v39 = vld [vmem:[#allocation2 + $0x18a8] sm:$0xff]  ;;  %v2364_v41 = vld [vmem:[#allocation2 + $0x1898] sm:$0xff]  ;;  %v2361_v44 = vld [vmem:[#allocation2 + $0x1880] sm:$0xff] }
 0x2c5   :  { %v2368_v42 = vld [vmem:[#allocation2 + $0x18b8] sm:$0xff] }
 0x2c6   :  { %4851 = vmatpush1.bf16.msra.mxu0 %v4850_v50  ;;  %v5380_v50 = vpack.c.bf16 %v2336_v46, %v2332_v45  ;;  %v2365_v45 = vld [vmem:[#allocation2 + $0x18a0] sm:$0xff]  ;;  %v2363_v46 = vld [vmem:[#allocation2 + $0x1890] sm:$0xff] }
 0x2c7   :  { %5363 = vmatpush1.bf16.msra.mxu1 %v5362_v18  ;;  %4853 = vmatprep.subr.bf16.mxu0 %v4852_v51  ;;  %v2335_v18 = vld [vmem:[#allocation2 + $0x17b0] sm:$0xff]  ;;  %v2338_v51 = vld [vmem:[#allocation2 + $0x17c8] sm:$0xff] }
 0x2c8   :  { %5365 = vmatprep.subr.bf16.mxu1 %v5364_v57  ;;  %v4870_v57 = vpack.c.bf16 %v2333_v34, %v2329_v48  ;;  %v5382_v62 = vpack.c.bf16 %v2335_v18, %v2331_v31  ;;  %v4872_v63 = vpack.c.bf16 %v2342_v55, %v2338_v51  ;;  %v2374_v48 = vld [vmem:[#allocation2 + $0x18e8] sm:$0xff]  ;;  %v2372_v34 = vld [vmem:[#allocation2 + $0x18d8] sm:$0xff]  ;;  %v2369_v51 = vld [vmem:[#allocation2 + $0x18c0] sm:$0xff] }
 0x2c9   :  { %v2376_v31 = vld [vmem:[#allocation2 + $0x18f8] sm:$0xff]  ;;  %v2373_v55 = vld [vmem:[#allocation2 + $0x18e0] sm:$0xff] }
 0x2ca   :  { %4855 = vmatpush1.bf16.msra.mxu0 %v4854_v7  ;;  %v5384_v7 = vpack.c.bf16 %v2344_v40, %v2340_v56  ;;  %v2371_v56 = vld [vmem:[#allocation2 + $0x18d0] sm:$0xff]  ;;  %v5400_v40 = vpack.c.bf16 %v2376_v31, %v2372_v34 }
 0x2cb   :  { %5367 = vmatpush1.bf16.msra.mxu1 %v5366_v52  ;;  %4857 = vmatprep.subr.bf16.mxu0 %v4856_v10  ;;  %v2343_v52 = vld [vmem:[#allocation2 + $0x17f0] sm:$0xff]  ;;  %v2346_v10 = vld [vmem:[#allocation2 + $0x1808] sm:$0xff] }
 0x2cc   :  { %5369 = vmatprep.subr.bf16.mxu1 %v5368_v12  ;;  %v4874_v12 = vpack.c.bf16 %v2341_v6, %v2337_v2  ;;  %v5386_v15 = vpack.c.bf16 %v2343_v52, %v2339_v53  ;;  %v4876_v16 = vpack.c.bf16 %v2350_v3, %v2346_v10  ;;  %v2380_v2 = vld [vmem:[#allocation2 + $0x1918] sm:$0xff]  ;;  %v4890_v53 = vpack.c.bf16 %v2373_v55, %v2369_v51  ;;  %v2377_v52 = vld [vmem:[#allocation2 + $0x1900] sm:$0xff]  ;;  %v2379_v3 = vld [vmem:[#allocation2 + $0x1910] sm:$0xff] }
 0x2cd   :  { %v2384_v6 = vld [vmem:[#allocation2 + $0x1938] sm:$0xff]  ;;  %v2381_v10 = vld [vmem:[#allocation2 + $0x1920] sm:$0xff]  ;;  %v2407_v31 = vld [vmem:[#allocation2 + $0x19f0] sm:$0xff] }
 0x2ce   :  { %4859 = vmatpush1.bf16.msra.mxu0 %v4858_v13  ;;  %v5388_v13 = vpack.c.bf16 %v2352_v11, %v2348_v4  ;;  %v5404_v4 = vpack.c.bf16 %v2384_v6, %v2380_v2  ;;  %v2383_v11 = vld [vmem:[#allocation2 + $0x1930] sm:$0xff]  ;;  %v2416_v51 = vld [vmem:[#allocation2 + $0x1a38] sm:$0xff] }
 0x2cf   :  { %5371 = vmatpush1.bf16.msra.mxu1 %v5370_v9  ;;  %4861 = vmatprep.subr.bf16.mxu0 %v4860_v19  ;;  %v2351_v9 = vld [vmem:[#allocation2 + $0x1830] sm:$0xff]  ;;  %v2354_v19 = vld [vmem:[#allocation2 + $0x1848] sm:$0xff] }
 0x2d0   :  { %5373 = vmatprep.subr.bf16.mxu1 %v5372_v24  ;;  %v4878_v24 = vpack.c.bf16 %v2349_v54, %v2345_v17  ;;  %v5390_v29 = vpack.c.bf16 %v2351_v9, %v2347_v8  ;;  %v4880_v30 = vpack.c.bf16 %v2358_v20, %v2354_v19  ;;  %v2392_v17 = vld [vmem:[#allocation2 + $0x1978] sm:$0xff]  ;;  %v4894_v54 = vpack.c.bf16 %v2381_v10, %v2377_v52  ;;  %v2385_v9 = vld [vmem:[#allocation2 + $0x1940] sm:$0xff]  ;;  %v2387_v20 = vld [vmem:[#allocation2 + $0x1950] sm:$0xff] }
 0x2d1   :  { %v5406_v8 = vpack.c.bf16 %v2383_v11, %v2379_v3  ;;  %v2389_v19 = vld [vmem:[#allocation2 + $0x1960] sm:$0xff]  ;;  %v2415_v6 = vld [vmem:[#allocation2 + $0x1a30] sm:$0xff]  ;;  %v2424_v52 = vld [vmem:[#allocation2 + $0x1a78] sm:$0xff] }
 0x2d2   :  { %4863 = vmatpush1.bf16.msra.mxu0 %v4862_v37  ;;  %v5392_v37 = vpack.c.bf16 %v2360_v22, %v2356_v21  ;;  %v2391_v22 = vld [vmem:[#allocation2 + $0x1970] sm:$0xff]  ;;  %v2417_v11 = vld [vmem:[#allocation2 + $0x1a40] sm:$0xff] }
 0x2d3   :  { %5375 = vmatpush1.bf16.msra.mxu1 %v5374_v5  ;;  %4865 = vmatprep.subr.bf16.mxu0 %v4864_v38  ;;  %v2359_v5 = vld [vmem:[#allocation2 + $0x1870] sm:$0xff]  ;;  %v2362_v38 = vld [vmem:[#allocation2 + $0x1888] sm:$0xff] }
 0x2d4   :  { %5377 = vmatprep.subr.bf16.mxu1 %v5376_v1  ;;  %v4882_v1 = vpack.c.bf16 %v2357_v33, %v2353_v32  ;;  %v5394_v28 = vpack.c.bf16 %v2359_v5, %v2355_v36  ;;  %v4884_v43 = vpack.c.bf16 %v2366_v39, %v2362_v38  ;;  %v2400_v32 = vld [vmem:[#allocation2 + $0x19b8] sm:$0xff]  ;;  %v4898_v33 = vpack.c.bf16 %v2389_v19, %v2385_v9  ;;  %v2393_v5 = vld [vmem:[#allocation2 + $0x1980] sm:$0xff]  ;;  %v2395_v39 = vld [vmem:[#allocation2 + $0x1990] sm:$0xff] }
 0x2d5   :  { %v5410_v36 = vpack.c.bf16 %v2391_v22, %v2387_v20  ;;  %v2397_v38 = vld [vmem:[#allocation2 + $0x19a0] sm:$0xff]  ;;  %v2432_v9 = vld [vmem:[#allocation2 + $0x1ab8] sm:$0xff] }
 0x2d6   :  { %4867 = vmatpush1.bf16.msra.mxu0 %v4866_v47  ;;  %v5396_v47 = vpack.c.bf16 %v2368_v42, %v2364_v41  ;;  %v2399_v42 = vld [vmem:[#allocation2 + $0x19b0] sm:$0xff]  ;;  %v2425_v22 = vld [vmem:[#allocation2 + $0x1a80] sm:$0xff] }
 0x2d7   :  { %5379 = vmatpush1.bf16.msra.mxu1 %v5378_v49  ;;  %4869 = vmatprep.subr.bf16.mxu0 %v4868_v35  ;;  %v2367_v49 = vld [vmem:[#allocation2 + $0x18b0] sm:$0xff]  ;;  %v2370_v35 = vld [vmem:[#allocation2 + $0x18c8] sm:$0xff] }
 0x2d8   :  { %5381 = vmatprep.subr.bf16.mxu1 %v5380_v50  ;;  %v5398_v50 = vpack.c.bf16 %v2367_v49, %v2363_v46  ;;  %v4888_v18 = vpack.c.bf16 %v2374_v48, %v2370_v35  ;;  %v5414_v46 = vpack.c.bf16 %v2399_v42, %v2395_v39  ;;  %v2401_v49 = vld [vmem:[#allocation2 + $0x19c0] sm:$0xff]  ;;  %v2403_v48 = vld [vmem:[#allocation2 + $0x19d0] sm:$0xff] }
 0x2d9   :  { %v2405_v35 = vld [vmem:[#allocation2 + $0x19e0] sm:$0xff] }
 0x2da   :  { %4871 = vmatpush1.bf16.msra.mxu0 %v4870_v57  ;;  %v2375_v57 = vld [vmem:[#allocation2 + $0x18f0] sm:$0xff]  ;;  %v4906_v55 = vpack.c.bf16 %v2405_v35, %v2401_v49  ;;  %v2433_v42 = vld [vmem:[#allocation2 + $0x1ac0] sm:$0xff]  ;;  %v2448_v49 = vld [vmem:[#allocation2 + $0x1b38] sm:$0xff] }
 0x2db   :  { %5383 = vmatpush1.bf16.msra.mxu1 %v5382_v62  ;;  %4873 = vmatprep.subr.bf16.mxu0 %v4872_v63  ;;  %v2378_v62 = vld [vmem:[#allocation2 + $0x1908] sm:$0xff] }
 0x2dc   :  { %5385 = vmatprep.subr.bf16.mxu1 %v5384_v7  ;;  %v2382_v63 = vld [vmem:[#allocation2 + $0x1928] sm:$0xff] }
 0x2dd   :  { %v4892_v7 = vpack.c.bf16 %v2382_v63, %v2378_v62  ;;  %v2413_v62 = vld [vmem:[#allocation2 + $0x1a20] sm:$0xff]  ;;  %v2411_v63 = vld [vmem:[#allocation2 + $0x1a10] sm:$0xff] }
 0x2de   :  { %4875 = vmatpush1.bf16.msra.mxu0 %v4874_v12  ;;  %v2386_v12 = vld [vmem:[#allocation2 + $0x1948] sm:$0xff]  ;;  %v5422_v3 = vpack.c.bf16 %v2415_v6, %v2411_v63  ;;  %v2449_v6 = vld [vmem:[#allocation2 + $0x1b40] sm:$0xff] }
 0x2df   :  { %5387 = vmatpush1.bf16.msra.mxu1 %v5386_v15  ;;  %4877 = vmatprep.subr.bf16.mxu0 %v4876_v16  ;;  %v2390_v15 = vld [vmem:[#allocation2 + $0x1968] sm:$0xff]  ;;  %v2388_v16 = vld [vmem:[#allocation2 + $0x1958] sm:$0xff] }
 0x2e0   :  { %5389 = vmatprep.subr.bf16.mxu1 %v5388_v13  ;;  %v4896_v13 = vpack.c.bf16 %v2390_v15, %v2386_v12  ;;  %v5408_v21 = vpack.c.bf16 %v2392_v17, %v2388_v16  ;;  %v2421_v12 = vld [vmem:[#allocation2 + $0x1a60] sm:$0xff]  ;;  %v2419_v15 = vld [vmem:[#allocation2 + $0x1a50] sm:$0xff] }
 0x2e1   :  { %3044 = vmatmul.mubr.f32.vlgmr.msra.gmra.mrb[8].mxu0 %v6136_v14  ;;  %v2423_v17 = vld [vmem:[#allocation2 + $0x1a70] sm:$0xff]  ;;  %v4914_v19 = vpack.c.bf16 %v2421_v12, %v2417_v11  ;;  %v2464_v11 = vld [vmem:[#allocation2 + $0x1bb8] sm:$0xff] }
 0x2e2   :  { %4879 = vmatpush1.bf16.msra.mxu0 %v4878_v24  ;;  %3612 = vmatmul.mubr.f32.vlgmr.msra.gmra.mrb[8].mxu1 %v6136_v14  ;;  %v4886_v14 = vpack.c.bf16 %v2365_v45, %v2361_v44  ;;  %v2394_v24 = vld [vmem:[#allocation2 + $0x1988] sm:$0xff]  ;;  %v2408_v44 = vld [vmem:[#allocation2 + $0x19f8] sm:$0xff]  ;;  %v4902_v45 = vpack.c.bf16 %v2397_v38, %v2393_v5  ;;  %v5426_v20 = vpack.c.bf16 %v2423_v17, %v2419_v15  ;;  %v2457_v17 = vld [vmem:[#allocation2 + $0x1b80] sm:$0xff] }
 0x2e3   :  { %5391 = vmatpush1.bf16.msra.mxu1 %v5390_v29  ;;  %4881 = vmatprep.subr.bf16.mxu0 %v4880_v30  ;;  %v2398_v29 = vld [vmem:[#allocation2 + $0x19a8] sm:$0xff]  ;;  %v2396_v30 = vld [vmem:[#allocation2 + $0x1998] sm:$0xff] }
 0x2e4   :  { %5393 = vmatprep.subr.bf16.mxu1 %v5392_v37  ;;  %3114 = vmatprep.mubr.f32.mxu0 %v6146_v26  ;;  %v4900_v37 = vpack.c.bf16 %v2398_v29, %v2394_v24  ;;  %v5412_v41 = vpack.c.bf16 %v2400_v32, %v2396_v30  ;;  %v2429_v24 = vld [vmem:[#allocation2 + $0x1aa0] sm:$0xff]  ;;  %v2427_v29 = vld [vmem:[#allocation2 + $0x1a90] sm:$0xff]  ;;  %v2440_v5 = vld [vmem:[#allocation2 + $0x1af8] sm:$0xff] }
 0x2e5   :  { %3682 = vmatprep.mubr.f32.mxu1 %v6146_v26  ;;  %v5402_v26 = vpack.c.bf16 %v2375_v57, %v2371_v56  ;;  %v5418_v56 = vpack.c.bf16 %v2407_v31, %v2403_v48  ;;  %v2409_v57 = vld [vmem:[#allocation2 + $0x1a00] sm:$0xff]  ;;  %v2431_v32 = vld [vmem:[#allocation2 + $0x1ab0] sm:$0xff]  ;;  %v4918_v38 = vpack.c.bf16 %v2429_v24, %v2425_v22  ;;  %v2472_v22 = vld [vmem:[#allocation2 + $0x1bf8] sm:$0xff] }
 0x2e6   :  { %4883 = vmatpush1.bf16.msra.mxu0 %v4882_v1  ;;  %v2402_v1 = vld [vmem:[#allocation2 + $0x19c8] sm:$0xff]  ;;  %v4910_v10 = vpack.c.bf16 %v2413_v62, %v2409_v57  ;;  %v5430_v39 = vpack.c.bf16 %v2431_v32, %v2427_v29  ;;  %v2441_v31 = vld [vmem:[#allocation2 + $0x1b00] sm:$0xff]  ;;  %v2456_v57 = vld [vmem:[#allocation2 + $0x1b78] sm:$0xff] }
 0x2e7   :  { %5395 = vmatpush1.bf16.msra.mxu1 %v5394_v28  ;;  %4885 = vmatprep.subr.bf16.mxu0 %v4884_v43  ;;  %v2406_v28 = vld [vmem:[#allocation2 + $0x19e8] sm:$0xff]  ;;  %v2404_v43 = vld [vmem:[#allocation2 + $0x19d8] sm:$0xff]  ;;  %v2465_v32 = vld [vmem:[#allocation2 + $0x1bc0] sm:$0xff] }
 0x2e8   :  { %5397 = vmatprep.subr.bf16.mxu1 %v5396_v47  ;;  %v4904_v47 = vpack.c.bf16 %v2406_v28, %v2402_v1  ;;  %v5416_v34 = vpack.c.bf16 %v2408_v44, %v2404_v43  ;;  %v2437_v1 = vld [vmem:[#allocation2 + $0x1ae0] sm:$0xff]  ;;  %v2435_v28 = vld [vmem:[#allocation2 + $0x1ad0] sm:$0xff] }
 0x2e9   :  { %v2439_v44 = vld [vmem:[#allocation2 + $0x1af0] sm:$0xff]  ;;  %v4922_v35 = vpack.c.bf16 %v2437_v1, %v2433_v42  ;;  %v2480_v42 = vld [vmem:[#allocation2 + $0x1c38] sm:$0xff] }
 0x2ea   :  { %4887 = vmatpush1.bf16.msra.mxu0 %v4886_v14  ;;  %v2410_v14 = vld [vmem:[#allocation2 + $0x1a08] sm:$0xff]  ;;  %v5434_v48 = vpack.c.bf16 %v2439_v44, %v2435_v28  ;;  %v2473_v44 = vld [vmem:[#allocation2 + $0x1c00] sm:$0xff] }
 0x2eb   :  { %5399 = vmatpush1.bf16.msra.mxu1 %v5398_v50  ;;  %4889 = vmatprep.subr.bf16.mxu0 %v4888_v18  ;;  %v2414_v50 = vld [vmem:[#allocation2 + $0x1a28] sm:$0xff]  ;;  %v2412_v18 = vld [vmem:[#allocation2 + $0x1a18] sm:$0xff] }
 0x2ec   :  { %5401 = vmatprep.subr.bf16.mxu1 %v5400_v40  ;;  %v4908_v40 = vpack.c.bf16 %v2414_v50, %v2410_v14  ;;  %v5420_v2 = vpack.c.bf16 %v2416_v51, %v2412_v18  ;;  %v2445_v14 = vld [vmem:[#allocation2 + $0x1b20] sm:$0xff]  ;;  %v2443_v50 = vld [vmem:[#allocation2 + $0x1b10] sm:$0xff] }
 0x2ed   :  { %v2447_v51 = vld [vmem:[#allocation2 + $0x1b30] sm:$0xff]  ;;  %v4926_v62 = vpack.c.bf16 %v2445_v14, %v2441_v31  ;;  %v2488_v31 = vld [vmem:[#allocation2 + $0x1c78] sm:$0xff] }
 0x2ee   :  { %4891 = vmatpush1.bf16.msra.mxu0 %v4890_v53  ;;  %v2418_v53 = vld [vmem:[#allocation2 + $0x1a48] sm:$0xff]  ;;  %v5438_v63 = vpack.c.bf16 %v2447_v51, %v2443_v50  ;;  %v2481_v51 = vld [vmem:[#allocation2 + $0x1c40] sm:$0xff] }
 0x2ef   :  { %5403 = vmatpush1.bf16.msra.mxu1 %v5402_v26  ;;  %4893 = vmatprep.subr.bf16.mxu0 %v4892_v7  ;;  %v2422_v26 = vld [vmem:[#allocation2 + $0x1a68] sm:$0xff]  ;;  %v2420_v7 = vld [vmem:[#allocation2 + $0x1a58] sm:$0xff] }
 0x2f0   :  { %5405 = vmatprep.subr.bf16.mxu1 %v5404_v4  ;;  %v4912_v4 = vpack.c.bf16 %v2422_v26, %v2418_v53  ;;  %v5424_v16 = vpack.c.bf16 %v2424_v52, %v2420_v7  ;;  %v2453_v53 = vld [vmem:[#allocation2 + $0x1b60] sm:$0xff]  ;;  %v2451_v26 = vld [vmem:[#allocation2 + $0x1b50] sm:$0xff] }
 0x2f1   :  { %v2455_v52 = vld [vmem:[#allocation2 + $0x1b70] sm:$0xff]  ;;  %v4930_v12 = vpack.c.bf16 %v2453_v53, %v2449_v6  ;;  %v2496_v6 = vld [vmem:[#allocation2 + $0x1cb8] sm:$0xff] }
 0x2f2   :  { %4895 = vmatpush1.bf16.msra.mxu0 %v4894_v54  ;;  %v2426_v54 = vld [vmem:[#allocation2 + $0x1a88] sm:$0xff]  ;;  %v5442_v15 = vpack.c.bf16 %v2455_v52, %v2451_v26  ;;  %v2489_v52 = vld [vmem:[#allocation2 + $0x1c80] sm:$0xff] }
 0x2f3   :  { %5407 = vmatpush1.bf16.msra.mxu1 %v5406_v8  ;;  %4897 = vmatprep.subr.bf16.mxu0 %v4896_v13  ;;  %v2430_v8 = vld [vmem:[#allocation2 + $0x1aa8] sm:$0xff]  ;;  %v2428_v13 = vld [vmem:[#allocation2 + $0x1a98] sm:$0xff] }
 0x2f4   :  { %5409 = vmatprep.subr.bf16.mxu1 %v5408_v21  ;;  %v4916_v21 = vpack.c.bf16 %v2430_v8, %v2426_v54  ;;  %v5428_v30 = vpack.c.bf16 %v2432_v9, %v2428_v13  ;;  %v2461_v54 = vld [vmem:[#allocation2 + $0x1ba0] sm:$0xff]  ;;  %v2459_v8 = vld [vmem:[#allocation2 + $0x1b90] sm:$0xff] }
 0x2f5   :  { %v2463_v9 = vld [vmem:[#allocation2 + $0x1bb0] sm:$0xff]  ;;  %v4934_v24 = vpack.c.bf16 %v2461_v54, %v2457_v17  ;;  %v2504_v17 = vld [vmem:[#allocation2 + $0x1cf8] sm:$0xff] }
 0x2f6   :  { %4899 = vmatpush1.bf16.msra.mxu0 %v4898_v33  ;;  %v2434_v33 = vld [vmem:[#allocation2 + $0x1ac8] sm:$0xff]  ;;  %v5446_v29 = vpack.c.bf16 %v2463_v9, %v2459_v8  ;;  %v2501_v9 = vld [vmem:[#allocation2 + $0x1ce0] sm:$0xff] }
 0x2f7   :  { %5411 = vmatpush1.bf16.msra.mxu1 %v5410_v36  ;;  %4901 = vmatprep.subr.bf16.mxu0 %v4900_v37  ;;  %v2438_v36 = vld [vmem:[#allocation2 + $0x1ae8] sm:$0xff]  ;;  %v2436_v37 = vld [vmem:[#allocation2 + $0x1ad8] sm:$0xff] }
 0x2f8   :  { %5413 = vmatprep.subr.bf16.mxu1 %v5412_v41  ;;  %v4920_v41 = vpack.c.bf16 %v2438_v36, %v2434_v33  ;;  %v5432_v43 = vpack.c.bf16 %v2440_v5, %v2436_v37  ;;  %v2469_v33 = vld [vmem:[#allocation2 + $0x1be0] sm:$0xff]  ;;  %v2467_v36 = vld [vmem:[#allocation2 + $0x1bd0] sm:$0xff] }
 0x2f9   :  { %v2471_v5 = vld [vmem:[#allocation2 + $0x1bf0] sm:$0xff]  ;;  %v4938_v1 = vpack.c.bf16 %v2469_v33, %v2465_v32 }
 0x2fa   :  { %4903 = vmatpush1.bf16.msra.mxu0 %v4902_v45  ;;  %v2442_v45 = vld [vmem:[#allocation2 + $0x1b08] sm:$0xff]  ;;  %v5450_v28 = vpack.c.bf16 %v2471_v5, %v2467_v36  ;;  %v2505_v36 = vld [vmem:[#allocation2 + $0x1d00] sm:$0xff]  ;;  %v2507_v5 = vld [vmem:[#allocation2 + $0x1d10] sm:$0xff] }
 0x2fb   :  { %5415 = vmatpush1.bf16.msra.mxu1 %v5414_v46  ;;  %4905 = vmatprep.subr.bf16.mxu0 %v4904_v47  ;;  %v2446_v46 = vld [vmem:[#allocation2 + $0x1b28] sm:$0xff]  ;;  %v2444_v47 = vld [vmem:[#allocation2 + $0x1b18] sm:$0xff] }
 0x2fc   :  { %5417 = vmatprep.subr.bf16.mxu1 %v5416_v34  ;;  %v4924_v34 = vpack.c.bf16 %v2446_v46, %v2442_v45  ;;  %v5436_v18 = vpack.c.bf16 %v2448_v49, %v2444_v47  ;;  %v2477_v45 = vld [vmem:[#allocation2 + $0x1c20] sm:$0xff]  ;;  %v2475_v46 = vld [vmem:[#allocation2 + $0x1c10] sm:$0xff] }
 0x2fd   :  { %v2479_v49 = vld [vmem:[#allocation2 + $0x1c30] sm:$0xff]  ;;  %v4942_v14 = vpack.c.bf16 %v2477_v45, %v2473_v44 }
 0x2fe   :  { %4907 = vmatpush1.bf16.msra.mxu0 %v4906_v55  ;;  %v2450_v55 = vld [vmem:[#allocation2 + $0x1b48] sm:$0xff]  ;;  %v5454_v50 = vpack.c.bf16 %v2479_v49, %v2475_v46  ;;  %v2513_v46 = vld [vmem:[#allocation2 + $0x1d40] sm:$0xff]  ;;  %v2515_v49 = vld [vmem:[#allocation2 + $0x1d50] sm:$0xff] }
 0x2ff   :  { %5419 = vmatpush1.bf16.msra.mxu1 %v5418_v56  ;;  %4909 = vmatprep.subr.bf16.mxu0 %v4908_v40  ;;  %v2454_v56 = vld [vmem:[#allocation2 + $0x1b68] sm:$0xff]  ;;  %v2452_v40 = vld [vmem:[#allocation2 + $0x1b58] sm:$0xff] }
 0x300   :  { %5421 = vmatprep.subr.bf16.mxu1 %v5420_v2  ;;  %v4928_v2 = vpack.c.bf16 %v2454_v56, %v2450_v55  ;;  %v5440_v7 = vpack.c.bf16 %v2456_v57, %v2452_v40  ;;  %v2485_v55 = vld [vmem:[#allocation2 + $0x1c60] sm:$0xff]  ;;  %v2483_v56 = vld [vmem:[#allocation2 + $0x1c50] sm:$0xff] }
 0x301   :  { %v2487_v57 = vld [vmem:[#allocation2 + $0x1c70] sm:$0xff]  ;;  %v4946_v53 = vpack.c.bf16 %v2485_v55, %v2481_v51 }
 0x302   :  { %4911 = vmatpush1.bf16.msra.mxu0 %v4910_v10  ;;  %v2458_v10 = vld [vmem:[#allocation2 + $0x1b88] sm:$0xff]  ;;  %v5458_v26 = vpack.c.bf16 %v2487_v57, %v2483_v56  ;;  %v2521_v56 = vld [vmem:[#allocation2 + $0x1d80] sm:$0xff]  ;;  %v2523_v57 = vld [vmem:[#allocation2 + $0x1d90] sm:$0xff] }
 0x303   :  { %5423 = vmatpush1.bf16.msra.mxu1 %v5422_v3  ;;  %4913 = vmatprep.subr.bf16.mxu0 %v4912_v4  ;;  %v2462_v3 = vld [vmem:[#allocation2 + $0x1ba8] sm:$0xff]  ;;  %v2460_v4 = vld [vmem:[#allocation2 + $0x1b98] sm:$0xff] }
 0x304   :  { %5425 = vmatprep.subr.bf16.mxu1 %v5424_v16  ;;  %v4932_v16 = vpack.c.bf16 %v2462_v3, %v2458_v10  ;;  %v5444_v13 = vpack.c.bf16 %v2464_v11, %v2460_v4  ;;  %v2493_v10 = vld [vmem:[#allocation2 + $0x1ca0] sm:$0xff]  ;;  %v2491_v3 = vld [vmem:[#allocation2 + $0x1c90] sm:$0xff] }
 0x305   :  { %v2495_v11 = vld [vmem:[#allocation2 + $0x1cb0] sm:$0xff] }
 0x306   :  { %4915 = vmatpush1.bf16.msra.mxu0 %v4914_v19  ;;  %v2466_v19 = vld [vmem:[#allocation2 + $0x1bc8] sm:$0xff]  ;;  %v5462_v54 = vpack.c.bf16 %v2495_v11, %v2491_v3  ;;  %v2529_v3 = vld [vmem:[#allocation2 + $0x1dc0] sm:$0xff]  ;;  %v2531_v11 = vld [vmem:[#allocation2 + $0x1dd0] sm:$0xff] }
 0x307   :  { %5427 = vmatpush1.bf16.msra.mxu1 %v5426_v20  ;;  %4917 = vmatprep.subr.bf16.mxu0 %v4916_v21  ;;  %v2470_v20 = vld [vmem:[#allocation2 + $0x1be8] sm:$0xff]  ;;  %v2468_v21 = vld [vmem:[#allocation2 + $0x1bd8] sm:$0xff] }
 0x308   :  { %5429 = vmatprep.subr.bf16.mxu1 %v5428_v30  ;;  %v4936_v30 = vpack.c.bf16 %v2470_v20, %v2466_v19  ;;  %v5448_v37 = vpack.c.bf16 %v2472_v22, %v2468_v21  ;;  %v2499_v19 = vld [vmem:[#allocation2 + $0x1cd0] sm:$0xff]  ;;  %v2506_v22 = vld [vmem:[#allocation2 + $0x1d08] sm:$0xff] }
 0x309   :  { %v2503_v21 = vld [vmem:[#allocation2 + $0x1cf0] sm:$0xff] }
 0x30a   :  { %4919 = vmatpush1.bf16.msra.mxu0 %v4918_v38  ;;  %v2474_v38 = vld [vmem:[#allocation2 + $0x1c08] sm:$0xff] }
 0x30b   :  { %5431 = vmatpush1.bf16.msra.mxu1 %v5430_v39  ;;  %4921 = vmatprep.subr.bf16.mxu0 %v4920_v41  ;;  %v2478_v39 = vld [vmem:[#allocation2 + $0x1c28] sm:$0xff]  ;;  %v2476_v41 = vld [vmem:[#allocation2 + $0x1c18] sm:$0xff] }
 0x30c   :  { %5433 = vmatprep.subr.bf16.mxu1 %v5432_v43  ;;  %v4940_v43 = vpack.c.bf16 %v2478_v39, %v2474_v38  ;;  %v5452_v47 = vpack.c.bf16 %v2480_v42, %v2476_v41  ;;  %v2511_v39 = vld [vmem:[#allocation2 + $0x1d30] sm:$0xff]  ;;  %v2514_v41 = vld [vmem:[#allocation2 + $0x1d48] sm:$0xff] }
 0x30d   :  { %v2518_v42 = vld [vmem:[#allocation2 + $0x1d68] sm:$0xff]  ;;  %v5470_v44 = vpack.c.bf16 %v2511_v39, %v2507_v5  ;;  %v2545_v5 = vld [vmem:[#allocation2 + $0x1e40] sm:$0xff]  ;;  %v2547_v39 = vld [vmem:[#allocation2 + $0x1e50] sm:$0xff] }
 0x30e   :  { %4923 = vmatpush1.bf16.msra.mxu0 %v4922_v35  ;;  %v2482_v35 = vld [vmem:[#allocation2 + $0x1c48] sm:$0xff]  ;;  %v4960_v45 = vpack.c.bf16 %v2518_v42, %v2514_v41  ;;  %v2551_v42 = vld [vmem:[#allocation2 + $0x1e70] sm:$0xff] }
 0x30f   :  { %5435 = vmatpush1.bf16.msra.mxu1 %v5434_v48  ;;  %4925 = vmatprep.subr.bf16.mxu0 %v4924_v34  ;;  %v2486_v48 = vld [vmem:[#allocation2 + $0x1c68] sm:$0xff]  ;;  %v2484_v34 = vld [vmem:[#allocation2 + $0x1c58] sm:$0xff] }
 0x310   :  { %5437 = vmatprep.subr.bf16.mxu1 %v5436_v18  ;;  %v4944_v18 = vpack.c.bf16 %v2486_v48, %v2482_v35  ;;  %v5456_v40 = vpack.c.bf16 %v2488_v31, %v2484_v34  ;;  %v2519_v48 = vld [vmem:[#allocation2 + $0x1d70] sm:$0xff]  ;;  %v2522_v34 = vld [vmem:[#allocation2 + $0x1d88] sm:$0xff] }
 0x311   :  { %v2526_v31 = vld [vmem:[#allocation2 + $0x1da8] sm:$0xff]  ;;  %v5474_v51 = vpack.c.bf16 %v2519_v48, %v2515_v49  ;;  %v2553_v49 = vld [vmem:[#allocation2 + $0x1e80] sm:$0xff]  ;;  %v2555_v48 = vld [vmem:[#allocation2 + $0x1e90] sm:$0xff] }
 0x312   :  { %4927 = vmatpush1.bf16.msra.mxu0 %v4926_v62  ;;  %v2490_v62 = vld [vmem:[#allocation2 + $0x1c88] sm:$0xff]  ;;  %v4964_v55 = vpack.c.bf16 %v2526_v31, %v2522_v34  ;;  %v2559_v31 = vld [vmem:[#allocation2 + $0x1eb0] sm:$0xff] }
 0x313   :  { %5439 = vmatpush1.bf16.msra.mxu1 %v5438_v63  ;;  %4929 = vmatprep.subr.bf16.mxu0 %v4928_v2  ;;  %v2494_v63 = vld [vmem:[#allocation2 + $0x1ca8] sm:$0xff]  ;;  %v2492_v2 = vld [vmem:[#allocation2 + $0x1c98] sm:$0xff] }
 0x314   :  { %5441 = vmatprep.subr.bf16.mxu1 %v5440_v7  ;;  %v4948_v7 = vpack.c.bf16 %v2494_v63, %v2490_v62  ;;  %v5460_v4 = vpack.c.bf16 %v2496_v6, %v2492_v2  ;;  %v2527_v63 = vld [vmem:[#allocation2 + $0x1db0] sm:$0xff]  ;;  %v2530_v2 = vld [vmem:[#allocation2 + $0x1dc8] sm:$0xff] }
 0x315   :  { %v2534_v6 = vld [vmem:[#allocation2 + $0x1de8] sm:$0xff] }
 0x316   :  { %4931 = vmatpush1.bf16.msra.mxu0 %v4930_v12  ;;  %v2498_v12 = vld [vmem:[#allocation2 + $0x1cc8] sm:$0xff] }
 0x317   :  { %5443 = vmatpush1.bf16.msra.mxu1 %v5442_v15  ;;  %4933 = vmatprep.subr.bf16.mxu0 %v4932_v16  ;;  %v2502_v15 = vld [vmem:[#allocation2 + $0x1ce8] sm:$0xff]  ;;  %v2500_v16 = vld [vmem:[#allocation2 + $0x1cd8] sm:$0xff] }
 0x318   :  { %5445 = vmatprep.subr.bf16.mxu1 %v5444_v13  ;;  %v4952_v8 = vpack.c.bf16 %v2502_v15, %v2498_v12  ;;  %v2497_v13 = vld [vmem:[#allocation2 + $0x1cc0] sm:$0xff]  ;;  %v5464_v20 = vpack.c.bf16 %v2504_v17, %v2500_v16  ;;  %v2535_v15 = vld [vmem:[#allocation2 + $0x1df0] sm:$0xff]  ;;  %v2538_v16 = vld [vmem:[#allocation2 + $0x1e08] sm:$0xff] }
 0x319   :  { %v4954_v32 = vpack.c.bf16 %v2501_v9, %v2497_v13  ;;  %v2542_v17 = vld [vmem:[#allocation2 + $0x1e28] sm:$0xff]  ;;  %v5482_v13 = vpack.c.bf16 %v2535_v15, %v2531_v11  ;;  %v2569_v11 = vld [vmem:[#allocation2 + $0x1f00] sm:$0xff]  ;;  %v2571_v15 = vld [vmem:[#allocation2 + $0x1f10] sm:$0xff] }
 0x31a   :  { %4935 = vmatpush1.bf16.msra.mxu0 %v4934_v24  ;;  %v2510_v24 = vld [vmem:[#allocation2 + $0x1d28] sm:$0xff]  ;;  %v4972_v9 = vpack.c.bf16 %v2542_v17, %v2538_v16  ;;  %v2575_v17 = vld [vmem:[#allocation2 + $0x1f30] sm:$0xff] }
 0x31b   :  { %5447 = vmatpush1.bf16.msra.mxu1 %v5446_v29  ;;  %4937 = vmatprep.subr.bf16.mxu0 %v4936_v30  ;;  %v2508_v29 = vld [vmem:[#allocation2 + $0x1d18] sm:$0xff]  ;;  %v4956_v33 = vpack.c.bf16 %v2510_v24, %v2506_v22  ;;  %v2543_v24 = vld [vmem:[#allocation2 + $0x1e30] sm:$0xff] }
 0x31c   :  { %5449 = vmatprep.subr.bf16.mxu1 %v5448_v37  ;;  %v2512_v30 = vld [vmem:[#allocation2 + $0x1d38] sm:$0xff]  ;;  %v2509_v37 = vld [vmem:[#allocation2 + $0x1d20] sm:$0xff] }
 0x31d   :  { %v5468_v38 = vpack.c.bf16 %v2512_v30, %v2508_v29  ;;  %v2546_v29 = vld [vmem:[#allocation2 + $0x1e48] sm:$0xff] }
 0x31e   :  { %4939 = vmatpush1.bf16.msra.mxu0 %v4938_v1  ;;  %v2516_v1 = vld [vmem:[#allocation2 + $0x1d58] sm:$0xff]  ;;  %v2550_v30 = vld [vmem:[#allocation2 + $0x1e68] sm:$0xff] }
 0x31f   :  { %5451 = vmatpush1.bf16.msra.mxu1 %v5450_v28  ;;  %4941 = vmatprep.subr.bf16.mxu0 %v4940_v43  ;;  %v2520_v28 = vld [vmem:[#allocation2 + $0x1d78] sm:$0xff]  ;;  %v4958_v43 = vpack.c.bf16 %v2509_v37, %v2505_v36  ;;  %v4976_v37 = vpack.c.bf16 %v2550_v30, %v2546_v29  ;;  %v2583_v30 = vld [vmem:[#allocation2 + $0x1f70] sm:$0xff] }
 0x320   :  { %5453 = vmatprep.subr.bf16.mxu1 %v5452_v47  ;;  %v2517_v47 = vld [vmem:[#allocation2 + $0x1d60] sm:$0xff]  ;;  %v5472_v35 = vpack.c.bf16 %v2520_v28, %v2516_v1  ;;  %v2554_v1 = vld [vmem:[#allocation2 + $0x1e88] sm:$0xff] }
 0x321   :  { %3115 = vmatmul.mubr.f32.vlgmr.msra.gmra.mrb[8].mxu0 %v6142_v23  ;;  %v2558_v28 = vld [vmem:[#allocation2 + $0x1ea8] sm:$0xff] }
 0x322   :  { %4943 = vmatpush1.bf16.msra.mxu0 %v4942_v14  ;;  %3683 = vmatmul.mubr.f32.vlgmr.msra.gmra.mrb[8].mxu1 %v6142_v23  ;;  %v4950_v23 = vpack.c.bf16 %v2493_v10, %v2489_v52  ;;  %v2524_v14 = vld [vmem:[#allocation2 + $0x1d98] sm:$0xff]  ;;  %v5478_v52 = vpack.c.bf16 %v2527_v63, %v2523_v57  ;;  %v4968_v10 = vpack.c.bf16 %v2534_v6, %v2530_v2  ;;  %v2561_v57 = vld [vmem:[#allocation2 + $0x1ec0] sm:$0xff]  ;;  %v2563_v63 = vld [vmem:[#allocation2 + $0x1ed0] sm:$0xff] }
 0x323   :  { %5455 = vmatpush1.bf16.msra.mxu1 %v5454_v50  ;;  %4945 = vmatprep.subr.bf16.mxu0 %v4944_v18  ;;  %v2528_v50 = vld [vmem:[#allocation2 + $0x1db8] sm:$0xff]  ;;  %v4962_v18 = vpack.c.bf16 %v2517_v47, %v2513_v46  ;;  %v5490_v46 = vpack.c.bf16 %v2551_v42, %v2547_v39  ;;  %v4980_v47 = vpack.c.bf16 %v2558_v28, %v2554_v1  ;;  %v2567_v6 = vld [vmem:[#allocation2 + $0x1ef0] sm:$0xff]  ;;  %v2585_v39 = vld [vmem:[#allocation2 + $0x1f80] sm:$0xff] }
 0x324   :  { %5457 = vmatprep.subr.bf16.mxu1 %v5456_v40  ;;  %3185 = vmatprep.mubr.f32.mxu0 %v6148_v27  ;;  %v2525_v40 = vld [vmem:[#allocation2 + $0x1da0] sm:$0xff]  ;;  %v5476_v62 = vpack.c.bf16 %v2528_v50, %v2524_v14  ;;  %v2562_v14 = vld [vmem:[#allocation2 + $0x1ec8] sm:$0xff]  ;;  %v2587_v42 = vld [vmem:[#allocation2 + $0x1f90] sm:$0xff] }
 0x325   :  { %3753 = vmatprep.mubr.f32.mxu1 %v6148_v27  ;;  %v5466_v27 = vpack.c.bf16 %v2503_v21, %v2499_v19  ;;  %v2537_v19 = vld [vmem:[#allocation2 + $0x1e00] sm:$0xff]  ;;  %v2539_v21 = vld [vmem:[#allocation2 + $0x1e10] sm:$0xff]  ;;  %v2566_v50 = vld [vmem:[#allocation2 + $0x1ee8] sm:$0xff] }
 0x326   :  { %4947 = vmatpush1.bf16.msra.mxu0 %v4946_v53  ;;  %v2532_v53 = vld [vmem:[#allocation2 + $0x1dd8] sm:$0xff]  ;;  %v5486_v36 = vpack.c.bf16 %v2543_v24, %v2539_v21  ;;  %v2577_v21 = vld [vmem:[#allocation2 + $0x1f40] sm:$0xff]  ;;  %v2579_v24 = vld [vmem:[#allocation2 + $0x1f50] sm:$0xff] }
 0x327   :  { %5459 = vmatpush1.bf16.msra.mxu1 %v5458_v26  ;;  %4949 = vmatprep.subr.bf16.mxu0 %v4948_v7  ;;  %v2536_v26 = vld [vmem:[#allocation2 + $0x1df8] sm:$0xff]  ;;  %v4966_v7 = vpack.c.bf16 %v2525_v40, %v2521_v56  ;;  %v5494_v56 = vpack.c.bf16 %v2559_v31, %v2555_v48  ;;  %v4984_v40 = vpack.c.bf16 %v2566_v50, %v2562_v14  ;;  %v2591_v28 = vld [vmem:[#allocation2 + $0x1fb0] sm:$0xff]  ;;  %v2593_v48 = vld [vmem:[#allocation2 + $0x1fc0] sm:$0xff] }
 0x328   :  { %5461 = vmatprep.subr.bf16.mxu1 %v5460_v4  ;;  %v2533_v4 = vld [vmem:[#allocation2 + $0x1de0] sm:$0xff]  ;;  %v5480_v12 = vpack.c.bf16 %v2536_v26, %v2532_v53  ;;  %v2570_v53 = vld [vmem:[#allocation2 + $0x1f08] sm:$0xff]  ;;  %v2595_v31 = vld [vmem:[#allocation2 + $0x1fd0] sm:$0xff] }
 0x329   :  { %v2574_v26 = vld [vmem:[#allocation2 + $0x1f28] sm:$0xff]  ;;  %v2599_v50 = vld [vmem:[#allocation2 + $0x1ff0] sm:$0xff] }
 0x32a   :  { %4951 = vmatpush1.bf16.msra.mxu0 %v4950_v23  ;;  %v2540_v23 = vld [vmem:[#allocation2 + $0x1e18] sm:$0xff] }
 0x32b   :  { %5463 = vmatpush1.bf16.msra.mxu1 %v5462_v54  ;;  %4953 = vmatprep.subr.bf16.mxu0 %v4952_v8  ;;  %v2544_v54 = vld [vmem:[#allocation2 + $0x1e38] sm:$0xff]  ;;  %v4970_v8 = vpack.c.bf16 %v2533_v4, %v2529_v3  ;;  %v5498_v3 = vpack.c.bf16 %v2567_v6, %v2563_v63  ;;  %v4988_v4 = vpack.c.bf16 %v2574_v26, %v2570_v53  ;;  %v3772_v63 = vld [vmem:[#allocation3] sm:$0xff]  ;;  %v3805_v26 = vld [vmem:[#allocation3 + $0x108] sm:$0xff] }
 0x32c   :  { %5465 = vmatprep.subr.bf16.mxu1 %v5464_v20  ;;  %v2541_v20 = vld [vmem:[#allocation2 + $0x1e20] sm:$0xff]  ;;  %v5484_v22 = vpack.c.bf16 %v2544_v54, %v2540_v23  ;;  %v2578_v23 = vld [vmem:[#allocation2 + $0x1f48] sm:$0xff] }
 0x32d   :  { %v2582_v54 = vld [vmem:[#allocation2 + $0x1f68] sm:$0xff]  ;;  %v3804_v6 = vld [vmem:[#allocation3 + $0x100] sm:$0xff] }
 0x32e   :  { %4955 = vmatpush1.bf16.msra.mxu0 %v4954_v32  ;;  %v2548_v32 = vld [vmem:[#allocation2 + $0x1e58] sm:$0xff] }
 0x32f   :  { %5467 = vmatpush1.bf16.msra.mxu1 %v5466_v27  ;;  %4957 = vmatprep.subr.bf16.mxu0 %v4956_v33  ;;  %v2552_v27 = vld [vmem:[#allocation2 + $0x1e78] sm:$0xff]  ;;  %v4974_v33 = vpack.c.bf16 %v2541_v20, %v2537_v19  ;;  %v5502_v19 = vpack.c.bf16 %v2575_v17, %v2571_v15  ;;  %v4992_v20 = vpack.c.bf16 %v2582_v54, %v2578_v23  ;;  %v3774_v15 = vld [vmem:[#allocation3 + $0x10] sm:$0xff] }
 0x330   :  { %5469 = vmatprep.subr.bf16.mxu1 %v5468_v38  ;;  %v2549_v38 = vld [vmem:[#allocation2 + $0x1e60] sm:$0xff]  ;;  %v5488_v41 = vpack.c.bf16 %v2552_v27, %v2548_v32  ;;  %v2586_v32 = vld [vmem:[#allocation2 + $0x1f88] sm:$0xff]  ;;  %v3806_v17 = vld [vmem:[#allocation3 + $0x110] sm:$0xff] }
 0x331   :  { %v2590_v27 = vld [vmem:[#allocation2 + $0x1fa8] sm:$0xff]  ;;  %v3807_v54 = vld [vmem:[#allocation3 + $0x118] sm:$0xff] }
 0x332   :  { %4959 = vmatpush1.bf16.msra.mxu0 %v4958_v43  ;;  %v2556_v43 = vld [vmem:[#allocation2 + $0x1e98] sm:$0xff] }
 0x333   :  { %5471 = vmatpush1.bf16.msra.mxu1 %v5470_v44  ;;  %4961 = vmatprep.subr.bf16.mxu0 %v4960_v45  ;;  %v2560_v44 = vld [vmem:[#allocation2 + $0x1eb8] sm:$0xff]  ;;  %v4978_v45 = vpack.c.bf16 %v2549_v38, %v2545_v5  ;;  %v5506_v5 = vpack.c.bf16 %v2583_v30, %v2579_v24  ;;  %v4996_v38 = vpack.c.bf16 %v2590_v27, %v2586_v32  ;;  %v3776_v24 = vld [vmem:[#allocation3 + $0x20] sm:$0xff]  ;;  %v3809_v27 = vld [vmem:[#allocation3 + $0x128] sm:$0xff] }
 0x334   :  { %5473 = vmatprep.subr.bf16.mxu1 %v5472_v35  ;;  %v2557_v35 = vld [vmem:[#allocation2 + $0x1ea0] sm:$0xff]  ;;  %v5492_v34 = vpack.c.bf16 %v2560_v44, %v2556_v43  ;;  %v2594_v43 = vld [vmem:[#allocation2 + $0x1fc8] sm:$0xff] }
 0x335   :  { %v2598_v44 = vld [vmem:[#allocation2 + $0x1fe8] sm:$0xff]  ;;  %v3808_v30 = vld [vmem:[#allocation3 + $0x120] sm:$0xff] }
 0x336   :  { %4963 = vmatpush1.bf16.msra.mxu0 %v4962_v18  ;;  %v2564_v18 = vld [vmem:[#allocation2 + $0x1ed8] sm:$0xff] }
 0x337   :  { %5475 = vmatpush1.bf16.msra.mxu1 %v5474_v51  ;;  %4965 = vmatprep.subr.bf16.mxu0 %v4964_v55  ;;  %v2568_v51 = vld [vmem:[#allocation2 + $0x1ef8] sm:$0xff]  ;;  %v4982_v55 = vpack.c.bf16 %v2557_v35, %v2553_v49  ;;  %v5510_v49 = vpack.c.bf16 %v2591_v28, %v2587_v42  ;;  %v5000_v35 = vpack.c.bf16 %v2598_v44, %v2594_v43  ;;  %v3796_v44 = vld [vmem:[#allocation3 + $0xc0] sm:$0xff] }
 0x338   :  { %5477 = vmatprep.subr.bf16.mxu1 %v5476_v62  ;;  %v2565_v62 = vld [vmem:[#allocation2 + $0x1ee0] sm:$0xff]  ;;  %v5496_v2 = vpack.c.bf16 %v2568_v51, %v2564_v18  ;;  %v3789_v51 = vld [vmem:[#allocation3 + $0x88] sm:$0xff]  ;;  %v3779_v42 = vld [vmem:[#allocation3 + $0x38] sm:$0xff] }
 0x339   :  { %v3788_v18 = vld [vmem:[#allocation3 + $0x80] sm:$0xff]  ;;  %v3811_v43 = vld [vmem:[#allocation3 + $0x138] sm:$0xff] }
 0x33a   :  { %4967 = vmatpush1.bf16.msra.mxu0 %v4966_v7  ;;  %v2572_v7 = vld [vmem:[#allocation2 + $0x1f18] sm:$0xff] }
 0x33b   :  { %5479 = vmatpush1.bf16.msra.mxu1 %v5478_v52  ;;  %4969 = vmatprep.subr.bf16.mxu0 %v4968_v10  ;;  %v2576_v52 = vld [vmem:[#allocation2 + $0x1f38] sm:$0xff]  ;;  %v4986_v10 = vpack.c.bf16 %v2565_v62, %v2561_v57  ;;  %v5514_v57 = vpack.c.bf16 %v2599_v50, %v2595_v31  ;;  %v5516_v62 = vpack.c.bf16 %v3789_v51, %v3788_v18  ;;  %v3781_v31 = vld [vmem:[#allocation3 + $0x48] sm:$0xff]  ;;  %v3798_v51 = vld [vmem:[#allocation3 + $0xd0] sm:$0xff] }
 0x33c   :  { %5481 = vmatprep.subr.bf16.mxu1 %v5480_v12  ;;  %v2573_v12 = vld [vmem:[#allocation2 + $0x1f20] sm:$0xff]  ;;  %v5500_v16 = vpack.c.bf16 %v2576_v52, %v2572_v7  ;;  %v3790_v7 = vld [vmem:[#allocation3 + $0x90] sm:$0xff]  ;;  %v3791_v52 = vld [vmem:[#allocation3 + $0x98] sm:$0xff] }
 0x33d   :  { %v3813_v18 = vld [vmem:[#allocation3 + $0x148] sm:$0xff] }
 0x33e   :  { %4971 = vmatpush1.bf16.msra.mxu0 %v4970_v8  ;;  %v2580_v8 = vld [vmem:[#allocation2 + $0x1f58] sm:$0xff] }
 0x33f   :  { %5483 = vmatpush1.bf16.msra.mxu1 %v5482_v13  ;;  %4973 = vmatprep.subr.bf16.mxu0 %v4972_v9  ;;  %v2584_v13 = vld [vmem:[#allocation2 + $0x1f78] sm:$0xff]  ;;  %v4990_v9 = vpack.c.bf16 %v2573_v12, %v2569_v11  ;;  %v5550_v11 = vpack.c.bf16 %v3805_v26, %v3804_v6  ;;  %v5520_v12 = vpack.c.bf16 %v3791_v52, %v3790_v7  ;;  %v3814_v26 = vld [vmem:[#allocation3 + $0x150] sm:$0xff] }
 0x340   :  { %5485 = vmatprep.subr.bf16.mxu1 %v5484_v22  ;;  %v2581_v22 = vld [vmem:[#allocation2 + $0x1f60] sm:$0xff]  ;;  %v5504_v29 = vpack.c.bf16 %v2584_v13, %v2580_v8  ;;  %v3793_v13 = vld [vmem:[#allocation3 + $0xa8] sm:$0xff]  ;;  %v3783_v6 = vld [vmem:[#allocation3 + $0x58] sm:$0xff] }
 0x341   :  { %v3792_v8 = vld [vmem:[#allocation3 + $0xa0] sm:$0xff]  ;;  %v3815_v7 = vld [vmem:[#allocation3 + $0x158] sm:$0xff] }
 0x342   :  { %4975 = vmatpush1.bf16.msra.mxu0 %v4974_v33  ;;  %v2588_v33 = vld [vmem:[#allocation2 + $0x1f98] sm:$0xff] }
 0x343   :  { %5487 = vmatpush1.bf16.msra.mxu1 %v5486_v36  ;;  %4977 = vmatprep.subr.bf16.mxu0 %v4976_v37  ;;  %v2592_v36 = vld [vmem:[#allocation2 + $0x1fb8] sm:$0xff]  ;;  %v4994_v37 = vpack.c.bf16 %v2581_v22, %v2577_v21  ;;  %v5554_v21 = vpack.c.bf16 %v3807_v54, %v3806_v17  ;;  %v5524_v22 = vpack.c.bf16 %v3793_v13, %v3792_v8  ;;  %v3785_v17 = vld [vmem:[#allocation3 + $0x68] sm:$0xff]  ;;  %v3816_v8 = vld [vmem:[#allocation3 + $0x160] sm:$0xff] }
 0x344   :  { %5489 = vmatprep.subr.bf16.mxu1 %v5488_v41  ;;  %v2589_v41 = vld [vmem:[#allocation2 + $0x1fa0] sm:$0xff]  ;;  %v5508_v1 = vpack.c.bf16 %v2592_v36, %v2588_v33  ;;  %v3794_v33 = vld [vmem:[#allocation3 + $0xb0] sm:$0xff]  ;;  %v3795_v36 = vld [vmem:[#allocation3 + $0xb8] sm:$0xff] }
 0x345   :  { %v3817_v13 = vld [vmem:[#allocation3 + $0x168] sm:$0xff] }
 0x346   :  { %4979 = vmatpush1.bf16.msra.mxu0 %v4978_v45  ;;  %v2596_v45 = vld [vmem:[#allocation2 + $0x1fd8] sm:$0xff] }
 0x347   :  { %5491 = vmatpush1.bf16.msra.mxu1 %v5490_v46  ;;  %4981 = vmatprep.subr.bf16.mxu0 %v4980_v47  ;;  %v2600_v46 = vld [vmem:[#allocation2 + $0x1ff8] sm:$0xff]  ;;  %v4998_v47 = vpack.c.bf16 %v2589_v41, %v2585_v39  ;;  %v5528_v39 = vpack.c.bf16 %v3795_v36, %v3794_v33  ;;  %v3778_v41 = vld [vmem:[#allocation3 + $0x30] sm:$0xff] }
 0x348   :  { %5493 = vmatprep.subr.bf16.mxu1 %v5492_v34  ;;  %v2597_v34 = vld [vmem:[#allocation2 + $0x1fe0] sm:$0xff]  ;;  %v5512_v14 = vpack.c.bf16 %v2600_v46, %v2596_v45  ;;  %v3797_v45 = vld [vmem:[#allocation3 + $0xc8] sm:$0xff]  ;;  %v3818_v33 = vld [vmem:[#allocation3 + $0x170] sm:$0xff] }
 0x349   :  { %v3828_v46 = vld [vmem:[#allocation3 + $0x1c0] sm:$0xff]  ;;  %v3819_v36 = vld [vmem:[#allocation3 + $0x178] sm:$0xff] }
 0x34a   :  { %4983 = vmatpush1.bf16.msra.mxu0 %v4982_v55  ;;  %v3820_v55 = vld [vmem:[#allocation3 + $0x180] sm:$0xff] }
 0x34b   :  { %5495 = vmatpush1.bf16.msra.mxu1 %v5494_v56  ;;  %4985 = vmatprep.subr.bf16.mxu0 %v4984_v40  ;;  %v3821_v56 = vld [vmem:[#allocation3 + $0x188] sm:$0xff]  ;;  %v5002_v40 = vpack.c.bf16 %v2597_v34, %v2593_v48  ;;  %v5532_v48 = vpack.c.bf16 %v3797_v45, %v3796_v44  ;;  %v3780_v34 = vld [vmem:[#allocation3 + $0x40] sm:$0xff] }
 0x34c   :  { %5497 = vmatprep.subr.bf16.mxu1 %v5496_v2  ;;  %v3773_v2 = vld [vmem:[#allocation3 + $0x8] sm:$0xff]  ;;  %v5548_v53 = vpack.c.bf16 %v3821_v56, %v3820_v55  ;;  %v3799_v55 = vld [vmem:[#allocation3 + $0xd8] sm:$0xff]  ;;  %v3830_v56 = vld [vmem:[#allocation3 + $0x1d0] sm:$0xff] }
 0x34e   :  { %4987 = vmatpush1.bf16.msra.mxu0 %v4986_v10  ;;  %v3822_v10 = vld [vmem:[#allocation3 + $0x190] sm:$0xff] }
 0x34f   :  { %5499 = vmatpush1.bf16.msra.mxu1 %v5498_v3  ;;  %4989 = vmatprep.subr.bf16.mxu0 %v4988_v4  ;;  %v3823_v3 = vld [vmem:[#allocation3 + $0x198] sm:$0xff]  ;;  %v5518_v4 = vpack.c.bf16 %v3773_v2, %v3772_v63  ;;  %v5536_v63 = vpack.c.bf16 %v3799_v55, %v3798_v51  ;;  %v3782_v2 = vld [vmem:[#allocation3 + $0x50] sm:$0xff] }
 0x350   :  { %5501 = vmatprep.subr.bf16.mxu1 %v5500_v16  ;;  %v3775_v16 = vld [vmem:[#allocation3 + $0x18] sm:$0xff]  ;;  %v5552_v23 = vpack.c.bf16 %v3823_v3, %v3822_v10  ;;  %v5538_v52 = vpack.c.bf16 %v3783_v6, %v3782_v2  ;;  %v5570_v10 = vpack.c.bf16 %v3815_v7, %v3814_v26  ;;  %v3800_v3 = vld [vmem:[#allocation3 + $0xe0] sm:$0xff]  ;;  %v3989_v26 = vld [vmem:[#allocation3 + $0x248] sm:$0xff] }
 0x351   :  { %v3987_v2 = vld [vmem:[#allocation3 + $0x238] sm:$0xff] }
 0x352   :  { %4991 = vmatpush1.bf16.msra.mxu0 %v4990_v9  ;;  %v3824_v9 = vld [vmem:[#allocation3 + $0x1a0] sm:$0xff] }
 0x353   :  { %5503 = vmatpush1.bf16.msra.mxu1 %v5502_v19  ;;  %4993 = vmatprep.subr.bf16.mxu0 %v4992_v20  ;;  %v3825_v19 = vld [vmem:[#allocation3 + $0x1a8] sm:$0xff]  ;;  %v5522_v20 = vpack.c.bf16 %v3775_v16, %v3774_v15  ;;  %v3784_v16 = vld [vmem:[#allocation3 + $0x60] sm:$0xff] }
 0x354   :  { %5505 = vmatprep.subr.bf16.mxu1 %v5504_v29  ;;  %v3777_v29 = vld [vmem:[#allocation3 + $0x28] sm:$0xff]  ;;  %v5556_v32 = vpack.c.bf16 %v3825_v19, %v3824_v9  ;;  %v5542_v54 = vpack.c.bf16 %v3785_v17, %v3784_v16  ;;  %v5574_v9 = vpack.c.bf16 %v3817_v13, %v3816_v8  ;;  %v3802_v19 = vld [vmem:[#allocation3 + $0xf0] sm:$0xff]  ;;  %v3995_v16 = vld [vmem:[#allocation3 + $0x278] sm:$0xff] }
 0x355   :  { %v3833_v15 = vld [vmem:[#allocation3 + $0x1e8] sm:$0xff]  ;;  %v4072_v8 = vld [vmem:[#allocation3 + $0x290] sm:$0xff] }
 0x356   :  { %4995 = vmatpush1.bf16.msra.mxu0 %v4994_v37  ;;  %v3826_v37 = vld [vmem:[#allocation3 + $0x1b0] sm:$0xff] }
 0x357   :  { %5507 = vmatpush1.bf16.msra.mxu1 %v5506_v5  ;;  %4997 = vmatprep.subr.bf16.mxu0 %v4996_v38  ;;  %v3827_v5 = vld [vmem:[#allocation3 + $0x1b8] sm:$0xff]  ;;  %v5526_v38 = vpack.c.bf16 %v3777_v29, %v3776_v24  ;;  %v3786_v29 = vld [vmem:[#allocation3 + $0x70] sm:$0xff] }
 0x358   :  { %5509 = vmatprep.subr.bf16.mxu1 %v5508_v1  ;;  %v3810_v1 = vld [vmem:[#allocation3 + $0x130] sm:$0xff]  ;;  %v5560_v28 = vpack.c.bf16 %v3827_v5, %v3826_v37  ;;  %v3835_v24 = vld [vmem:[#allocation3 + $0x1f8] sm:$0xff]  ;;  %v5578_v37 = vpack.c.bf16 %v3819_v36, %v3818_v33  ;;  %v5873_v5 = vmov 0.0|0.0  }
 0x359   :  { %v4080_v33 = vld [vmem:[#allocation3 + $0x2d0] sm:$0xff]  ;;  %v4081_v36 = vld [vmem:[#allocation3 + $0x2d8] sm:$0xff] }
 0x35a   :  { %4999 = vmatpush1.bf16.msra.mxu0 %v4998_v47  ;;  %v3829_v47 = vld [vmem:[#allocation3 + $0x1c8] sm:$0xff] }
 0x35b   :  { %5511 = vmatpush1.bf16.msra.mxu1 %v5510_v49  ;;  %5001 = vmatprep.subr.bf16.mxu0 %v5000_v35  ;;  %v5530_v49 = vpack.c.bf16 %v3779_v42, %v3778_v41  ;;  %v5562_v35 = vpack.c.bf16 %v3811_v43, %v3810_v1  ;;  %v5564_v50 = vpack.c.bf16 %v3829_v47, %v3828_v46 }
 0x35c   :  { %5513 = vmatprep.subr.bf16.mxu1 %v5512_v14  ;;  %v3812_v14 = vld [vmem:[#allocation3 + $0x140] sm:$0xff] }
 0x35e   :  { %5003 = vmatpush1.bf16.msra.mxu0 %v5002_v40  ;;  %v3831_v40 = vld [vmem:[#allocation3 + $0x1d8] sm:$0xff] }
 0x35f   :  { %5515 = vmatpush1.bf16.msra.mxu1 %v5514_v57  ;;  %5517 = vmatprep.subr.bf16.mxu0 %v5516_v62  ;;  %v5534_v57 = vpack.c.bf16 %v3781_v31, %v3780_v34  ;;  %v5566_v62 = vpack.c.bf16 %v3813_v18, %v3812_v14  ;;  %v3982_v14 = vld [vmem:[#allocation3 + $0x210] sm:$0xff] }
 0x360   :  { %5549 = vmatprep.subr.bf16.mxu1 %v5548_v53  ;;  %v5568_v53 = vpack.c.bf16 %v3831_v40, %v3830_v56  ;;  %v3984_v40 = vld [vmem:[#allocation3 + $0x220] sm:$0xff] }
 0x361   :  { %3186 = vmatmul.mubr.f32.vlgmr.msra.gmra.mrb[8].mxu0 %v6144_v25 }
 0x362   :  { %3754 = vmatmul.mubr.f32.vlgmr.msra.gmra.mrb[8].mxu1 %v6144_v25  ;;  %5519 = vmatpush3.bf16.msra.mxu0 %v5518_v4  ;;  %v5558_v25 = vpack.c.bf16 %v3809_v27, %v3808_v30  ;;  %v3801_v4 = vld [vmem:[#allocation3 + $0xe8] sm:$0xff]  ;;  %v3787_v30 = vld [vmem:[#allocation3 + $0x78] sm:$0xff] }
 0x363   :  { %5551 = vmatpush3.bf16.msra.mxu1 %v5550_v11  ;;  %5521 = vmatprep.subr.bf16.mxu0 %v5520_v12  ;;  %v3832_v11 = vld [vmem:[#allocation3 + $0x1e0] sm:$0xff]  ;;  %v5540_v12 = vpack.c.bf16 %v3801_v4, %v3800_v3  ;;  %v5546_v27 = vpack.c.bf16 %v3787_v30, %v3786_v29  ;;  %v4077_v29 = vld [vmem:[#allocation3 + $0x2b8] sm:$0xff] }
 0x364   :  { %5553 = vmatprep.subr.bf16.mxu1 %v5552_v23  ;;  %v5572_v23 = vpack.c.bf16 %v3833_v15, %v3832_v11  ;;  %v3992_v4 = vld [vmem:[#allocation3 + $0x260] sm:$0xff]  ;;  %v3993_v11 = vld [vmem:[#allocation3 + $0x268] sm:$0xff]  ;;  %v3994_v15 = vld [vmem:[#allocation3 + $0x270] sm:$0xff] }
 0x365   :  { %v5602_v17 = vpack.c.bf16 %v3995_v16, %v3994_v15 }
 0x366   :  { %5523 = vmatpush3.bf16.msra.mxu0 %v5522_v20  ;;  %v3803_v20 = vld [vmem:[#allocation3 + $0xf8] sm:$0xff] }
 0x367   :  { %5555 = vmatpush3.bf16.msra.mxu1 %v5554_v21  ;;  %5525 = vmatprep.subr.bf16.mxu0 %v5524_v22  ;;  %v3834_v21 = vld [vmem:[#allocation3 + $0x1f0] sm:$0xff]  ;;  %v5544_v22 = vpack.c.bf16 %v3803_v20, %v3802_v19  ;;  %v4074_v20 = vld [vmem:[#allocation3 + $0x2a0] sm:$0xff] }
 0x368   :  { %5557 = vmatprep.subr.bf16.mxu1 %v5556_v32  ;;  %v5576_v32 = vpack.c.bf16 %v3835_v24, %v3834_v21  ;;  %v4075_v21 = vld [vmem:[#allocation3 + $0x2a8] sm:$0xff]  ;;  %v4076_v24 = vld [vmem:[#allocation3 + $0x2b0] sm:$0xff] }
 0x369   :  { %v5614_v30 = vpack.c.bf16 %v4077_v29, %v4076_v24 }
 0x36a   :  { %5527 = vmatpush3.bf16.msra.mxu0 %v5526_v38  ;;  %v2602_v38 = vld [vmem:[#allocation11 + $0x182] ss:$8 sm:$0xf] }
 0x36b   :  { %5559 = vmatpush3.bf16.msra.mxu1 %v5558_v25  ;;  %5529 = vmatprep.subr.bf16.mxu0 %v5528_v39  ;;  %v2607_v25 = vrot.slane %v2602_v38, %v6087_v58  ;;  %v2615_v39 = vrot.slane %v2602_v38, %v6090_v59  ;;  %v2611_v41 = vrot.slane %v2602_v38, %v6093_v60 }
 0x36c   :  { %5561 = vmatprep.subr.bf16.mxu1 %v5560_v28  ;;  %v2619_v42 = vrot.slane %v2602_v38, %v6096_v61  ;;  %v4082_v38 = vld [vmem:[#allocation3 + $0x2e0] sm:$0xff] }
 0x36e   :  { %5531 = vmatpush3.bf16.msra.mxu0 %v5530_v49  ;;  %v3980_v49 = vld [vmem:[#allocation3 + $0x200] sm:$0xff] }
 0x36f   :  { %5563 = vmatpush3.bf16.msra.mxu1 %v5562_v35  ;;  %5533 = vmatprep.subr.bf16.mxu0 %v5532_v48  ;;  %v3981_v35 = vld [vmem:[#allocation3 + $0x208] sm:$0xff] }
 0x370   :  { %5565 = vmatprep.subr.bf16.mxu1 %v5564_v50  ;;  %v5581_v60 = vpack.c.bf16 %v3981_v35, %v3980_v49  ;;  %v3983_v50 = vld [vmem:[#allocation3 + $0x218] sm:$0xff] }
 0x371   :  { %v5584_v56 = vpack.c.bf16 %v3983_v50, %v3982_v14  ;;  %v4086_v50 = vld [vmem:[#allocation11 + $0x185] ss:$0 sm:$0xff] }
 0x372   :  { %5535 = vmatpush3.bf16.msra.mxu0 %v5534_v57  ;;  %v3985_v57 = vld [vmem:[#allocation3 + $0x228] sm:$0xff] }
 0x373   :  { %5567 = vmatpush3.bf16.msra.mxu1 %v5566_v62  ;;  %5537 = vmatprep.subr.bf16.mxu0 %v5536_v63  ;;  %v5587_v62 = vpack.c.bf16 %v3985_v57, %v3984_v40  ;;  %v3986_v63 = vld [vmem:[#allocation3 + $0x230] sm:$0xff] }
 0x374   :  { %5569 = vmatprep.subr.bf16.mxu1 %v5568_v53  ;;  %v5590_v6 = vpack.c.bf16 %v3987_v2, %v3986_v63  ;;  %v3988_v53 = vld [vmem:[#allocation3 + $0x240] sm:$0xff] }
 0x375   :  { %v5593_v7 = vpack.c.bf16 %v3989_v26, %v3988_v53 }
 0x376   :  { %5539 = vmatpush3.bf16.msra.mxu0 %v5538_v52  ;;  %v3990_v52 = vld [vmem:[#allocation3 + $0x250] sm:$0xff] }
 0x377   :  { %5571 = vmatpush3.bf16.msra.mxu1 %v5570_v10  ;;  %5541 = vmatprep.subr.bf16.mxu0 %v5540_v12  ;;  %v3991_v10 = vld [vmem:[#allocation3 + $0x258] sm:$0xff]  ;;  %v5599_v12 = vpack.c.bf16 %v3993_v11, %v3992_v4 }
 0x378   :  { %5573 = vmatprep.subr.bf16.mxu1 %v5572_v23  ;;  %v5596_v3 = vpack.c.bf16 %v3991_v10, %v3990_v52  ;;  %v4070_v23 = vld [vmem:[#allocation3 + $0x280] sm:$0xff] }
 0x37a   :  { %5543 = vmatpush3.bf16.msra.mxu0 %v5542_v54  ;;  %v4071_v54 = vld [vmem:[#allocation3 + $0x288] sm:$0xff] }
 0x37b   :  { %5575 = vmatpush3.bf16.msra.mxu1 %v5574_v9  ;;  %5545 = vmatprep.subr.bf16.mxu0 %v5544_v22  ;;  %v5605_v13 = vpack.c.bf16 %v4071_v54, %v4070_v23  ;;  %v4073_v9 = vld [vmem:[#allocation3 + $0x298] sm:$0xff]  ;;  %v5611_v22 = vpack.c.bf16 %v4075_v21, %v4074_v20 }
 0x37c   :  { %5577 = vmatprep.subr.bf16.mxu1 %v5576_v32  ;;  %v5608_v19 = vpack.c.bf16 %v4073_v9, %v4072_v8  ;;  %v4079_v32 = vld [vmem:[#allocation3 + $0x2c8] sm:$0xff] }
 0x37e   :  { %5547 = vmatpush3.bf16.msra.mxu0 %v5546_v27 }
 0x37f   :  { %5579 = vmatpush3.bf16.msra.mxu1 %v5578_v37  ;;  %5580 = vmatprep.subr.bf16.mxu0 %v5873_v5  ;;  %v5620_v37 = vpack.c.bf16 %v4081_v36, %v4080_v33 }
 0x380   :  { %5604 = vmatprep.subr.bf16.mxu1 %v5873_v5 }
 0x434   :  { %v3187_v1 = vpop.f32.mrb[8].mxu0 }
 0x435   :  { %v5628_v28 = vadd.f32 %v3187_v1, %v2607_v25  ;;  %v3755_v43 = vpop.f32.mrb[8].mxu1  ;;  %v3189_v44 = vpop.f32.mrb[9].mxu0  ;;  %v4083_v25 = vld [vmem:[#allocation3 + $0x2e8] sm:$0xff] }
 0x436   :  { %v5630_v45 = vadd.f32 %v3755_v43, %v2615_v39  ;;  %v5629_v46 = vadd.f32 %v3189_v44, %v2611_v41  ;;  %v3757_v47 = vpop.f32.mrb[9].mxu1  ;;  %v5623_v39 = vpack.c.bf16 %v4083_v25, %v4082_v38  ;;  %v3836_v1 = vld [vmem:[#allocation11 + $0x183] ss:$0 sm:$0xff] }
 0x437   :  { %v3764_v48 = vmul.f32 0.2, %v5628_v28  ;;  %v5631_v34 = vadd.f32 %v3757_v47, %v2619_v42  ;;  %vm3760_vm6 = vcmp.ge.f32.partialorder %v5628_v28, 0.0 }
 0x438   :  { %v3766_v31 = vmul.f32 0.2, %v5630_v45  ;;  %v3765_v58 = vmul.f32 0.2, %v5629_v46  ;;  %vm3761_vm7 = vcmp.ge.f32.partialorder %v5629_v46, 0.0  ;;  %vm3762_vm8 = vcmp.ge.f32.partialorder %v5630_v45, 0.0 }
 0x439   :  { %v3767_v59 = vmul.f32 0.2, %v5631_v34  ;;  %vm3763_vm9 = vcmp.ge.f32.partialorder %v5631_v34, 0.0  ;;  %v3768_v51 = vsel %vm3760_vm6, %v5628_v28, %v3764_v48  ;;  %v4084_v48 = vld [vmem:[#allocation3 + $0x2f0] sm:$0xff] }
 0x43a   :  { %v3769_v61 = vsel %vm3761_vm7, %v5629_v46, %v3765_v58  ;;  %v3770_v55 = vsel %vm3762_vm8, %v5630_v45, %v3766_v31  ;;  %v3996_v58 = vld [vmem:[#allocation11 + $0x184] ss:$0 sm:$0xff] }
 0x43b   :  { %3901 = vmatprep.mubr.f32.mxu0 %v3769_v61  ;;  %v3771_v18 = vsel %vm3763_vm9, %v5631_v34, %v3767_v59  ;;  %v4085_v34 = vld [vmem:[#allocation3 + $0x2f8] sm:$0xff] }
 0x43c   :  { %3971 = vmatprep.mubr.f32.mxu1 %v3771_v18  ;;  %3902 = vmatmul.mubr.f32.vlgmr.msra.gmra.mrb[10].mxu0 %v3768_v51  ;;  %v5626_v31 = vpack.c.bf16 %v4085_v34, %v4084_v48 }
 0x43d   :  { %3972 = vmatmul.mubr.f32.vlgmr.msra.gmra.mrb[10].mxu1 %v3770_v55  ;;  %5582 = vmatpush3.bf16.msra.mxu0 %v5581_v60 }
 0x43e   :  { %5583 = vmatprep.subr.bf16.mxu0 %v5873_v5  ;;  %4374 = vmatprep.mubr.msk.f32.mxu0 %vm5874_vm10, %v5869_v0 }
 0x43f   :  { %4409 = vmatprep.mubr.msk.f32.mxu1 %vm5874_vm10, %v5869_v0  ;;  %5606 = vmatpush3.bf16.msra.mxu1 %v5605_v13  ;;  %v4078_v0 = vld [vmem:[#allocation3 + $0x2c0] sm:$0xff] }
 0x440   :  { %5607 = vmatprep.subr.bf16.mxu1 %v5873_v5  ;;  %v5617_v27 = vpack.c.bf16 %v4079_v32, %v4078_v0 }
 0x441   :  { %5585 = vmatpush3.bf16.msra.mxu0 %v5584_v56 }
 0x442   :  { %5586 = vmatprep.subr.bf16.mxu0 %v5873_v5 }
 0x443   :  { %5609 = vmatpush3.bf16.msra.mxu1 %v5608_v19 }
 0x444   :  { %5610 = vmatprep.subr.bf16.mxu1 %v5873_v5 }
 0x445   :  { %5588 = vmatpush3.bf16.msra.mxu0 %v5587_v62 }
 0x446   :  { %5589 = vmatprep.subr.bf16.mxu0 %v5873_v5 }
 0x447   :  { %5612 = vmatpush3.bf16.msra.mxu1 %v5611_v22 }
 0x448   :  { %5613 = vmatprep.subr.bf16.mxu1 %v5873_v5 }
 0x449   :  { %5591 = vmatpush3.bf16.msra.mxu0 %v5590_v6 }
 0x44a   :  { %5592 = vmatprep.subr.bf16.mxu0 %v5873_v5 }
 0x44b   :  { %5615 = vmatpush3.bf16.msra.mxu1 %v5614_v30 }
 0x44c   :  { %5616 = vmatprep.subr.bf16.mxu1 %v5873_v5 }
 0x44d   :  { %5594 = vmatpush3.bf16.msra.mxu0 %v5593_v7 }
 0x44e   :  { %5595 = vmatprep.subr.bf16.mxu0 %v5873_v5 }
 0x44f   :  { %5618 = vmatpush3.bf16.msra.mxu1 %v5617_v27 }
 0x450   :  { %5619 = vmatprep.subr.bf16.mxu1 %v5873_v5 }
 0x451   :  { %5597 = vmatpush3.bf16.msra.mxu0 %v5596_v3 }
 0x452   :  { %5598 = vmatprep.subr.bf16.mxu0 %v5873_v5 }
 0x453   :  { %5621 = vmatpush3.bf16.msra.mxu1 %v5620_v37 }
 0x454   :  { %5622 = vmatprep.subr.bf16.mxu1 %v5873_v5 }
 0x455   :  { %5600 = vmatpush3.bf16.msra.mxu0 %v5599_v12 }
 0x456   :  { %5601 = vmatprep.subr.bf16.mxu0 %v5873_v5 }
 0x457   :  { %5624 = vmatpush3.bf16.msra.mxu1 %v5623_v39 }
 0x458   :  { %5625 = vmatprep.subr.bf16.mxu1 %v5873_v5 }
 0x459   :  { %5603 = vmatpush3.bf16.msra.mxu0 %v5602_v17 }
 0x45b   :  { %5627 = vmatpush3.bf16.msra.mxu1 %v5626_v31 }
 0x50f   :  { %v4270_v41 = vpop.f32.mrb[10].mxu0 }
 0x510   :  { %v4305_v42 = vpop.f32.mrb[10].mxu1  ;;  %v4271_v28 = vpop.f32.mrb[11].mxu0 }
 0x511   :  { %v4272_v43 = vadd.f32 %v4271_v28, %v4270_v41  ;;  %v4306_v44 = vpop.f32.mrb[11].mxu1 }
 0x512   :  { %v4307_v45 = vadd.f32 %v4306_v44, %v4305_v42 }
 0x513   :  { %v3904_v46 = vadd.f32 %v4272_v43, %v3836_v1 }
 0x515   :  { %v3974_v47 = vadd.f32 %v4307_v45, %v3904_v46 }
 0x517   :  { %v3978_v49 = vmul.f32 0.2, %v3974_v47  ;;  %vm3977_vm11 = vcmp.ge.f32.partialorder %v3974_v47, 0.0 }
 0x519   :  { %v3979_v35 = vsel %vm3977_vm11, %v3974_v47, %v3978_v49 }
 0x51a   :  { %4375 = vmatmul.mubr.f32.vlgmr.msra.gmra.mrb[12].mxu0 %v3979_v35 }
 0x5ed   :  { %v4063_v59 = vpop.f32.mrb[12].mxu0 }
 0x5ee   :  { %v4064_v5 = vadd.f32 %v4063_v59, %v3996_v58  ;;  %v4376_v60 = vpop.f32.mrb[13].mxu0 }
 0x5f0   :  { %vm4067_vm12 = vcmp.ge.f32.partialorder %v4064_v5, 0.0  ;;  %v4068_v61 = vmul.f32 0.2, %v4064_v5 }
 0x5f2   :  { %v4069_v14 = vsel %vm4067_vm12, %v4064_v5, %v4068_v61 }
 0x5f3   :  { %4410 = vmatmul.mubr.f32.vlgmr.msra.gmra.mrb[12].mxu1 %v4069_v14 }
 0x6c6   :  { %v4153_v18 = vpop.f32.mrb[12].mxu1 }
 0x6c7   :  { %v4154_v51 = vadd.f32 %v4153_v18, %v4086_v50  ;;  %v4411_v55 = vpop.f32.mrb[13].mxu1 }
 0x6c9   :  { %4157 = vst [vmem:[#allocation13] sm:$0xf] %v4154_v51 }
 0x6ca   :  { %5840 = shalt.err (!%p5837_p10)
}
 0x6cb   :  { %s5841_s1 = scalar_lea.hbm %s6222_s6, 64 }
 0x6cc   :  { %p5842_p11 = scmp.ne.s32.totalorder %s6222_s6, %s5841_s1  ;;  %p5845_p12 = scmp.lt.u32.totalorder %s5841_s1, %s6222_s6 }
 0x6ce   :  { %p5847_p13 = pnand %p5845_p12, %p5842_p11 }
 0x6d0   :  { %5850 = shalt.err (!%p5847_p13)
}
 0x6d1   :  { %4167 = dma.vmem_to_hbm [thread:$0]  %s4165_s16, 64, %s6222_s6, [#allocation7]  }
 0x6d2   :  { %5861 = dma.done.wait [#allocation7], 64  }
 0x6d3   :  { %5862 = vsyncadd [#allocation7], 4294967232 }
 0x6d4   :  { %4171 = vsyncpa [#allocation6], 1 }
 0x6d5   :  { %4172 = vsyncpa [#allocation9], 1 }
 0x6d6   :  { %4173 = vsyncpa [#allocation12], 1 }
 0x6d7   :  { %4174 = vsyncpa [#allocation7], 1 }
 0x6d8   :  { %4175 = vsyncmov [#allocation4] }
 0x6db   :  { %s4176_s25 = vpop.sfrf %4175 }
 0x6dc   :  { %p4236_p0 = scmp.ne.s32.totalorder %s4176_s25, 0 }
 0x6de   :  { %4180 = shalt.err (%p4236_p0)  }
 0x6df   :  { %4182 = vsyncmov [#allocation4 + $0x1] }
 0x6e2   :  { %s4183_s26 = vpop.sfrf %4182 }
 0x6e3   :  { %p4237_p1 = scmp.ne.s32.totalorder %s4183_s26, 0 }
 0x6e5   :  { %4187 = shalt.err (%p4237_p1)  }

</bundles_post_ra>
